<compile_context>
chip_gen: v5e
topology: v5e:2x2
jax: 0.10.0
libtpu: 0.0.40
codegen_flags: <defaults>
</compile_context>

<pallas_src>
import jax
import jax.numpy as jnp
from jax.experimental import pallas as pl
from jax.experimental.pallas import tpu as pltpu


# ----------------------------------------------------------------------------
# Kernel
# ----------------------------------------------------------------------------
def _block_kernel(x_ref,
                  w1_ref, s1_ref, t1_ref,
                  w2_ref, s2_ref, t2_ref,
                  wse1_ref, bse1_ref, wse2_ref, bse2_ref,
                  o_ref,
                  pad_ref, col_ref):
    # x_ref   : (B*H*W, C)  input tokens (NHWC batch tile flattened); also the
    #                       residual branch
    # w1/w2   : (9*C, C)    bf16 im2col conv weights, row = tap*C + c_in
    # s*/t*   : (1, C)      folded conv-bias + BatchNorm scale / shift (f32)
    # wse1    : (C, Cr), bse1: (1, Cr), wse2: (Cr, C), bse2: (1, C)   (f32)
    # o_ref   : (B*H*W, C)
    # pad_ref : VMEM (B, H+2, W+2, C) f32 -- shared padded buffer (both convs)
    # col_ref : VMEM (B*H*W, 9*C) f32     -- im2col patch slab
    B, Hp2, Wp2, C = pad_ref.shape
    H, W = Hp2 - 2, Wp2 - 2
    M = B * H * W

    # Zero only the 1-pixel border (the interior is fully overwritten below).
    # Done every step rather than under pl.when(program_id == 0) so the kernel
    # remains correct when the "parallel" batch axis is sharded across cores.
    zrow = jnp.zeros((B, 1, Wp2, C), pad_ref.dtype)
    zcol = jnp.zeros((B, Hp2, 1, C), pad_ref.dtype)
    pad_ref[:, 0:1, :, :] = zrow
    pad_ref[:, H + 1:H + 2, :, :] = zrow
    pad_ref[:, :, 0:1, :] = zcol
    pad_ref[:, :, W + 1:W + 2, :] = zcol

    x = x_ref[...]                                              # (M, C)
    pad_ref[:, 1:H + 1, 1:W + 1, :] = (
        x.reshape(B, H, W, C).astype(pad_ref.dtype))

    def conv3x3(w_ref):
        # im2col: build one (M, 9C) patch slab in VMEM, then a single MXU
        # matmul with contraction depth K = 9C (instead of nine K=C matmuls).
        for t in range(9):
            ky, kx = divmod(t, 3)
            col_ref[:, t * C:(t + 1) * C] = (
                pad_ref[:, ky:ky + H, kx:kx + W, :].reshape(M, C))
        slab = col_ref[...].astype(jnp.bfloat16)                # bf16 MXU operand
        return jnp.dot(slab, w_ref[...],
                       preferred_element_type=jnp.float32)      # (M, C) f32

    # conv1 -> BN1 -> ReLU1   (folded BN, f32 epilogue on the VPU)
    y = jnp.maximum(conv3x3(w1_ref) * s1_ref[...] + t1_ref[...], 0.0)

    # Re-use the same padded scratch for the second conv.
    pad_ref[:, 1:H + 1, 1:W + 1, :] = (
        y.reshape(B, H, W, C).astype(pad_ref.dtype))

    # conv2 -> BN2 -> ReLU2
    z = jnp.maximum(conv3x3(w2_ref) * s2_ref[...] + t2_ref[...], 0.0)

    # Squeeze-and-excite for the whole batch tile at once:
    # avgpool -> 1x1 conv -> SiLU -> 1x1 conv -> sigmoid -> channel gate.
    pooled = jnp.mean(z.reshape(B, H * W, C), axis=1)           # (B, C)
    h = jnp.dot(pooled, wse1_ref[...],
                preferred_element_type=jnp.float32) + bse1_ref[...]
    h = h * jax.nn.sigmoid(h)                                   # SiLU (EUP)
    g = jax.nn.sigmoid(jnp.dot(h, wse2_ref[...],
                               preferred_element_type=jnp.float32)
                       + bse2_ref[...])                         # (B, C)
    z = (z.reshape(B, H * W, C) * g[:, None, :]).reshape(M, C)

    # Residual add and store.
    o_ref[...] = (z + x.astype(jnp.float32)).astype(o_ref.dtype)


# ----------------------------------------------------------------------------
# Wrapper: NCHW in / NCHW out.
# ----------------------------------------------------------------------------
def block_forward(x_nchw, params, *, batch_tile=None):
    N, C, H, W = x_nchw.shape
    Cr = params["wse1"].shape[1]

    # Batch tile = images folded into one grid step.  Per-step VMEM here is
    # tiny; when scaling H/W/C, budget ~2x(in+out block) + scratch + weights
    # and keep it under ~48 MiB on v7x (64 MiB physical VMEM).
    if batch_tile is None:
        batch_tile = max(1, min(N, max(1, 1024 // (H * W))))
    B = batch_tile
    num_tiles = -(-N // B)
    Npad = num_tiles * B

    x = jnp.transpose(x_nchw, (0, 2, 3, 1))                     # NHWC
    if Npad != N:
        x = jnp.pad(x, ((0, Npad - N), (0, 0), (0, 0), (0, 0)))
    x2d = x.reshape(Npad * H * W, C)                            # token view
    Mt = B * H * W

    flops = 2 * (2 * 9 * C * C) * (Npad * H * W) + 2 * (2 * C * Cr) * Npad
    bytes_accessed = (2 * Npad * H * W * C) * 4 + 2 * (9 * C * C) * 2 \
        + (2 * C * Cr + 6 * C + 2 * Cr) * 4
    cost = pl.CostEstimate(flops=flops,
                           transcendentals=Npad * (C + 2 * Cr),
                           bytes_accessed=bytes_accessed)

    # NOTE: parameter blocks are grid-invariant; at realistic C they could also
    # be single-buffered (pipeline_mode=pl.Buffered(1)) to halve their VMEM.
    out2d = pl.pallas_call(
        _block_kernel,
        out_shape=jax.ShapeDtypeStruct((Npad * H * W, C), x.dtype),
        grid_spec=pltpu.PrefetchScalarGridSpec(
            num_scalar_prefetch=0,
            grid=(num_tiles,),
            in_specs=[
                pl.BlockSpec((Mt, C), lambda n: (n, 0)),         # x tokens
                pl.BlockSpec((9 * C, C), lambda n: (0, 0)),      # w1 (bf16)
                pl.BlockSpec((1, C), lambda n: (0, 0)),          # s1
                pl.BlockSpec((1, C), lambda n: (0, 0)),          # t1
                pl.BlockSpec((9 * C, C), lambda n: (0, 0)),      # w2 (bf16)
                pl.BlockSpec((1, C), lambda n: (0, 0)),          # s2
                pl.BlockSpec((1, C), lambda n: (0, 0)),          # t2
                pl.BlockSpec((C, Cr), lambda n: (0, 0)),         # wse1
                pl.BlockSpec((1, Cr), lambda n: (0, 0)),         # bse1
                pl.BlockSpec((Cr, C), lambda n: (0, 0)),         # wse2
                pl.BlockSpec((1, C), lambda n: (0, 0)),          # bse2
            ],
            out_specs=pl.BlockSpec((Mt, C), lambda n: (n, 0)),
            scratch_shapes=[
                pltpu.VMEM((B, H + 2, W + 2, C), jnp.float32),   # padded image
                pltpu.VMEM((Mt, 9 * C), jnp.float32),            # im2col slab
            ],
        ),
        compiler_params=pltpu.CompilerParams(
            dimension_semantics=("parallel",),   # batch tiles are independent
            vmem_limit_bytes=32 * 1024 * 1024),
        cost_estimate=cost,
    )(x2d,
      params["w1"], params["s1"], params["t1"],
      params["w2"], params["s2"], params["t2"],
      params["wse1"], params["bse1"], params["wse2"], params["bse2"])

    out = out2d.reshape(Npad, H, W, C)[:N]
    return jnp.transpose(out, (0, 3, 1, 2))                     # back to NCHW


# ----------------------------------------------------------------------------
# Deterministic synthetic parameters (shapes from Block.__init__) with conv
# bias + BatchNorm (eval mode) folded into per-channel scale/shift; conv
# weights reshaped to im2col layout and cast to bf16 for the MXU.
# ----------------------------------------------------------------------------
def make_params(key, C, rd_ratio=8, eps=1e-5):
    Cr = max(1, C // rd_ratio)
    ks = jax.random.split(key, 10)

    w1 = jax.random.normal(ks[0], (3, 3, C, C), jnp.float32) * 0.1   # HWIO
    b1 = 0.1 * jax.random.normal(ks[1], (C,), jnp.float32)
    w2 = jax.random.normal(ks[2], (3, 3, C, C), jnp.float32) * 0.1
    b2 = 0.1 * jax.random.normal(ks[3], (C,), jnp.float32)

    def bn(k):
        a, b, c_, d = jax.random.split(k, 4)
        gamma = 1.0 + 0.1 * jax.random.normal(a, (C,), jnp.float32)
        beta = 0.1 * jax.random.normal(b, (C,), jnp.float32)
        mean = 0.1 * jax.random.normal(c_, (C,), jnp.float32)
        var = jax.random.uniform(d, (C,), jnp.float32, minval=0.5, maxval=1.5)
        return gamma, beta, mean, var

    g1, be1, m1, v1 = bn(ks[4])
    g2, be2, m2, v2 = bn(ks[5])
    s1 = g1 / jnp.sqrt(v1 + eps)
    t1 = (b1 - m1) * s1 + be1
    s2 = g2 / jnp.sqrt(v2 + eps)
    t2 = (b2 - m2) * s2 + be2

    wse1 = 0.2 * jax.random.normal(ks[6], (C, Cr), jnp.float32)
    bse1 = 0.1 * jax.random.normal(ks[7], (Cr,), jnp.float32)
    wse2 = 0.2 * jax.random.normal(ks[8], (Cr, C), jnp.float32)
    bse2 = 0.1 * jax.random.normal(ks[9], (C,), jnp.float32)

    params = dict(
        w1=w1.reshape(9 * C, C).astype(jnp.bfloat16),
        s1=s1.reshape(1, C), t1=t1.reshape(1, C),
        w2=w2.reshape(9 * C, C).astype(jnp.bfloat16),
        s2=s2.reshape(1, C), t2=t2.reshape(1, C),
        wse1=wse1, bse1=bse1.reshape(1, Cr),
        wse2=wse2, bse2=bse2.reshape(1, C),
    )
    raw = dict(w1=w1, w2=w2,
               s1=s1.reshape(1, C), t1=t1.reshape(1, C),
               s2=s2.reshape(1, C), t2=t2.reshape(1, C),
               wse1=wse1, bse1=bse1, wse2=wse2, bse2=bse2)
    return params, raw


# ----------------------------------------------------------------------------
# Pure-JAX f32 reference (same folded-BN semantics) for the correctness check.
# ----------------------------------------------------------------------------
def reference(x_nchw, raw):
    x = jnp.transpose(x_nchw, (0, 2, 3, 1))  # NHWC

    def conv_bn_relu(h, w_hwio, s, t):
        y = jax.lax.conv_general_dilated(
            h, w_hwio, window_strides=(1, 1), padding=((1, 1), (1, 1)),
            dimension_numbers=("NHWC", "HWIO", "NHWC"))
        return jnp.maximum(y * s + t, 0.0)

    y = conv_bn_relu(x, raw["w1"], raw["s1"], raw["t1"])
    z = conv_bn_relu(y, raw["w2"], raw["s2"], raw["t2"])

    pooled = jnp.mean(z, axis=(1, 2), keepdims=True)                  # (N,1,1,C)
    h = jnp.einsum("nijc,cd->nijd", pooled, raw["wse1"]) + raw["bse1"]
    h = h * jax.nn.sigmoid(h)
    g = jax.nn.sigmoid(jnp.einsum("nijd,dc->nijc", h, raw["wse2"]) + raw["bse2"])
    z = z * g
    return jnp.transpose(z + x, (0, 3, 1, 2))


def _check(out, ref, x):
    assert out.shape == x.shape and out.dtype == x.dtype
    err = float(jnp.max(jnp.abs(out - ref)))
    scale = float(jnp.max(jnp.abs(ref)))
    # bf16 MXU operands vs an f32 reference -> relative tolerance.
    tol = 3e-2 * max(1.0, scale)
    if err > tol:
        raise AssertionError(f"mismatch vs reference: max abs err {err} (tol {tol})")


if __name__ == "__main__":
    key = jax.random.PRNGKey(0)

    # Small config (embed_dim=32, rd_ratio=8): one batch tile, grid=(1,).
    k1, k2, key = jax.random.split(key, 3)
    x = jax.random.normal(k1, (2, 32, 8, 8), jnp.float32)
    params, raw = make_params(k2, 32, rd_ratio=8)
    out = jax.block_until_ready(block_forward(x, params, batch_tile=2))
    _check(out, reference(x, raw), x)

    # Wider config (embed_dim=64) with two batch tiles -> exercises the
    # multi-step "parallel" grid and the persistent padded scratch.
    k1, k2, key = jax.random.split(key, 3)
    x = jax.random.normal(k1, (4, 64, 8, 8), jnp.float32)
    params, raw = make_params(k2, 64, rd_ratio=8)
    out = jax.block_until_ready(block_forward(x, params, batch_tile=2))
    _check(out, reference(x, raw), x)

    print("KERNEL_OK")
</pallas_src>

<mosaic_0001>
module attributes {stable_mosaic.version = 11 : i64} {
  func.func @_block_kernel(%arg0: i32, %arg1: memref<128x32xf32, #tpu.memory_space<vmem>>, %arg2: memref<288x32xbf16, #tpu.memory_space<vmem>>, %arg3: memref<1x32xf32, #tpu.memory_space<vmem>>, %arg4: memref<1x32xf32, #tpu.memory_space<vmem>>, %arg5: memref<288x32xbf16, #tpu.memory_space<vmem>>, %arg6: memref<1x32xf32, #tpu.memory_space<vmem>>, %arg7: memref<1x32xf32, #tpu.memory_space<vmem>>, %arg8: memref<32x4xf32, #tpu.memory_space<vmem>>, %arg9: memref<1x4xf32, #tpu.memory_space<vmem>>, %arg10: memref<4x32xf32, #tpu.memory_space<vmem>>, %arg11: memref<1x32xf32, #tpu.memory_space<vmem>>, %arg12: memref<128x32xf32, #tpu.memory_space<vmem>>, %arg13: memref<2x10x10x32xf32, #tpu.memory_space<vmem>>, %arg14: memref<128x288xf32, #tpu.memory_space<vmem>>) attributes {dimension_semantics = [#tpu.dimension_semantics<parallel>], iteration_bounds = array<i64: 1>, scalar_prefetch = 0 : i64, scratch_operands = 2 : i64, tpu.core_type = #tpu.core_type<tc>, window_params = [{transform_indices = @transform_0, window_bounds = array<i64: 128, 32>}, {pipeline_mode = #tpu.pipeline_mode<synchronous>, transform_indices = @transform_1, window_bounds = array<i64: 288, 32>}, {pipeline_mode = #tpu.pipeline_mode<synchronous>, transform_indices = @transform_2, window_bounds = array<i64: 1, 32>}, {pipeline_mode = #tpu.pipeline_mode<synchronous>, transform_indices = @transform_3, window_bounds = array<i64: 1, 32>}, {pipeline_mode = #tpu.pipeline_mode<synchronous>, transform_indices = @transform_4, window_bounds = array<i64: 288, 32>}, {pipeline_mode = #tpu.pipeline_mode<synchronous>, transform_indices = @transform_5, window_bounds = array<i64: 1, 32>}, {pipeline_mode = #tpu.pipeline_mode<synchronous>, transform_indices = @transform_6, window_bounds = array<i64: 1, 32>}, {pipeline_mode = #tpu.pipeline_mode<synchronous>, transform_indices = @transform_7, window_bounds = array<i64: 32, 4>}, {pipeline_mode = #tpu.pipeline_mode<synchronous>, transform_indices = @transform_8, window_bounds = array<i64: 1, 4>}, {pipeline_mode = #tpu.pipeline_mode<synchronous>, transform_indices = @transform_9, window_bounds = array<i64: 4, 32>}, {pipeline_mode = #tpu.pipeline_mode<synchronous>, transform_indices = @transform_10, window_bounds = array<i64: 1, 32>}, {transform_indices = @transform_11, window_bounds = array<i64: 128, 32>}]} {
    %cst = arith.constant 0.000000e+00 : f32
    %0 = vector.broadcast %cst : f32 to vector<2x1x10x32xf32>
    %cst_0 = arith.constant 0.000000e+00 : f32
    %1 = vector.broadcast %cst_0 : f32 to vector<2x10x1x32xf32>
    %c0 = arith.constant 0 : index
    %c0_1 = arith.constant 0 : index
    %c0_2 = arith.constant 0 : index
    %c0_3 = arith.constant 0 : index
    %2 = vector.load %arg13[%c0, %c0_1, %c0_2, %c0_3] : memref<2x10x10x32xf32, #tpu.memory_space<vmem>>, vector<2x1x10x32xf32>
    tpu.vector_store %arg13[%c0, %c0_1, %c0_2, %c0_3], %0 {strides = array<i32>} : memref<2x10x10x32xf32, #tpu.memory_space<vmem>>, vector<2x1x10x32xf32>,
    %c0_4 = arith.constant 0 : index
    %c9 = arith.constant 9 : index
    %c0_5 = arith.constant 0 : index
    %c0_6 = arith.constant 0 : index
    %3 = vector.load %arg13[%c0_4, %c9, %c0_5, %c0_6] : memref<2x10x10x32xf32, #tpu.memory_space<vmem>>, vector<2x1x10x32xf32>
    tpu.vector_store %arg13[%c0_4, %c9, %c0_5, %c0_6], %0 {strides = array<i32>} : memref<2x10x10x32xf32, #tpu.memory_space<vmem>>, vector<2x1x10x32xf32>,
    %c0_7 = arith.constant 0 : index
    %c0_8 = arith.constant 0 : index
    %c0_9 = arith.constant 0 : index
    %c0_10 = arith.constant 0 : index
    %4 = vector.load %arg13[%c0_7, %c0_8, %c0_9, %c0_10] : memref<2x10x10x32xf32, #tpu.memory_space<vmem>>, vector<2x10x1x32xf32>
    tpu.vector_store %arg13[%c0_7, %c0_8, %c0_9, %c0_10], %1 {strides = array<i32>} : memref<2x10x10x32xf32, #tpu.memory_space<vmem>>, vector<2x10x1x32xf32>,
    %c0_11 = arith.constant 0 : index
    %c0_12 = arith.constant 0 : index
    %c9_13 = arith.constant 9 : index
    %c0_14 = arith.constant 0 : index
    %5 = vector.load %arg13[%c0_11, %c0_12, %c9_13, %c0_14] : memref<2x10x10x32xf32, #tpu.memory_space<vmem>>, vector<2x10x1x32xf32>
    tpu.vector_store %arg13[%c0_11, %c0_12, %c9_13, %c0_14], %1 {strides = array<i32>} : memref<2x10x10x32xf32, #tpu.memory_space<vmem>>, vector<2x10x1x32xf32>,
    %c0_15 = arith.constant 0 : index
    %c0_16 = arith.constant 0 : index
    %6 = vector.load %arg1[%c0_15, %c0_16] : memref<128x32xf32, #tpu.memory_space<vmem>>, vector<128x32xf32>
    %7 = vector.shape_cast %6 : vector<128x32xf32> to vector<2x8x8x32xf32>
    %c0_17 = arith.constant 0 : index
    %c1 = arith.constant 1 : index
    %c1_18 = arith.constant 1 : index
    %c0_19 = arith.constant 0 : index
    %8 = vector.load %arg13[%c0_17, %c1, %c1_18, %c0_19] : memref<2x10x10x32xf32, #tpu.memory_space<vmem>>, vector<2x8x8x32xf32>
    tpu.vector_store %arg13[%c0_17, %c1, %c1_18, %c0_19], %7 {strides = array<i32>} : memref<2x10x10x32xf32, #tpu.memory_space<vmem>>, vector<2x8x8x32xf32>,
    %c0_20 = arith.constant 0 : index
    %c0_21 = arith.constant 0 : index
    %c0_22 = arith.constant 0 : index
    %c0_23 = arith.constant 0 : index
    %9 = vector.load %arg13[%c0_20, %c0_21, %c0_22, %c0_23] : memref<2x10x10x32xf32, #tpu.memory_space<vmem>>, vector<2x8x8x32xf32>
    %10 = vector.shape_cast %9 : vector<2x8x8x32xf32> to vector<128x32xf32>
    %c0_24 = arith.constant 0 : index
    %c0_25 = arith.constant 0 : index
    %11 = vector.load %arg14[%c0_24, %c0_25] : memref<128x288xf32, #tpu.memory_space<vmem>>, vector<128x32xf32>
    tpu.vector_store %arg14[%c0_24, %c0_25], %10 {strides = array<i32>} : memref<128x288xf32, #tpu.memory_space<vmem>>, vector<128x32xf32>,
    %c0_26 = arith.constant 0 : index
    %c0_27 = arith.constant 0 : index
    %c1_28 = arith.constant 1 : index
    %c0_29 = arith.constant 0 : index
    %12 = vector.load %arg13[%c0_26, %c0_27, %c1_28, %c0_29] : memref<2x10x10x32xf32, #tpu.memory_space<vmem>>, vector<2x8x8x32xf32>
    %13 = vector.shape_cast %12 : vector<2x8x8x32xf32> to vector<128x32xf32>
    %c0_30 = arith.constant 0 : index
    %c32 = arith.constant 32 : index
    %14 = vector.load %arg14[%c0_30, %c32] : memref<128x288xf32, #tpu.memory_space<vmem>>, vector<128x32xf32>
    tpu.vector_store %arg14[%c0_30, %c32], %13 {strides = array<i32>} : memref<128x288xf32, #tpu.memory_space<vmem>>, vector<128x32xf32>,
    %c0_31 = arith.constant 0 : index
    %c0_32 = arith.constant 0 : index
    %c2 = arith.constant 2 : index
    %c0_33 = arith.constant 0 : index
    %15 = vector.load %arg13[%c0_31, %c0_32, %c2, %c0_33] : memref<2x10x10x32xf32, #tpu.memory_space<vmem>>, vector<2x8x8x32xf32>
    %16 = vector.shape_cast %15 : vector<2x8x8x32xf32> to vector<128x32xf32>
    %c0_34 = arith.constant 0 : index
    %c64 = arith.constant 64 : index
    %17 = vector.load %arg14[%c0_34, %c64] : memref<128x288xf32, #tpu.memory_space<vmem>>, vector<128x32xf32>
    tpu.vector_store %arg14[%c0_34, %c64], %16 {strides = array<i32>} : memref<128x288xf32, #tpu.memory_space<vmem>>, vector<128x32xf32>,
    %c0_35 = arith.constant 0 : index
    %c1_36 = arith.constant 1 : index
    %c0_37 = arith.constant 0 : index
    %c0_38 = arith.constant 0 : index
    %18 = vector.load %arg13[%c0_35, %c1_36, %c0_37, %c0_38] : memref<2x10x10x32xf32, #tpu.memory_space<vmem>>, vector<2x8x8x32xf32>
    %19 = vector.shape_cast %18 : vector<2x8x8x32xf32> to vector<128x32xf32>
    %c0_39 = arith.constant 0 : index
    %c96 = arith.constant 96 : index
    %20 = vector.load %arg14[%c0_39, %c96] : memref<128x288xf32, #tpu.memory_space<vmem>>, vector<128x32xf32>
    tpu.vector_store %arg14[%c0_39, %c96], %19 {strides = array<i32>} : memref<128x288xf32, #tpu.memory_space<vmem>>, vector<128x32xf32>,
    %c0_40 = arith.constant 0 : index
    %c1_41 = arith.constant 1 : index
    %c1_42 = arith.constant 1 : index
    %c0_43 = arith.constant 0 : index
    %21 = vector.load %arg13[%c0_40, %c1_41, %c1_42, %c0_43] : memref<2x10x10x32xf32, #tpu.memory_space<vmem>>, vector<2x8x8x32xf32>
    %22 = vector.shape_cast %21 : vector<2x8x8x32xf32> to vector<128x32xf32>
    %c0_44 = arith.constant 0 : index
    %c128 = arith.constant 128 : index
    %23 = vector.load %arg14[%c0_44, %c128] : memref<128x288xf32, #tpu.memory_space<vmem>>, vector<128x32xf32>
    tpu.vector_store %arg14[%c0_44, %c128], %22 {strides = array<i32>} : memref<128x288xf32, #tpu.memory_space<vmem>>, vector<128x32xf32>,
    %c0_45 = arith.constant 0 : index
    %c1_46 = arith.constant 1 : index
    %c2_47 = arith.constant 2 : index
    %c0_48 = arith.constant 0 : index
    %24 = vector.load %arg13[%c0_45, %c1_46, %c2_47, %c0_48] : memref<2x10x10x32xf32, #tpu.memory_space<vmem>>, vector<2x8x8x32xf32>
    %25 = vector.shape_cast %24 : vector<2x8x8x32xf32> to vector<128x32xf32>
    %c0_49 = arith.constant 0 : index
    %c160 = arith.constant 160 : index
    %26 = vector.load %arg14[%c0_49, %c160] : memref<128x288xf32, #tpu.memory_space<vmem>>, vector<128x32xf32>
    tpu.vector_store %arg14[%c0_49, %c160], %25 {strides = array<i32>} : memref<128x288xf32, #tpu.memory_space<vmem>>, vector<128x32xf32>,
    %c0_50 = arith.constant 0 : index
    %c2_51 = arith.constant 2 : index
    %c0_52 = arith.constant 0 : index
    %c0_53 = arith.constant 0 : index
    %27 = vector.load %arg13[%c0_50, %c2_51, %c0_52, %c0_53] : memref<2x10x10x32xf32, #tpu.memory_space<vmem>>, vector<2x8x8x32xf32>
    %28 = vector.shape_cast %27 : vector<2x8x8x32xf32> to vector<128x32xf32>
    %c0_54 = arith.constant 0 : index
    %c192 = arith.constant 192 : index
    %29 = vector.load %arg14[%c0_54, %c192] : memref<128x288xf32, #tpu.memory_space<vmem>>, vector<128x32xf32>
    tpu.vector_store %arg14[%c0_54, %c192], %28 {strides = array<i32>} : memref<128x288xf32, #tpu.memory_space<vmem>>, vector<128x32xf32>,
    %c0_55 = arith.constant 0 : index
    %c2_56 = arith.constant 2 : index
    %c1_57 = arith.constant 1 : index
    %c0_58 = arith.constant 0 : index
    %30 = vector.load %arg13[%c0_55, %c2_56, %c1_57, %c0_58] : memref<2x10x10x32xf32, #tpu.memory_space<vmem>>, vector<2x8x8x32xf32>
    %31 = vector.shape_cast %30 : vector<2x8x8x32xf32> to vector<128x32xf32>
    %c0_59 = arith.constant 0 : index
    %c224 = arith.constant 224 : index
    %32 = vector.load %arg14[%c0_59, %c224] : memref<128x288xf32, #tpu.memory_space<vmem>>, vector<128x32xf32>
    tpu.vector_store %arg14[%c0_59, %c224], %31 {strides = array<i32>} : memref<128x288xf32, #tpu.memory_space<vmem>>, vector<128x32xf32>,
    %c0_60 = arith.constant 0 : index
    %c2_61 = arith.constant 2 : index
    %c2_62 = arith.constant 2 : index
    %c0_63 = arith.constant 0 : index
    %33 = vector.load %arg13[%c0_60, %c2_61, %c2_62, %c0_63] : memref<2x10x10x32xf32, #tpu.memory_space<vmem>>, vector<2x8x8x32xf32>
    %34 = vector.shape_cast %33 : vector<2x8x8x32xf32> to vector<128x32xf32>
    %c0_64 = arith.constant 0 : index
    %c256 = arith.constant 256 : index
    %35 = vector.load %arg14[%c0_64, %c256] : memref<128x288xf32, #tpu.memory_space<vmem>>, vector<128x32xf32>
    tpu.vector_store %arg14[%c0_64, %c256], %34 {strides = array<i32>} : memref<128x288xf32, #tpu.memory_space<vmem>>, vector<128x32xf32>,
    %c0_65 = arith.constant 0 : index
    %c0_66 = arith.constant 0 : index
    %36 = vector.load %arg14[%c0_65, %c0_66] : memref<128x288xf32, #tpu.memory_space<vmem>>, vector<128x288xf32>
    %37 = arith.truncf %36 : vector<128x288xf32> to vector<128x288xbf16>
    %c0_67 = arith.constant 0 : index
    %c0_68 = arith.constant 0 : index
    %38 = vector.load %arg2[%c0_67, %c0_68] : memref<288x32xbf16, #tpu.memory_space<vmem>>, vector<288x32xbf16>
    %cst_69 = arith.constant dense<0.000000e+00> : vector<128x32xf32>
    %39 = tpu.matmul %37, %38, %cst_69 {dimension_numbers = #tpu.dot_dimension_numbers<[1], [0], [0], [1], [0, 0, 1, 1], [], []>} : vector<128x288xbf16>, vector<288x32xbf16>, vector<128x32xf32> -> vector<128x32xf32>
    %c0_70 = arith.constant 0 : index
    %c0_71 = arith.constant 0 : index
    %40 = vector.load %arg3[%c0_70, %c0_71] : memref<1x32xf32, #tpu.memory_space<vmem>>, vector<1x32xf32>
    %41 = vector.broadcast %40 : vector<1x32xf32> to vector<128x32xf32>
    %42 = arith.mulf %39, %41 : vector<128x32xf32>
    %c0_72 = arith.constant 0 : index
    %c0_73 = arith.constant 0 : index
    %43 = vector.load %arg4[%c0_72, %c0_73] : memref<1x32xf32, #tpu.memory_space<vmem>>, vector<1x32xf32>
    %44 = vector.broadcast %43 : vector<1x32xf32> to vector<128x32xf32>
    %45 = arith.addf %42, %44 : vector<128x32xf32>
    %cst_74 = arith.constant 0.000000e+00 : f32
    %46 = vector.broadcast %cst_74 : f32 to vector<128x32xf32>
    %47 = arith.maximumf %45, %46 : vector<128x32xf32>
    %48 = vector.shape_cast %47 : vector<128x32xf32> to vector<2x8x8x32xf32>
    %c0_75 = arith.constant 0 : index
    %c1_76 = arith.constant 1 : index
    %c1_77 = arith.constant 1 : index
    %c0_78 = arith.constant 0 : index
    %49 = vector.load %arg13[%c0_75, %c1_76, %c1_77, %c0_78] : memref<2x10x10x32xf32, #tpu.memory_space<vmem>>, vector<2x8x8x32xf32>
    tpu.vector_store %arg13[%c0_75, %c1_76, %c1_77, %c0_78], %48 {strides = array<i32>} : memref<2x10x10x32xf32, #tpu.memory_space<vmem>>, vector<2x8x8x32xf32>,
    %c0_79 = arith.constant 0 : index
    %c0_80 = arith.constant 0 : index
    %c0_81 = arith.constant 0 : index
    %c0_82 = arith.constant 0 : index
    %50 = vector.load %arg13[%c0_79, %c0_80, %c0_81, %c0_82] : memref<2x10x10x32xf32, #tpu.memory_space<vmem>>, vector<2x8x8x32xf32>
    %51 = vector.shape_cast %50 : vector<2x8x8x32xf32> to vector<128x32xf32>
    %c0_83 = arith.constant 0 : index
    %c0_84 = arith.constant 0 : index
    %52 = vector.load %arg14[%c0_83, %c0_84] : memref<128x288xf32, #tpu.memory_space<vmem>>, vector<128x32xf32>
    tpu.vector_store %arg14[%c0_83, %c0_84], %51 {strides = array<i32>} : memref<128x288xf32, #tpu.memory_space<vmem>>, vector<128x32xf32>,
    %c0_85 = arith.constant 0 : index
    %c0_86 = arith.constant 0 : index
    %c1_87 = arith.constant 1 : index
    %c0_88 = arith.constant 0 : index
    %53 = vector.load %arg13[%c0_85, %c0_86, %c1_87, %c0_88] : memref<2x10x10x32xf32, #tpu.memory_space<vmem>>, vector<2x8x8x32xf32>
    %54 = vector.shape_cast %53 : vector<2x8x8x32xf32> to vector<128x32xf32>
    %c0_89 = arith.constant 0 : index
    %c32_90 = arith.constant 32 : index
    %55 = vector.load %arg14[%c0_89, %c32_90] : memref<128x288xf32, #tpu.memory_space<vmem>>, vector<128x32xf32>
    tpu.vector_store %arg14[%c0_89, %c32_90], %54 {strides = array<i32>} : memref<128x288xf32, #tpu.memory_space<vmem>>, vector<128x32xf32>,
    %c0_91 = arith.constant 0 : index
    %c0_92 = arith.constant 0 : index
    %c2_93 = arith.constant 2 : index
    %c0_94 = arith.constant 0 : index
    %56 = vector.load %arg13[%c0_91, %c0_92, %c2_93, %c0_94] : memref<2x10x10x32xf32, #tpu.memory_space<vmem>>, vector<2x8x8x32xf32>
    %57 = vector.shape_cast %56 : vector<2x8x8x32xf32> to vector<128x32xf32>
    %c0_95 = arith.constant 0 : index
    %c64_96 = arith.constant 64 : index
    %58 = vector.load %arg14[%c0_95, %c64_96] : memref<128x288xf32, #tpu.memory_space<vmem>>, vector<128x32xf32>
    tpu.vector_store %arg14[%c0_95, %c64_96], %57 {strides = array<i32>} : memref<128x288xf32, #tpu.memory_space<vmem>>, vector<128x32xf32>,
    %c0_97 = arith.constant 0 : index
    %c1_98 = arith.constant 1 : index
    %c0_99 = arith.constant 0 : index
    %c0_100 = arith.constant 0 : index
    %59 = vector.load %arg13[%c0_97, %c1_98, %c0_99, %c0_100] : memref<2x10x10x32xf32, #tpu.memory_space<vmem>>, vector<2x8x8x32xf32>
    %60 = vector.shape_cast %59 : vector<2x8x8x32xf32> to vector<128x32xf32>
    %c0_101 = arith.constant 0 : index
    %c96_102 = arith.constant 96 : index
    %61 = vector.load %arg14[%c0_101, %c96_102] : memref<128x288xf32, #tpu.memory_space<vmem>>, vector<128x32xf32>
    tpu.vector_store %arg14[%c0_101, %c96_102], %60 {strides = array<i32>} : memref<128x288xf32, #tpu.memory_space<vmem>>, vector<128x32xf32>,
    %c0_103 = arith.constant 0 : index
    %c1_104 = arith.constant 1 : index
    %c1_105 = arith.constant 1 : index
    %c0_106 = arith.constant 0 : index
    %62 = vector.load %arg13[%c0_103, %c1_104, %c1_105, %c0_106] : memref<2x10x10x32xf32, #tpu.memory_space<vmem>>, vector<2x8x8x32xf32>
    %63 = vector.shape_cast %62 : vector<2x8x8x32xf32> to vector<128x32xf32>
    %c0_107 = arith.constant 0 : index
    %c128_108 = arith.constant 128 : index
    %64 = vector.load %arg14[%c0_107, %c128_108] : memref<128x288xf32, #tpu.memory_space<vmem>>, vector<128x32xf32>
    tpu.vector_store %arg14[%c0_107, %c128_108], %63 {strides = array<i32>} : memref<128x288xf32, #tpu.memory_space<vmem>>, vector<128x32xf32>,
    %c0_109 = arith.constant 0 : index
    %c1_110 = arith.constant 1 : index
    %c2_111 = arith.constant 2 : index
    %c0_112 = arith.constant 0 : index
    %65 = vector.load %arg13[%c0_109, %c1_110, %c2_111, %c0_112] : memref<2x10x10x32xf32, #tpu.memory_space<vmem>>, vector<2x8x8x32xf32>
    %66 = vector.shape_cast %65 : vector<2x8x8x32xf32> to vector<128x32xf32>
    %c0_113 = arith.constant 0 : index
    %c160_114 = arith.constant 160 : index
    %67 = vector.load %arg14[%c0_113, %c160_114] : memref<128x288xf32, #tpu.memory_space<vmem>>, vector<128x32xf32>
    tpu.vector_store %arg14[%c0_113, %c160_114], %66 {strides = array<i32>} : memref<128x288xf32, #tpu.memory_space<vmem>>, vector<128x32xf32>,
    %c0_115 = arith.constant 0 : index
    %c2_116 = arith.constant 2 : index
    %c0_117 = arith.constant 0 : index
    %c0_118 = arith.constant 0 : index
    %68 = vector.load %arg13[%c0_115, %c2_116, %c0_117, %c0_118] : memref<2x10x10x32xf32, #tpu.memory_space<vmem>>, vector<2x8x8x32xf32>
    %69 = vector.shape_cast %68 : vector<2x8x8x32xf32> to vector<128x32xf32>
    %c0_119 = arith.constant 0 : index
    %c192_120 = arith.constant 192 : index
    %70 = vector.load %arg14[%c0_119, %c192_120] : memref<128x288xf32, #tpu.memory_space<vmem>>, vector<128x32xf32>
    tpu.vector_store %arg14[%c0_119, %c192_120], %69 {strides = array<i32>} : memref<128x288xf32, #tpu.memory_space<vmem>>, vector<128x32xf32>,
    %c0_121 = arith.constant 0 : index
    %c2_122 = arith.constant 2 : index
    %c1_123 = arith.constant 1 : index
    %c0_124 = arith.constant 0 : index
    %71 = vector.load %arg13[%c0_121, %c2_122, %c1_123, %c0_124] : memref<2x10x10x32xf32, #tpu.memory_space<vmem>>, vector<2x8x8x32xf32>
    %72 = vector.shape_cast %71 : vector<2x8x8x32xf32> to vector<128x32xf32>
    %c0_125 = arith.constant 0 : index
    %c224_126 = arith.constant 224 : index
    %73 = vector.load %arg14[%c0_125, %c224_126] : memref<128x288xf32, #tpu.memory_space<vmem>>, vector<128x32xf32>
    tpu.vector_store %arg14[%c0_125, %c224_126], %72 {strides = array<i32>} : memref<128x288xf32, #tpu.memory_space<vmem>>, vector<128x32xf32>,
    %c0_127 = arith.constant 0 : index
    %c2_128 = arith.constant 2 : index
    %c2_129 = arith.constant 2 : index
    %c0_130 = arith.constant 0 : index
    %74 = vector.load %arg13[%c0_127, %c2_128, %c2_129, %c0_130] : memref<2x10x10x32xf32, #tpu.memory_space<vmem>>, vector<2x8x8x32xf32>
    %75 = vector.shape_cast %74 : vector<2x8x8x32xf32> to vector<128x32xf32>
    %c0_131 = arith.constant 0 : index
    %c256_132 = arith.constant 256 : index
    %76 = vector.load %arg14[%c0_131, %c256_132] : memref<128x288xf32, #tpu.memory_space<vmem>>, vector<128x32xf32>
    tpu.vector_store %arg14[%c0_131, %c256_132], %75 {strides = array<i32>} : memref<128x288xf32, #tpu.memory_space<vmem>>, vector<128x32xf32>,
    %c0_133 = arith.constant 0 : index
    %c0_134 = arith.constant 0 : index
    %77 = vector.load %arg14[%c0_133, %c0_134] : memref<128x288xf32, #tpu.memory_space<vmem>>, vector<128x288xf32>
    %78 = arith.truncf %77 : vector<128x288xf32> to vector<128x288xbf16>
    %c0_135 = arith.constant 0 : index
    %c0_136 = arith.constant 0 : index
    %79 = vector.load %arg5[%c0_135, %c0_136] : memref<288x32xbf16, #tpu.memory_space<vmem>>, vector<288x32xbf16>
    %cst_137 = arith.constant dense<0.000000e+00> : vector<128x32xf32>
    %80 = tpu.matmul %78, %79, %cst_137 {dimension_numbers = #tpu.dot_dimension_numbers<[1], [0], [0], [1], [0, 0, 1, 1], [], []>} : vector<128x288xbf16>, vector<288x32xbf16>, vector<128x32xf32> -> vector<128x32xf32>
    %c0_138 = arith.constant 0 : index
    %c0_139 = arith.constant 0 : index
    %81 = vector.load %arg6[%c0_138, %c0_139] : memref<1x32xf32, #tpu.memory_space<vmem>>, vector<1x32xf32>
    %82 = vector.broadcast %81 : vector<1x32xf32> to vector<128x32xf32>
    %83 = arith.mulf %80, %82 : vector<128x32xf32>
    %c0_140 = arith.constant 0 : index
    %c0_141 = arith.constant 0 : index
    %84 = vector.load %arg7[%c0_140, %c0_141] : memref<1x32xf32, #tpu.memory_space<vmem>>, vector<1x32xf32>
    %85 = vector.broadcast %84 : vector<1x32xf32> to vector<128x32xf32>
    %86 = arith.addf %83, %85 : vector<128x32xf32>
    %cst_142 = arith.constant 0.000000e+00 : f32
    %87 = vector.broadcast %cst_142 : f32 to vector<128x32xf32>
    %88 = arith.maximumf %86, %87 : vector<128x32xf32>
    %89 = vector.shape_cast %88 : vector<128x32xf32> to vector<2x64x32xf32>
    %cst_143 = arith.constant dense<0.000000e+00> : vector<2x32xf32>
    %90 = vector.multi_reduction <add>, %89, %cst_143 [1] : vector<2x64x32xf32> to vector<2x32xf32>
    %cst_144 = arith.constant 6.400000e+01 : f32
    %91 = vector.broadcast %cst_144 : f32 to vector<2x32xf32>
    %92 = arith.divf %90, %91 : vector<2x32xf32>
    %c0_145 = arith.constant 0 : index
    %c0_146 = arith.constant 0 : index
    %93 = vector.load %arg8[%c0_145, %c0_146] : memref<32x4xf32, #tpu.memory_space<vmem>>, vector<32x4xf32>
    %cst_147 = arith.constant dense<0.000000e+00> : vector<2x4xf32>
    %94 = tpu.matmul %92, %93, %cst_147 {dimension_numbers = #tpu.dot_dimension_numbers<[1], [0], [0], [1], [0, 0, 1, 1], [], []>} : vector<2x32xf32>, vector<32x4xf32>, vector<2x4xf32> -> vector<2x4xf32>
    %c0_148 = arith.constant 0 : index
    %c0_149 = arith.constant 0 : index
    %95 = vector.load %arg9[%c0_148, %c0_149] : memref<1x4xf32, #tpu.memory_space<vmem>>, vector<1x4xf32>
    %96 = vector.broadcast %95 : vector<1x4xf32> to vector<2x4xf32>
    %97 = arith.addf %94, %96 : vector<2x4xf32>
    %98 = arith.negf %97 : vector<2x4xf32>
    %99 = math.exp %98 : vector<2x4xf32>
    %cst_150 = arith.constant 1.000000e+00 : f32
    %100 = vector.broadcast %cst_150 : f32 to vector<2x4xf32>
    %101 = arith.addf %100, %99 : vector<2x4xf32>
    %102 = arith.divf %100, %101 : vector<2x4xf32>
    %103 = arith.mulf %97, %102 : vector<2x4xf32>
    %c0_151 = arith.constant 0 : index
    %c0_152 = arith.constant 0 : index
    %104 = vector.load %arg10[%c0_151, %c0_152] : memref<4x32xf32, #tpu.memory_space<vmem>>, vector<4x32xf32>
    %cst_153 = arith.constant dense<0.000000e+00> : vector<2x32xf32>
    %105 = tpu.matmul %103, %104, %cst_153 {dimension_numbers = #tpu.dot_dimension_numbers<[1], [0], [0], [1], [0, 0, 1, 1], [], []>} : vector<2x4xf32>, vector<4x32xf32>, vector<2x32xf32> -> vector<2x32xf32>
    %c0_154 = arith.constant 0 : index
    %c0_155 = arith.constant 0 : index
    %106 = vector.load %arg11[%c0_154, %c0_155] : memref<1x32xf32, #tpu.memory_space<vmem>>, vector<1x32xf32>
    %107 = vector.broadcast %106 : vector<1x32xf32> to vector<2x32xf32>
    %108 = arith.addf %105, %107 : vector<2x32xf32>
    %109 = arith.negf %108 : vector<2x32xf32>
    %110 = math.exp %109 : vector<2x32xf32>
    %cst_156 = arith.constant 1.000000e+00 : f32
    %111 = vector.broadcast %cst_156 : f32 to vector<2x32xf32>
    %112 = arith.addf %111, %110 : vector<2x32xf32>
    %113 = arith.divf %111, %112 : vector<2x32xf32>
    %114 = vector.shape_cast %88 : vector<128x32xf32> to vector<2x64x32xf32>
    %115 = vector.shape_cast %113 : vector<2x32xf32> to vector<2x1x32xf32>
    %116 = vector.broadcast %115 : vector<2x1x32xf32> to vector<2x64x32xf32>
    %117 = arith.mulf %114, %116 : vector<2x64x32xf32>
    %118 = vector.shape_cast %117 : vector<2x64x32xf32> to vector<128x32xf32>
    %119 = arith.addf %118, %6 : vector<128x32xf32>
    %c0_157 = arith.constant 0 : index
    %c0_158 = arith.constant 0 : index
    %120 = vector.load %arg12[%c0_157, %c0_158] : memref<128x32xf32, #tpu.memory_space<vmem>>, vector<128x32xf32>
    tpu.vector_store %arg12[%c0_157, %c0_158], %119 {strides = array<i32>} : memref<128x32xf32, #tpu.memory_space<vmem>>, vector<128x32xf32>,
    return
  }
  func.func @transform_0(%arg0: i32) -> (i32, i32) {
    %c0_i32 = arith.constant 0 : i32
    %c0_i32_0 = arith.constant 0 : i32
    return %arg0, %c0_i32 : i32, i32
  }
  func.func @transform_1(%arg0: i32) -> (i32, i32) {
    %c0_i32 = arith.constant 0 : i32
    %c0_i32_0 = arith.constant 0 : i32
    %c0_i32_1 = arith.constant 0 : i32
    return %c0_i32, %c0_i32_0 : i32, i32
  }
  func.func @transform_2(%arg0: i32) -> (i32, i32) {
    %c0_i32 = arith.constant 0 : i32
    %c0_i32_0 = arith.constant 0 : i32
    %c0_i32_1 = arith.constant 0 : i32
    return %c0_i32, %c0_i32_0 : i32, i32
  }
  func.func @transform_3(%arg0: i32) -> (i32, i32) {
    %c0_i32 = arith.constant 0 : i32
    %c0_i32_0 = arith.constant 0 : i32
    %c0_i32_1 = arith.constant 0 : i32
    return %c0_i32, %c0_i32_0 : i32, i32
  }
  func.func @transform_4(%arg0: i32) -> (i32, i32) {
    %c0_i32 = arith.constant 0 : i32
    %c0_i32_0 = arith.constant 0 : i32
    %c0_i32_1 = arith.constant 0 : i32
    return %c0_i32, %c0_i32_0 : i32, i32
  }
  func.func @transform_5(%arg0: i32) -> (i32, i32) {
    %c0_i32 = arith.constant 0 : i32
    %c0_i32_0 = arith.constant 0 : i32
    %c0_i32_1 = arith.constant 0 : i32
    return %c0_i32, %c0_i32_0 : i32, i32
  }
  func.func @transform_6(%arg0: i32) -> (i32, i32) {
    %c0_i32 = arith.constant 0 : i32
    %c0_i32_0 = arith.constant 0 : i32
    %c0_i32_1 = arith.constant 0 : i32
    return %c0_i32, %c0_i32_0 : i32, i32
  }
  func.func @transform_7(%arg0: i32) -> (i32, i32) {
    %c0_i32 = arith.constant 0 : i32
    %c0_i32_0 = arith.constant 0 : i32
    %c0_i32_1 = arith.constant 0 : i32
    return %c0_i32, %c0_i32_0 : i32, i32
  }
  func.func @transform_8(%arg0: i32) -> (i32, i32) {
    %c0_i32 = arith.constant 0 : i32
    %c0_i32_0 = arith.constant 0 : i32
    %c0_i32_1 = arith.constant 0 : i32
    return %c0_i32, %c0_i32_0 : i32, i32
  }
  func.func @transform_9(%arg0: i32) -> (i32, i32) {
    %c0_i32 = arith.constant 0 : i32
    %c0_i32_0 = arith.constant 0 : i32
    %c0_i32_1 = arith.constant 0 : i32
    return %c0_i32, %c0_i32_0 : i32, i32
  }
  func.func @transform_10(%arg0: i32) -> (i32, i32) {
    %c0_i32 = arith.constant 0 : i32
    %c0_i32_0 = arith.constant 0 : i32
    %c0_i32_1 = arith.constant 0 : i32
    return %c0_i32, %c0_i32_0 : i32, i32
  }
  func.func @transform_11(%arg0: i32) -> (i32, i32) {
    %c0_i32 = arith.constant 0 : i32
    %c0_i32_0 = arith.constant 0 : i32
    return %arg0, %c0_i32 : i32, i32
  }
}

</mosaic_0001>

<bundles_post_ra>
// kernel: tpu_custom_call.1
= control target key start
LH: loop header
LB: loop body
LE: loop exit
PB: predicated region body
PF: predicated region fallthrough
CT: control target
= control target key end

     0   :  { %vm39_vm0 = vcmask 261120   ;;  %vm41_vm1 = vcmask 254976   ;;  %v2821_v0 = vmov 0.0   ;;  %vm50_vm2 = vcmask 253952   ;;  %s2822_s17 = smov 32   ;;  %s2823_s18 = smov 64   ;;  %s4284_s0 = inlined_call_operand.vmem [shape: f32[128,32], index: 0, kind: input, shape index: {}]   ;;  %s4285_s1 = inlined_call_operand.vmem [shape: bf16[288,32], index: 1, kind: input, shape index: {}]   ;;  %s4286_s2 = inlined_call_operand.vmem [shape: f32[1,32], index: 2, kind: input, shape index: {}]   ;;  %s4287_s3 = inlined_call_operand.vmem [shape: f32[1,32], index: 3, kind: input, shape index: {}]   ;;  %s4288_s4 = inlined_call_operand.vmem [shape: bf16[288,32], index: 4, kind: input, shape index: {}]   ;;  %s4289_s5 = inlined_call_operand.vmem [shape: f32[1,32], index: 5, kind: input, shape index: {}]   ;;  %s4290_s6 = inlined_call_operand.vmem [shape: f32[1,32], index: 6, kind: input, shape index: {}]   ;;  %s4291_s7 = inlined_call_operand.vmem [shape: f32[32,4], index: 7, kind: input, shape index: {}]   ;;  %s4292_s8 = inlined_call_operand.vmem [shape: f32[1,4], index: 8, kind: input, shape index: {}]   ;;  %s4293_s10 = inlined_call_operand.vmem [shape: f32[1,32], index: 10, kind: input, shape index: {}]   ;;  %s4294_s9 = inlined_call_operand.vmem [shape: f32[4,32], index: 9, kind: input, shape index: {}]   ;;  %s4295_s11 = inlined_call_operand.vmem [shape: f32[128,32], index: 11, kind: output, shape index: {}]  }
   0x1   :  { %43 = vst.msk [vmem:[#allocation2 + $0xa0] sm:$0xff] %vm39_vm0, %v2821_v0  ;;  %v2933_v3 = vld [vmem:[%s4284_s0 + $0x40] sm:$0xff]  ;;  %v2939_v4 = vld [vmem:[%s4284_s0 + $0x48] sm:$0xff]  ;;  %v2945_v5 = vld [vmem:[%s4284_s0 + $0x50] sm:$0xff]  ;;  %s2824_s29 = smov 96   ;;  %vm236_vm3 = vcmask 523520  }
   0x2   :  { %44 = vst.msk [vmem:[#allocation2 + $0xa8] sm:$0x3] %vm41_vm1, %v2821_v0  ;;  %v2952_v6 = vld [vmem:[%s4284_s0 + $0x58] sm:$0xff]  ;;  %v2959_v7 = vld [vmem:[%s4284_s0 + $0x60] sm:$0xff]  ;;  %v2983_v13 = vld [vmem:[%s4284_s0 + $0x68] sm:$0xff]  ;;  %vm333_vm4 = vcmask 785920  }
   0x3   :  { %40 = vst.msk [vmem:[#allocation2] sm:$0xff] %vm39_vm0, %v2821_v0  ;;  %v2988_v14 = vld [vmem:[%s4284_s0 + $0x70] sm:$0xff]  ;;  %v3029_v22 = vld [vmem:[%s4284_s0] sm:$0xff]  ;;  %v3042_v25 = vld [vmem:[%s4284_s0 + $0x8] sm:$0xff]  ;;  %vm430_vm5 = vcmask 1048320   ;;  %vm2435_vm7 = vcmask 1041409  }
   0x4   :  { %42 = vst.msk [vmem:[#allocation2 + $0x8] sm:$0x3] %vm41_vm1, %v2821_v0  ;;  %v3076_v32 = vld [vmem:[%s4284_s0 + $0x78] sm:$0xff]  ;;  %v3081_v33 = vld [vmem:[%s4284_s0 + $0x10] sm:$0xff]  ;;  %v3148_v50 = vld [vmem:[%s4284_s0 + $0x20] sm:$0xff]  ;;  %vm2488_vm8 = vcmask 1043456  }
   0x5   :  { %46 = vst.msk [vmem:[#allocation2 + $0x90] sm:$0xff] %vm39_vm0, %v2821_v0  ;;  %v3122_v42 = vld [vmem:[%s4284_s0 + $0x18] sm:$0xff]  ;;  %v2760_v49 = vld [vmem:[%s4285_s1 + $0x30] sm:$0xff]  ;;  %v2759_v51 = vld [vmem:[%s4285_s1 + $0x28] sm:$0xff]  ;;  %vm2484_vm13 = vcmask 31744  }
   0x6   :  { %47 = vst.msk [vmem:[#allocation2 + $0x98] sm:$0x3] %vm41_vm1, %v2821_v0  ;;  %v2761_v44 = vld [vmem:[%s4285_s1 + $0x38] sm:$0xff]  ;;  %v2758_v55 = vld [vmem:[%s4285_s1 + $0x20] sm:$0xff]  ;;  %v2756_v61 = vld [vmem:[%s4285_s1 + $0x10] sm:$0xff] }
   0x7   :  { %48 = vst.msk [vmem:[#allocation2 + $0x130] sm:$0xff] %vm39_vm0, %v2821_v0  ;;  %2790 = vmatpush.bf16.msra.mxu1 %v2761_v44  ;;  %1040 = vmatpush.bf16.msra.mxu0 %v2761_v44  ;;  %v2757_v57 = vld [vmem:[%s4285_s1 + $0x18] sm:$0xff]  ;;  %v2755_v62 = vld [vmem:[%s4285_s1 + $0x8] sm:$0xff] }
   0x8   :  { %49 = vst.msk [vmem:[#allocation2 + $0x138] sm:$0x3] %vm41_vm1, %v2821_v0  ;;  %v3197_v63 = vld [vmem:[%s4284_s0 + $0x28] sm:$0xff] }
   0x9   :  { %v164_v1 = vld [vmem:[#allocation2 + $0xa1] sm:$0xff]  ;;  %81 = vst.msk [vmem:[#allocation2 + $0xa9] sm:$0x1] %vm50_vm2, %v2821_v0 }
   0xa   :  { %204 = vrot.lane.b32.xlu0 %v164_v1, %s2822_s17  ;;  %51 = vst.msk [vmem:[#allocation2] sm:$0x1] %vm50_vm2, %v2821_v0 }
   0xb   :  { %52 = vst.msk [vmem:[#allocation2 + $0x10] sm:$0x1] %vm50_vm2, %v2821_v0  ;;  %v156_v40 = vld [vmem:[#allocation2 + $0x1] sm:$0xff]  ;;  %2791 = vmatpush.bf16.msra.mxu1 %v2760_v49  ;;  %1041 = vmatpush.bf16.msra.mxu0 %v2760_v49  ;;  %v3260_v49 = vld [vmem:[%s4284_s0 + $0x38] sm:$0xff] }
   0xc   :  { %53 = vst.msk [vmem:[#allocation2 + $0x20] sm:$0x1] %vm50_vm2, %v2821_v0 }
   0xd   :  { %54 = vst.msk [vmem:[#allocation2 + $0x30] sm:$0x1] %vm50_vm2, %v2821_v0 }
   0xe   :  { %55 = vst.msk [vmem:[#allocation2 + $0x40] sm:$0x1] %vm50_vm2, %v2821_v0 }
   0xf   :  { %56 = vst.msk [vmem:[#allocation2 + $0x50] sm:$0x1] %vm50_vm2, %v2821_v0  ;;  %2792 = vmatpush.bf16.msra.mxu1 %v2759_v51  ;;  %1042 = vmatpush.bf16.msra.mxu0 %v2759_v51 }
  0x10   :  { %v261_v2 = vld [vmem:[#allocation2 + $0xa2] sm:$0xff]  ;;  %57 = vst.msk [vmem:[#allocation2 + $0x60] sm:$0x1] %vm50_vm2, %v2821_v0 }
  0x11   :  { %301 = vrot.lane.b32.xlu1 %v261_v2, %s2823_s18  ;;  %58 = vst.msk [vmem:[#allocation2 + $0x70] sm:$0x1] %vm50_vm2, %v2821_v0  ;;  %v2754_v2 = vld [vmem:[%s4285_s1] sm:$0xff] }
  0x12   :  { %59 = vst.msk [vmem:[#allocation2 + $0x80] sm:$0x1] %vm50_vm2, %v2821_v0 }
  0x13   :  { %60 = vst.msk [vmem:[#allocation2 + $0x90] sm:$0x1] %vm50_vm2, %v2821_v0  ;;  %2793 = vmatpush.bf16.msra.mxu1 %v2758_v55  ;;  %1043 = vmatpush.bf16.msra.mxu0 %v2758_v55 }
  0x14   :  { %61 = vst.msk [vmem:[#allocation2 + $0xa0] sm:$0x1] %vm50_vm2, %v2821_v0 }
  0x15   :  { %62 = vst.msk [vmem:[#allocation2 + $0xb0] sm:$0x1] %vm50_vm2, %v2821_v0 }
  0x16   :  { %63 = vst.msk [vmem:[#allocation2 + $0xc0] sm:$0x1] %vm50_vm2, %v2821_v0 }
  0x17   :  { %64 = vst.msk [vmem:[#allocation2 + $0xd0] sm:$0x1] %vm50_vm2, %v2821_v0  ;;  %2794 = vmatpush.bf16.msra.mxu1 %v2757_v57  ;;  %1044 = vmatpush.bf16.msra.mxu0 %v2757_v57 }
  0x18   :  { %65 = vst.msk [vmem:[#allocation2 + $0xe0] sm:$0x1] %vm50_vm2, %v2821_v0 }
  0x19   :  { %66 = vst.msk [vmem:[#allocation2 + $0xf0] sm:$0x1] %vm50_vm2, %v2821_v0 }
  0x1a   :  { %67 = vst.msk [vmem:[#allocation2 + $0x100] sm:$0x1] %vm50_vm2, %v2821_v0 }
  0x1b   :  { %68 = vst.msk [vmem:[#allocation2 + $0x110] sm:$0x1] %vm50_vm2, %v2821_v0  ;;  %v132_v54 = vld [vmem:[#allocation2 + $0xa0] sm:$0xff]  ;;  %2795 = vmatpush.bf16.msra.mxu1 %v2756_v61  ;;  %1045 = vmatpush.bf16.msra.mxu0 %v2756_v61 }
  0x1c   :  { %69 = vst.msk [vmem:[#allocation2 + $0x120] sm:$0x1] %vm50_vm2, %v2821_v0 }
  0x1d   :  { %70 = vst.msk [vmem:[#allocation2 + $0x130] sm:$0x1] %vm50_vm2, %v2821_v0 }
  0x1e   :  { %71 = vst.msk [vmem:[#allocation2 + $0x9] sm:$0x1] %vm50_vm2, %v2821_v0 }
  0x1f   :  { %72 = vst.msk [vmem:[#allocation2 + $0x19] sm:$0x1] %vm50_vm2, %v2821_v0  ;;  %2796 = vmatpush.bf16.msra.mxu1 %v2755_v62  ;;  %1046 = vmatpush.bf16.msra.mxu0 %v2755_v62 }
  0x20   :  { %73 = vst.msk [vmem:[#allocation2 + $0x29] sm:$0x1] %vm50_vm2, %v2821_v0 }
  0x21   :  { %74 = vst.msk [vmem:[#allocation2 + $0x39] sm:$0x1] %vm50_vm2, %v2821_v0 }
  0x22   :  { %75 = vst.msk [vmem:[#allocation2 + $0x49] sm:$0x1] %vm50_vm2, %v2821_v0 }
  0x23   :  { %76 = vst.msk [vmem:[#allocation2 + $0x59] sm:$0x1] %vm50_vm2, %v2821_v0  ;;  %2797 = vmatpush.bf16.msra.mxu1 %v2754_v2  ;;  %1047 = vmatpush.bf16.msra.mxu0 %v2754_v2 }
  0x24   :  { %77 = vst.msk [vmem:[#allocation2 + $0x69] sm:$0x1] %vm50_vm2, %v2821_v0 }
  0x25   :  { %78 = vst.msk [vmem:[#allocation2 + $0x79] sm:$0x1] %vm50_vm2, %v2821_v0  ;;  %v253_v45 = vld [vmem:[#allocation2 + $0x2] sm:$0xff] }
  0x26   :  { %79 = vst.msk [vmem:[#allocation2 + $0x89] sm:$0x1] %vm50_vm2, %v2821_v0 }
  0x27   :  { %80 = vst.msk [vmem:[#allocation2 + $0x99] sm:$0x1] %vm50_vm2, %v2821_v0 }
  0x28   :  { %82 = vst.msk [vmem:[#allocation2 + $0xb9] sm:$0x1] %vm50_vm2, %v2821_v0 }
  0x29   :  { %83 = vst.msk [vmem:[#allocation2 + $0xc9] sm:$0x1] %vm50_vm2, %v2821_v0 }
  0x2a   :  { %84 = vst.msk [vmem:[#allocation2 + $0xd9] sm:$0x1] %vm50_vm2, %v2821_v0 }
  0x2b   :  { %85 = vst.msk [vmem:[#allocation2 + $0xe9] sm:$0x1] %vm50_vm2, %v2821_v0 }
  0x2c   :  { %86 = vst.msk [vmem:[#allocation2 + $0xf9] sm:$0x1] %vm50_vm2, %v2821_v0 }
  0x2d   :  { %87 = vst.msk [vmem:[#allocation2 + $0x109] sm:$0x1] %vm50_vm2, %v2821_v0 }
  0x2e   :  { %88 = vst.msk [vmem:[#allocation2 + $0x119] sm:$0x1] %vm50_vm2, %v2821_v0 }
  0x2f   :  { %89 = vst.msk [vmem:[#allocation2 + $0x129] sm:$0x1] %vm50_vm2, %v2821_v0 }
  0x30   :  { %90 = vst.msk [vmem:[#allocation2 + $0x139] sm:$0x1] %vm50_vm2, %v2821_v0 }
  0x31   :  { %116 = vst.msk [vmem:[#allocation2 + $0xb1] sm:$0xff] %vm39_vm0, %v2933_v3 }
  0x32   :  { %117 = vst.msk [vmem:[#allocation2 + $0xc1] sm:$0xff] %vm39_vm0, %v2939_v4 }
  0x33   :  { %118 = vst.msk [vmem:[#allocation2 + $0xd1] sm:$0xff] %vm39_vm0, %v2945_v5 }
  0x34   :  { %119 = vst.msk [vmem:[#allocation2 + $0xe1] sm:$0xff] %vm39_vm0, %v2952_v6 }
  0x35   :  { %120 = vst.msk [vmem:[#allocation2 + $0xf1] sm:$0xff] %vm39_vm0, %v2959_v7 }
  0x36   :  { %121 = vst.msk [vmem:[#allocation2 + $0x101] sm:$0xff] %vm39_vm0, %v2983_v13 }
  0x37   :  { %122 = vst.msk [vmem:[#allocation2 + $0x111] sm:$0xff] %vm39_vm0, %v2988_v14 }
  0x38   :  { %v165_v8 = vld [vmem:[#allocation2 + $0xb1] sm:$0xff]  ;;  %108 = vst.msk [vmem:[#allocation2 + $0x11] sm:$0xff] %vm39_vm0, %v3029_v22 }
  0x39   :  { %v2967_v9 = vld [vmem:[#allocation2 + $0xb2] sm:$0xff]  ;;  %206 = vrot.lane.b32.xlu0 %v165_v8, %s2822_s17  ;;  %v2972_v11 = vld [vmem:[#allocation2 + $0xc0] sm:$0xff]  ;;  %109 = vst.msk [vmem:[#allocation2 + $0x21] sm:$0xff] %vm39_vm0, %v3042_v25 }
  0x3a   :  { %v358_v10 = vld [vmem:[#allocation2 + $0xb0] sm:$0xff]  ;;  %303 = vrot.lane.b32.xlu1 %v2967_v9, %s2823_s18  ;;  %150 = vst.msk [vmem:[#allocation3 + $0xf0] sm:$0xff] %vm39_vm0, %v2972_v11  ;;  %v2998_v16 = vld [vmem:[#allocation2 + $0xc1] sm:$0xff] }
  0x3b   :  { %149 = vst.msk [vmem:[#allocation3 + $0xd8] sm:$0xff] %vm39_vm0, %v358_v10  ;;  %398 = vrot.lane.b32.xlu2 %v358_v10, %s2824_s29  ;;  %v2976_v12 = vld [vmem:[#allocation2 + $0xd0] sm:$0xff]  ;;  %v3008_v18 = vld [vmem:[#allocation2 + $0xe0] sm:$0xff] }
  0x3c   :  { %151 = vst.msk [vmem:[#allocation3 + $0x108] sm:$0xff] %vm39_vm0, %v2976_v12  ;;  %v2994_v15 = vld [vmem:[#allocation2 + $0xf0] sm:$0xff]  ;;  %v3016_v20 = vld [vmem:[#allocation2 + $0xc2] sm:$0xff] }
  0x3d   :  { %v3000_v17 = vld [vmem:[#allocation2 + $0xd1] sm:$0xff]  ;;  %153 = vst.msk [vmem:[#allocation3 + $0x138] sm:$0xff] %vm39_vm0, %v2994_v15  ;;  %v3035_v23 = vld [vmem:[#allocation2 + $0xe1] sm:$0xff] }
  0x3e   :  { %152 = vst.msk [vmem:[#allocation3 + $0x120] sm:$0xff] %vm39_vm0, %v3008_v18  ;;  %v3014_v19 = vld [vmem:[#allocation2 + $0xd2] sm:$0xff]  ;;  %v3048_v26 = vld [vmem:[#allocation2 + $0x100] sm:$0xff] }
  0x3f   :  { %v3022_v21 = vld [vmem:[#allocation2 + $0x110] sm:$0xff]  ;;  %154 = vst.msk [vmem:[#allocation3 + $0x150] sm:$0xff] %vm39_vm0, %v3048_v26  ;;  %v3059_v29 = vld [vmem:[#allocation2 + $0xe2] sm:$0xff] }
  0x40   :  { %155 = vst.msk [vmem:[#allocation3 + $0x168] sm:$0xff] %vm39_vm0, %v3022_v21  ;;  %v3037_v24 = vld [vmem:[#allocation2 + $0xf1] sm:$0xff]  ;;  %v3061_v30 = vld [vmem:[#allocation2 + $0x22] sm:$0xff] }
  0x41   :  { %208 = vrot.lane.b32.xlu0 %v2998_v16, %s2822_s17  ;;  %v157_v27 = vld [vmem:[#allocation2 + $0x11] sm:$0xff]  ;;  %v3067_v31 = vld [vmem:[#allocation2 + $0x20] sm:$0xff]  ;;  %784 = vst.msk [vmem:[#allocation3 + $0x10] sm:$0xff] %vm39_vm0, %v3061_v30 }
  0x42   :  { %210 = vrot.lane.b32.xlu1 %v3000_v17, %s2822_s17  ;;  %463 = vst.msk [vmem:[#allocation3 + $0x8] sm:$0xff] %vm39_vm0, %v157_v27  ;;  %v3057_v28 = vld [vmem:[#allocation2 + $0xf2] sm:$0xff]  ;;  %v3089_v34 = vld [vmem:[#allocation2 + $0x101] sm:$0xff] }
  0x43   :  { %400 = vrot.lane.b32.xlu2 %v2972_v11, %s2824_s29  ;;  %142 = vst.msk [vmem:[#allocation3 + $0x30] sm:$0xff] %vm39_vm0, %v3067_v31  ;;  %v3091_v35 = vld [vmem:[#allocation2 + $0x111] sm:$0xff]  ;;  %v3105_v38 = vld [vmem:[#allocation2 + $0x102] sm:$0xff] }
  0x44   :  { %123 = vst.msk [vmem:[#allocation2 + $0x121] sm:$0xff] %vm39_vm0, %v3076_v32  ;;  %v3103_v37 = vld [vmem:[#allocation2 + $0x112] sm:$0xff]  ;;  %v3111_v39 = vld [vmem:[#allocation2 + $0x21] sm:$0xff] }
  0x45   :  { %110 = vst.msk [vmem:[#allocation2 + $0x31] sm:$0xff] %vm39_vm0, %v3081_v33  ;;  %v479_v46 = vld [vmem:[#allocation2 + $0x12] sm:$0xff] }
  0x46   :  { %464 = vst.msk [vmem:[#allocation3 + $0x20] sm:$0xff] %vm39_vm0, %v3111_v39  ;;  %v350_v48 = vld [vmem:[#allocation2 + $0x10] sm:$0xff] }
  0x47   :  { %111 = vst.msk [vmem:[#allocation2 + $0x41] sm:$0xff] %vm39_vm0, %v3122_v42  ;;  %v3217_v10 = vld [vmem:[%s4284_s0 + $0x30] sm:$0xff] }
  0x48   :  { %141 = vst.msk [vmem:[#allocation3 + $0x18] sm:$0xff] %vm39_vm0, %v350_v48 }
  0x49   :  { %307 = vrot.lane.b32.xlu0 %v3014_v19, %s2823_s18  ;;  %112 = vst.msk [vmem:[#allocation2 + $0x51] sm:$0xff] %vm39_vm0, %v3148_v50 }
  0x4a   :  { %402 = vrot.lane.b32.xlu1 %v2976_v12, %s2824_s29  ;;  %148 = vst.msk [vmem:[#allocation3 + $0xc0] sm:$0xff] %vm39_vm0, %v132_v54 }
  0x4b   :  { %305 = vrot.lane.b32.xlu2 %v3016_v20, %s2823_s18  ;;  %v3117_v41 = vld [vmem:[#allocation2 + $0x120] sm:$0xff]  ;;  %113 = vst.msk [vmem:[#allocation2 + $0x61] sm:$0xff] %vm39_vm0, %v3197_v63 }
  0x4c   :  { %v3099_v36 = vld [vmem:[#allocation2 + $0x30] sm:$0xff]  ;;  %114 = vst.msk [vmem:[#allocation2 + $0x71] sm:$0xff] %vm39_vm0, %v3217_v10 }
  0x4d   :  { %143 = vst.msk [vmem:[#allocation3 + $0x48] sm:$0xff] %vm39_vm0, %v3099_v36  ;;  %v159_v43 = vld [vmem:[#allocation2 + $0x31] sm:$0xff] }
  0x4e   :  { %465 = vst.msk [vmem:[#allocation3 + $0x38] sm:$0xff] %vm39_vm0, %v159_v43  ;;  %v3134_v47 = vld [vmem:[#allocation2 + $0x42] sm:$0xff]  ;;  %v481_v59 = vld [vmem:[#allocation2 + $0x32] sm:$0xff] }
  0x4f   :  { %786 = vst.msk [vmem:[#allocation3 + $0x40] sm:$0xff] %vm39_vm0, %v3134_v47  ;;  %v3154_v52 = vld [vmem:[#allocation2 + $0x40] sm:$0xff] }
  0x50   :  { %144 = vst.msk [vmem:[#allocation3 + $0x60] sm:$0xff] %vm39_vm0, %v3154_v52  ;;  %v3173_v58 = vld [vmem:[#allocation2 + $0x50] sm:$0xff]  ;;  %v674_v60 = vld [vmem:[#allocation2 + $0x41] sm:$0xff] }
  0x51   :  { %212 = vrot.lane.b32.xlu0 %v3035_v23, %s2822_s17  ;;  %145 = vst.msk [vmem:[#allocation3 + $0x78] sm:$0xff] %vm39_vm0, %v3173_v58  ;;  %v161_v0 = vld [vmem:[#allocation2 + $0x51] sm:$0xff] }
  0x52   :  { %214 = vrot.lane.b32.xlu1 %v3037_v24, %s2822_s17  ;;  %785 = vst.msk [vmem:[#allocation3 + $0x28] sm:$0xff] %vm39_vm0, %v481_v59  ;;  %v3211_v8 = vld [vmem:[#allocation2 + $0x62] sm:$0xff] }
  0x53   :  { %404 = vrot.lane.b32.xlu2 %v3008_v18, %s2824_s29  ;;  %466 = vst.msk [vmem:[#allocation3 + $0x50] sm:$0xff] %vm39_vm0, %v674_v60  ;;  %v3244_v44 = vld [vmem:[#allocation2 + $0x61] sm:$0xff]  ;;  %v163_v51 = vld [vmem:[#allocation2 + $0x71] sm:$0xff] }
  0x54   :  { %467 = vst.msk [vmem:[#allocation3 + $0x68] sm:$0xff] %vm39_vm0, %v161_v0 }
  0x55   :  { %788 = vst.msk [vmem:[#allocation3 + $0x70] sm:$0xff] %vm39_vm0, %v3211_v8 }
  0x56   :  { %468 = vst.msk [vmem:[#allocation3 + $0x80] sm:$0xff] %vm39_vm0, %v3244_v44 }
  0x57   :  { %115 = vst.msk [vmem:[#allocation2 + $0x81] sm:$0xff] %vm39_vm0, %v3260_v49 }
  0x58   :  { %469 = vst.msk [vmem:[#allocation3 + $0x98] sm:$0xff] %vm39_vm0, %v163_v51 }
  0x59   :  { %311 = vrot.lane.b32.xlu0 %v3057_v28, %s2823_s18 }
  0x5a   :  { %406 = vrot.lane.b32.xlu1 %v2994_v15, %s2824_s29 }
  0x5b   :  { %309 = vrot.lane.b32.xlu2 %v3059_v29, %s2823_s18 }
  0x61   :  { %216 = vrot.lane.b32.xlu0 %v3089_v34, %s2822_s17 }
  0x62   :  { %218 = vrot.lane.b32.xlu1 %v3091_v35, %s2822_s17 }
  0x63   :  { %408 = vrot.lane.b32.xlu2 %v3048_v26, %s2824_s29 }
  0x69   :  { %315 = vrot.lane.b32.xlu0 %v3103_v37, %s2823_s18 }
  0x6a   :  { %410 = vrot.lane.b32.xlu1 %v3022_v21, %s2824_s29 }
  0x6b   :  { %313 = vrot.lane.b32.xlu2 %v3105_v38, %s2823_s18 }
  0x71   :  { %188 = vrot.lane.b32.xlu0 %v156_v40, %s2822_s17  ;;  %v2769_v40 = vld [vmem:[%s4285_s1 + $0x78] sm:$0xff] }
  0x72   :  { %190 = vrot.lane.b32.xlu1 %v157_v27, %s2822_s17  ;;  %1089 = vmatpush.bf16.msrb.mxu1 %v2769_v40 }
  0x73   :  { %412 = vrot.lane.b32.xlu2 %v3117_v41, %s2824_s29 }
  0x79   :  { %513 = vrot.lane.b32.xlu0 %v3061_v30, %s2822_s17 }
  0x7a   :  { %285 = vrot.lane.b32.xlu1 %v253_v45, %s2823_s18 }
  0x7b   :  { %511 = vrot.lane.b32.xlu2 %v479_v46, %s2822_s17 }
  0x7c   :  { %v205_v53 = vpop.permute.xlu0 %204 }
  0x7d   :  { %245 = vst.msk [vmem:[#allocation3 + $0xc0] sm:$0xff] %vm236_vm3, %v205_v53 }
  0x81   :  { %608 = vrot.lane.b32.xlu0 %v3067_v31, %s2823_s18 }
  0x82   :  { %610 = vrot.lane.b32.xlu1 %v3099_v36, %s2823_s18 }
  0x83   :  { %287 = vrot.lane.b32.xlu2 %v479_v46, %s2823_s18  ;;  %v302_v56 = vpop.permute.xlu1 %301 }
  0x84   :  { %342 = vst.msk [vmem:[#allocation3 + $0xc0] sm:$0xff] %vm333_vm4, %v302_v56 }
  0x89   :  { %384 = vrot.lane.b32.xlu0 %v3067_v31, %s2824_s29  ;;  %v3223_v31 = vld [vmem:[#allocation2 + $0x60] sm:$0xff] }
  0x8a   :  { %704 = vrot.lane.b32.xlu1 %v3111_v39, %s2824_s29  ;;  %146 = vst.msk [vmem:[#allocation3 + $0x90] sm:$0xff] %vm39_vm0, %v3223_v31 }
  0x8b   :  { %382 = vrot.lane.b32.xlu2 %v350_v48, %s2824_s29 }
  0x91   :  { %192 = vrot.lane.b32.xlu0 %v3111_v39, %s2822_s17 }
  0x92   :  { %194 = vrot.lane.b32.xlu1 %v159_v43, %s2822_s17 }
  0x93   :  { %706 = vrot.lane.b32.xlu2 %v159_v43, %s2824_s29  ;;  %v483_v43 = vld [vmem:[#allocation2 + $0x52] sm:$0xff] }
  0x94   :  { %787 = vst.msk [vmem:[#allocation3 + $0x58] sm:$0xff] %vm39_vm0, %v483_v43 }
  0x95   :  { %v399_v1 = vpop.permute.xlu2 %398 }
  0x96   :  { %439 = vst.msk [vmem:[#allocation3 + $0xc0] sm:$0xff] %vm430_vm5, %v399_v1  ;;  %v124_v1 = vld [vmem:[#allocation2] sm:$0xff] }
  0x97   :  { %140 = vst.msk [vmem:[#allocation3] sm:$0xff] %vm39_vm0, %v124_v1 }
  0x99   :  { %517 = vrot.lane.b32.xlu0 %v3134_v47, %s2822_s17 }
  0x9a   :  { %289 = vrot.lane.b32.xlu1 %v3061_v30, %s2823_s18  ;;  %v3232_v30 = vld [vmem:[#allocation2 + $0x70] sm:$0xff] }
  0x9b   :  { %515 = vrot.lane.b32.xlu2 %v481_v59, %s2822_s17  ;;  %147 = vst.msk [vmem:[#allocation3 + $0xa8] sm:$0xff] %vm39_vm0, %v3232_v30 }
  0x9d   :  { %v401_v27 = vpop.permute.xlu2 %400  ;;  %v824_v55 = vld [vmem:[#allocation3 + $0xc0] sm:$0xff] }
  0xa1   :  { %612 = vrot.lane.b32.xlu0 %v3154_v52, %s2823_s18 }
  0xa2   :  { %614 = vrot.lane.b32.xlu1 %v3173_v58, %s2823_s18 }
  0xa3   :  { %291 = vrot.lane.b32.xlu2 %v481_v59, %s2823_s18  ;;  %v2767_v59 = vld [vmem:[%s4285_s1 + $0x68] sm:$0xff] }
  0xa5   :  { %v306_v39 = vpop.permute.xlu2 %305 }
  0xa9   :  { %388 = vrot.lane.b32.xlu0 %v3154_v52, %s2824_s29 }
  0xaa   :  { %708 = vrot.lane.b32.xlu1 %v674_v60, %s2824_s29 }
  0xab   :  { %386 = vrot.lane.b32.xlu2 %v3099_v36, %s2824_s29  ;;  %v207_v45 = vpop.permute.xlu0 %206  ;;  %v2768_v36 = vld [vmem:[%s4285_s1 + $0x70] sm:$0xff] }
  0xac   :  { %v304_v46 = vpop.permute.xlu1 %303  ;;  %246 = vst.msk [vmem:[#allocation3 + $0xd8] sm:$0xff] %vm236_vm3, %v207_v45  ;;  %1090 = vmatpush.bf16.msrb.mxu1 %v2768_v36  ;;  %v3305_v36 = vld [vmem:[#allocation2 + $0x81] sm:$0xff] }
  0xad   :  { %v405_v48 = vpop.permute.xlu2 %404  ;;  %343 = vst.msk [vmem:[#allocation3 + $0xd8] sm:$0xff] %vm333_vm4, %v304_v46  ;;  %v2765_v46 = vld [vmem:[%s4285_s1 + $0x58] sm:$0xff] }
  0xae   :  { %440 = vst.msk [vmem:[#allocation3 + $0xd8] sm:$0xff] %vm430_vm5, %v401_v27 }
  0xaf   :  { %470 = vst.msk [vmem:[#allocation3 + $0xb0] sm:$0xff] %vm39_vm0, %v3305_v36 }
  0xb0   :  { %1091 = vmatpush.bf16.msrb.mxu1 %v2767_v59 }
  0xb1   :  { %196 = vrot.lane.b32.xlu0 %v674_v60, %s2822_s17  ;;  %v3276_v60 = vld [vmem:[#allocation2 + $0x82] sm:$0xff] }
  0xb2   :  { %198 = vrot.lane.b32.xlu1 %v161_v0, %s2822_s17  ;;  %790 = vst.msk [vmem:[#allocation3 + $0xa0] sm:$0xff] %vm39_vm0, %v3276_v60 }
  0xb3   :  { %710 = vrot.lane.b32.xlu2 %v161_v0, %s2824_s29  ;;  %v209_v52 = vpop.permute.xlu0 %208 }
  0xb4   :  { %v211_v53 = vpop.permute.xlu1 %210  ;;  %247 = vst.msk [vmem:[#allocation3 + $0xf0] sm:$0xff] %vm236_vm3, %v209_v52 }
  0xb5   :  { %v310_v54 = vpop.permute.xlu2 %309  ;;  %344 = vst.msk [vmem:[#allocation3 + $0xf0] sm:$0xff] %vm333_vm4, %v306_v39  ;;  %v827_v56 = vld [vmem:[#allocation3 + $0xd8] sm:$0xff] }
  0xb6   :  { %248 = vst.msk [vmem:[#allocation3 + $0x108] sm:$0xff] %vm236_vm3, %v211_v53  ;;  %v860_v57 = vpack.c.bf16 %v827_v56, %v824_v55  ;;  %v2771_v56 = vld [vmem:[%s4285_s1 + $0x88] sm:$0xff] }
  0xb7   :  { %1144 = vmatpush.bf16.msra.mxu2 %v2771_v56  ;;  %2798 = vmatpush.bf16.msra.mxu3 %v2771_v56 }
  0xb8   :  { %1068 = vmatmul.bf16.vlgmr.msra.gmra.mxu1 %v860_v57 }
  0xb9   :  { %521 = vrot.lane.b32.xlu0 %v3211_v8, %s2822_s17 }
  0xba   :  { %293 = vrot.lane.b32.xlu1 %v3134_v47, %s2823_s18  ;;  %v2766_v47 = vld [vmem:[%s4285_s1 + $0x60] sm:$0xff] }
  0xbb   :  { %519 = vrot.lane.b32.xlu2 %v483_v43, %s2822_s17  ;;  %v308_v61 = vpop.permute.xlu0 %307  ;;  %1092 = vmatpush.bf16.msrb.mxu1 %v2766_v47  ;;  %v805_v47 = vld [vmem:[#allocation3 + $0x28] sm:$0xff] }
  0xbc   :  { %v403_v62 = vpop.permute.xlu1 %402  ;;  %345 = vst.msk [vmem:[#allocation3 + $0x108] sm:$0xff] %vm333_vm4, %v308_v61 }
  0xbd   :  { %v409_v0 = vpop.permute.xlu2 %408  ;;  %442 = vst.msk [vmem:[#allocation3 + $0x108] sm:$0xff] %vm430_vm5, %v405_v48 }
  0xbe   :  { %441 = vst.msk [vmem:[#allocation3 + $0xf0] sm:$0xff] %vm430_vm5, %v403_v62  ;;  %v2770_v62 = vld [vmem:[%s4285_s1 + $0x80] sm:$0xff] }
  0xbf   :  { %1093 = vmatpush.bf16.msrb.mxu1 %v2765_v46  ;;  %1145 = vmatpush.bf16.msra.mxu2 %v2770_v62 }
  0xc0   :  { %2799 = vmatpush.bf16.msra.mxu3 %v2770_v62 }
  0xc1   :  { %616 = vrot.lane.b32.xlu0 %v3223_v31, %s2823_s18 }
  0xc2   :  { %618 = vrot.lane.b32.xlu1 %v3232_v30, %s2823_s18 }
  0xc3   :  { %295 = vrot.lane.b32.xlu2 %v483_v43, %s2823_s18  ;;  %v213_v2 = vpop.permute.xlu0 %212  ;;  %v485_v43 = vld [vmem:[#allocation2 + $0x72] sm:$0xff] }
  0xc4   :  { %v215_v27 = vpop.permute.xlu1 %214  ;;  %249 = vst.msk [vmem:[#allocation3 + $0x120] sm:$0xff] %vm236_vm3, %v213_v2  ;;  %v833_v39 = vld [vmem:[#allocation3 + $0x108] sm:$0xff] }
  0xc5   :  { %v314_v40 = vpop.permute.xlu2 %313  ;;  %346 = vst.msk [vmem:[#allocation3 + $0x120] sm:$0xff] %vm333_vm4, %v310_v54  ;;  %v830_v45 = vld [vmem:[#allocation3 + $0xf0] sm:$0xff] }
  0xc6   :  { %250 = vst.msk [vmem:[#allocation3 + $0x138] sm:$0xff] %vm236_vm3, %v215_v27  ;;  %v863_v48 = vpack.c.bf16 %v833_v39, %v830_v45 }
  0xc7   :  { %789 = vst.msk [vmem:[#allocation3 + $0x88] sm:$0xff] %vm39_vm0, %v485_v43 }
  0xc8   :  { %1073 = vmatmul.bf16.gmra.mxu1 %v863_v48 }
  0xc9   :  { %392 = vrot.lane.b32.xlu0 %v3223_v31, %s2824_s29  ;;  %v2764_v31 = vld [vmem:[%s4285_s1 + $0x50] sm:$0xff] }
  0xca   :  { %712 = vrot.lane.b32.xlu1 %v3244_v44, %s2824_s29  ;;  %1094 = vmatpush.bf16.msrb.mxu1 %v2764_v31 }
  0xcb   :  { %390 = vrot.lane.b32.xlu2 %v3173_v58, %s2824_s29  ;;  %v312_v52 = vpop.permute.xlu0 %311 }
  0xcc   :  { %v407_v53 = vpop.permute.xlu1 %406  ;;  %347 = vst.msk [vmem:[#allocation3 + $0x138] sm:$0xff] %vm333_vm4, %v312_v52 }
  0xcd   :  { %v413_v54 = vpop.permute.xlu2 %412  ;;  %444 = vst.msk [vmem:[#allocation3 + $0x138] sm:$0xff] %vm430_vm5, %v409_v0  ;;  %v802_v0 = vld [vmem:[#allocation3 + $0x10] sm:$0xff] }
  0xce   :  { %443 = vst.msk [vmem:[#allocation3 + $0x120] sm:$0xff] %vm430_vm5, %v407_v53  ;;  %v850_v1 = vpack.c.bf16 %v805_v47, %v802_v0 }
  0xd0   :  { %2661 = vmatmul.msk.bf16.vlgmr.msra.gmra.mxu2 %vm39_vm0, %v850_v1 }
  0xd1   :  { %200 = vrot.lane.b32.xlu0 %v3244_v44, %s2822_s17  ;;  %v2763_v44 = vld [vmem:[%s4285_s1 + $0x48] sm:$0xff] }
  0xd2   :  { %202 = vrot.lane.b32.xlu1 %v163_v51, %s2822_s17  ;;  %1095 = vmatpush.bf16.msrb.mxu1 %v2763_v44 }
  0xd3   :  { %714 = vrot.lane.b32.xlu2 %v163_v51, %s2824_s29  ;;  %v217_v58 = vpop.permute.xlu0 %216 }
  0xd4   :  { %v219_v55 = vpop.permute.xlu1 %218  ;;  %251 = vst.msk [vmem:[#allocation3 + $0x150] sm:$0xff] %vm236_vm3, %v217_v58  ;;  %v839_v57 = vld [vmem:[#allocation3 + $0x138] sm:$0xff] }
  0xd5   :  { %v512_v59 = vpop.permute.xlu2 %511  ;;  %348 = vst.msk [vmem:[#allocation3 + $0x150] sm:$0xff] %vm333_vm4, %v314_v40  ;;  %v836_v61 = vld [vmem:[#allocation3 + $0x120] sm:$0xff]  ;;  %v3345_v40 = vld [vmem:[#allocation2 + $0x90] sm:$0xff] }
  0xd6   :  { %252 = vst.msk [vmem:[#allocation3 + $0x168] sm:$0xff] %vm236_vm3, %v219_v55  ;;  %v866_v51 = vpack.c.bf16 %v839_v57, %v836_v61  ;;  %v3362_v55 = vld [vmem:[#allocation2 + $0x91] sm:$0xff] }
  0xd7   :  { %559 = vst.msk [vmem:[#allocation3 + $0x8] sm:$0xff] %vm236_vm3, %v512_v59 }
  0xd8   :  { %1078 = vmatmul.bf16.gmra.mxu1 %v866_v51 }
  0xd9   :  { %525 = vrot.lane.b32.xlu0 %v3276_v60, %s2822_s17  ;;  %v582_v60 = vld [vmem:[#allocation2 + $0x80] sm:$0xff] }
  0xda   :  { %297 = vrot.lane.b32.xlu1 %v3211_v8, %s2823_s18  ;;  %v2762_v8 = vld [vmem:[%s4285_s1 + $0x40] sm:$0xff] }
  0xdb   :  { %523 = vrot.lane.b32.xlu2 %v485_v43, %s2822_s17  ;;  %v316_v2 = vpop.permute.xlu0 %315  ;;  %1096 = vmatpush.bf16.msrb.mxu1 %v2762_v8  ;;  %v814_v8 = vld [vmem:[#allocation3 + $0x70] sm:$0xff] }
  0xdc   :  { %v411_v27 = vpop.permute.xlu1 %410  ;;  %349 = vst.msk [vmem:[#allocation3 + $0x168] sm:$0xff] %vm333_vm4, %v316_v2 }
  0xdd   :  { %v288_v39 = vpop.permute.xlu2 %287  ;;  %446 = vst.msk [vmem:[#allocation3 + $0x168] sm:$0xff] %vm430_vm5, %v413_v54 }
  0xde   :  { %445 = vst.msk [vmem:[#allocation3 + $0x150] sm:$0xff] %vm430_vm5, %v411_v27 }
  0xe1   :  { %620 = vrot.lane.b32.xlu0 %v582_v60, %s2823_s18 }
  0xe2   :  { %622 = vrot.lane.b32.xlu1 %v3345_v40, %s2823_s18 }
  0xe3   :  { %299 = vrot.lane.b32.xlu2 %v485_v43, %s2823_s18  ;;  %v189_v45 = vpop.permute.xlu0 %188 }
  0xe4   :  { %v191_v46 = vpop.permute.xlu1 %190  ;;  %237 = vst.msk [vmem:[#allocation3] sm:$0xff] %vm236_vm3, %v189_v45  ;;  %v845_v48 = vld [vmem:[#allocation3 + $0x168] sm:$0xff] }
  0xe5   :  { %v383_v52 = vpop.permute.xlu2 %382  ;;  %238 = vst.msk [vmem:[#allocation3 + $0x18] sm:$0xff] %vm236_vm3, %v191_v46  ;;  %v842_v53 = vld [vmem:[#allocation3 + $0x150] sm:$0xff] }
  0xe6   :  { %v869_v54 = vpack.c.bf16 %v845_v48, %v842_v53  ;;  %335 = vst.msk [vmem:[#allocation3 + $0x18] sm:$0xff] %vm333_vm4, %v288_v39 }
  0xe8   :  { %1083 = vmatmul.bf16.gmra.mxu1 %v869_v54 }
  0xe9   :  { %396 = vrot.lane.b32.xlu0 %v582_v60, %s2824_s29  ;;  %v817_v60 = vld [vmem:[#allocation3 + $0x88] sm:$0xff] }
  0xea   :  { %716 = vrot.lane.b32.xlu1 %v3305_v36, %s2824_s29  ;;  %v856_v45 = vpack.c.bf16 %v817_v60, %v814_v8 }
  0xeb   :  { %394 = vrot.lane.b32.xlu2 %v3232_v30, %s2824_s29  ;;  %v514_v43 = vpop.permute.xlu0 %513 }
  0xec   :  { %v286_v31 = vpop.permute.xlu1 %285  ;;  %560 = vst.msk [vmem:[#allocation3 + $0x20] sm:$0xff] %vm236_vm3, %v514_v43 }
  0xed   :  { %v707_v58 = vpop.permute.xlu2 %706  ;;  %334 = vst.msk [vmem:[#allocation3] sm:$0xff] %vm333_vm4, %v286_v31 }
  0xee   :  { %431 = vst.msk [vmem:[#allocation3] sm:$0xff] %vm430_vm5, %v383_v52 }
  0xf1   :  { %527 = vrot.lane.b32.xlu0 %v2967_v9, %s2822_s17  ;;  %v808_v9 = vld [vmem:[#allocation3 + $0x40] sm:$0xff] }
  0xf2   :  { %529 = vrot.lane.b32.xlu1 %v3016_v20, %s2822_s17  ;;  %v811_v20 = vld [vmem:[#allocation3 + $0x58] sm:$0xff] }
  0xf3   :  { %718 = vrot.lane.b32.xlu2 %v3362_v55, %s2824_s29  ;;  %v609_v30 = vpop.permute.xlu0 %608  ;;  %v853_v57 = vpack.c.bf16 %v811_v20, %v808_v9 }
  0xf4   :  { %v611_v36 = vpop.permute.xlu1 %610  ;;  %656 = vst.msk [vmem:[#allocation3 + $0x8] sm:$0xff] %vm333_vm4, %v609_v30  ;;  %v687_v30 = vld [vmem:[#allocation2 + $0x131] sm:$0xff] }
  0xf5   :  { %v516_v56 = vpop.permute.xlu2 %515  ;;  %657 = vst.msk [vmem:[#allocation3 + $0x20] sm:$0xff] %vm333_vm4, %v611_v36  ;;  %2662 = vmatmul.msk.bf16.gmra.mxu2 %vm39_vm0, %v853_v57  ;;  %v800_v62 = vld [vmem:[#allocation3] sm:$0xff]  ;;  %v775_v36 = vld [vmem:[#allocation2 + $0x92] sm:$0xff] }
  0xf6   :  { %753 = vst.msk [vmem:[#allocation3 + $0x20] sm:$0xff] %vm430_vm5, %v707_v58  ;;  %v820_v57 = vld [vmem:[#allocation3 + $0xa0] sm:$0xff] }
  0xf7   :  { %561 = vst.msk [vmem:[#allocation3 + $0x38] sm:$0xff] %vm236_vm3, %v516_v56 }
  0xf8   :  { %791 = vst.msk [vmem:[#allocation3 + $0xb8] sm:$0xff] %vm39_vm0, %v775_v36 }
  0xf9   :  { %626 = vrot.lane.b32.xlu0 %v2976_v12, %s2823_s18  ;;  %v494_v12 = vld [vmem:[#allocation2 + $0x122] sm:$0xff] }
  0xfa   :  { %720 = vrot.lane.b32.xlu1 %v2998_v16, %s2824_s29  ;;  %798 = vst.msk [vmem:[#allocation3 + $0x160] sm:$0xff] %vm39_vm0, %v494_v12 }
  0xfb   :  { %624 = vrot.lane.b32.xlu2 %v2972_v11, %s2823_s18  ;;  %v385_v59 = vpop.permute.xlu0 %384 }
  0xfc   :  { %v705_v61 = vpop.permute.xlu1 %704  ;;  %432 = vst.msk [vmem:[#allocation3 + $0x18] sm:$0xff] %vm430_vm5, %v385_v59 }
  0xfd   :  { %v292_v44 = vpop.permute.xlu2 %291  ;;  %752 = vst.msk [vmem:[#allocation3 + $0x8] sm:$0xff] %vm430_vm5, %v705_v61  ;;  %v804_v16 = vld [vmem:[#allocation3 + $0x20] sm:$0xff] }
  0xff   :  { %v823_v59 = vld [vmem:[#allocation3 + $0xb8] sm:$0xff] }
 0x100   :  { %v859_v61 = vpack.c.bf16 %v823_v59, %v820_v57  ;;  %1922 = vst.msk [vmem:[#allocation3 + $0xb8] sm:$0xff] %vm39_vm0, %v775_v36 }
 0x101   :  { %531 = vrot.lane.b32.xlu0 %v3014_v19, %s2822_s17 }
 0x102   :  { %533 = vrot.lane.b32.xlu1 %v3059_v29, %s2822_s17 }
 0x103   :  { %722 = vrot.lane.b32.xlu2 %v3000_v17, %s2824_s29  ;;  %v193_v11 = vpop.permute.xlu0 %192  ;;  %v803_v0 = vld [vmem:[#allocation3 + $0x18] sm:$0xff]  ;;  %v686_v17 = vld [vmem:[#allocation2 + $0x121] sm:$0xff] }
 0x104   :  { %v195_v51 = vpop.permute.xlu1 %194  ;;  %239 = vst.msk [vmem:[#allocation3 + $0x30] sm:$0xff] %vm236_vm3, %v193_v11  ;;  %v848_v47 = vpack.c.bf16 %v803_v0, %v800_v62  ;;  %v801_v1 = vld [vmem:[#allocation3 + $0x8] sm:$0xff]  ;;  %v455_v11 = vld [vmem:[#allocation2 + $0xb1] sm:$0xff] }
 0x105   :  { %v387_v2 = vpop.permute.xlu2 %386  ;;  %240 = vst.msk [vmem:[#allocation3 + $0x48] sm:$0xff] %vm236_vm3, %v195_v51  ;;  %v849_v19 = vpack.c.bf16 %v804_v16, %v801_v1  ;;  %2663 = vmatmul.msk.bf16.gmra.mxu2 %vm39_vm0, %v856_v45  ;;  %v457_v45 = vld [vmem:[#allocation2 + $0xd1] sm:$0xff] }
 0x106   :  { %1048 = vmatmul.bf16.vlgmr.msra.gmra.mxu0 %v848_v47  ;;  %337 = vst.msk [vmem:[#allocation3 + $0x48] sm:$0xff] %vm333_vm4, %v292_v44 }
 0x107   :  { %1097 = vmatmul.bf16.vlgmr.msrb.gmra.mxu1 %v849_v19  ;;  %478 = vst.msk [vmem:[#allocation3 + $0x170] sm:$0xff] %vm39_vm0, %v686_v17 }
 0x108   :  { %471 = vst.msk [vmem:[#allocation3 + $0xc8] sm:$0xff] %vm39_vm0, %v455_v11 }
 0x109   :  { %630 = vrot.lane.b32.xlu0 %v2994_v15, %s2823_s18  ;;  %473 = vst.msk [vmem:[#allocation3 + $0xf8] sm:$0xff] %vm39_vm0, %v457_v45 }
 0x10a   :  { %724 = vrot.lane.b32.xlu1 %v3035_v23, %s2824_s29 }
 0x10b   :  { %628 = vrot.lane.b32.xlu2 %v3008_v18, %s2823_s18  ;;  %v518_v29 = vpop.permute.xlu0 %517 }
 0x10c   :  { %v290_v27 = vpop.permute.xlu1 %289  ;;  %562 = vst.msk [vmem:[#allocation3 + $0x50] sm:$0xff] %vm236_vm3, %v518_v29 }
 0x10d   :  { %v711_v39 = vpop.permute.xlu2 %710  ;;  %336 = vst.msk [vmem:[#allocation3 + $0x30] sm:$0xff] %vm333_vm4, %v290_v27  ;;  %v456_v27 = vld [vmem:[#allocation2 + $0xc1] sm:$0xff] }
 0x10e   :  { %433 = vst.msk [vmem:[#allocation3 + $0x30] sm:$0xff] %vm430_vm5, %v387_v2 }
 0x10f   :  { %472 = vst.msk [vmem:[#allocation3 + $0xe0] sm:$0xff] %vm39_vm0, %v456_v27 }
 0x111   :  { %535 = vrot.lane.b32.xlu0 %v3057_v28, %s2822_s17 }
 0x112   :  { %537 = vrot.lane.b32.xlu1 %v3105_v38, %s2822_s17 }
 0x113   :  { %726 = vrot.lane.b32.xlu2 %v3037_v24, %s2824_s29  ;;  %v613_v15 = vpop.permute.xlu0 %612 }
 0x114   :  { %v615_v18 = vpop.permute.xlu1 %614  ;;  %658 = vst.msk [vmem:[#allocation3 + $0x38] sm:$0xff] %vm333_vm4, %v613_v15  ;;  %v777_v15 = vld [vmem:[#allocation2 + $0xd2] sm:$0xff] }
 0x115   :  { %v520_v23 = vpop.permute.xlu2 %519  ;;  %659 = vst.msk [vmem:[#allocation3 + $0x50] sm:$0xff] %vm333_vm4, %v615_v18  ;;  %v806_v48 = vld [vmem:[#allocation3 + $0x30] sm:$0xff]  ;;  %2664 = vmatmul.msk.bf16.gmra.mxu2 %vm39_vm0, %v859_v61 }
 0x116   :  { %755 = vst.msk [vmem:[#allocation3 + $0x50] sm:$0xff] %vm430_vm5, %v711_v39  ;;  %v776_v39 = vld [vmem:[#allocation2 + $0xc2] sm:$0xff] }
 0x117   :  { %563 = vst.msk [vmem:[#allocation3 + $0x68] sm:$0xff] %vm236_vm3, %v520_v23 }
 0x118   :  { %792 = vst.msk [vmem:[#allocation3 + $0xd0] sm:$0xff] %vm39_vm0, %v776_v39 }
 0x119   :  { %634 = vrot.lane.b32.xlu0 %v3022_v21, %s2823_s18  ;;  %793 = vst.msk [vmem:[#allocation3 + $0xe8] sm:$0xff] %vm39_vm0, %v777_v15 }
 0x11a   :  { %728 = vrot.lane.b32.xlu1 %v3089_v34, %s2824_s29 }
 0x11b   :  { %632 = vrot.lane.b32.xlu2 %v3048_v26, %s2823_s18  ;;  %v389_v24 = vpop.permute.xlu0 %388 }
 0x11c   :  { %v709_v28 = vpop.permute.xlu1 %708  ;;  %434 = vst.msk [vmem:[#allocation3 + $0x48] sm:$0xff] %vm430_vm5, %v389_v24 }
 0x11d   :  { %v296_v38 = vpop.permute.xlu2 %295  ;;  %754 = vst.msk [vmem:[#allocation3 + $0x38] sm:$0xff] %vm430_vm5, %v709_v28  ;;  %v810_v46 = vld [vmem:[#allocation3 + $0x50] sm:$0xff] }
 0x11f   :  { %v826_v24 = vld [vmem:[#allocation3 + $0xd0] sm:$0xff] }
 0x120   :  { %v829_v28 = vld [vmem:[#allocation3 + $0xe8] sm:$0xff] }
 0x121   :  { %539 = vrot.lane.b32.xlu0 %v3103_v37, %s2822_s17  ;;  %v591_v37 = vld [vmem:[#allocation2 + $0x130] sm:$0xff] }
 0x122   :  { %541 = vrot.lane.b32.xlu1 %v494_v12, %s2822_s17 }
 0x123   :  { %730 = vrot.lane.b32.xlu2 %v3091_v35, %s2824_s29  ;;  %v197_v21 = vpop.permute.xlu0 %196  ;;  %v809_v26 = vld [vmem:[#allocation3 + $0x48] sm:$0xff] }
 0x124   :  { %v199_v34 = vpop.permute.xlu1 %198  ;;  %241 = vst.msk [vmem:[#allocation3 + $0x60] sm:$0xff] %vm236_vm3, %v197_v21  ;;  %v851_v52 = vpack.c.bf16 %v809_v26, %v806_v48  ;;  %v807_v53 = vld [vmem:[#allocation3 + $0x38] sm:$0xff]  ;;  %v862_v21 = vpack.c.bf16 %v829_v28, %v826_v24  ;;  %v458_v26 = vld [vmem:[#allocation2 + $0xe1] sm:$0xff] }
 0x125   :  { %v391_v54 = vpop.permute.xlu2 %390  ;;  %242 = vst.msk [vmem:[#allocation3 + $0x78] sm:$0xff] %vm236_vm3, %v199_v34  ;;  %v852_v43 = vpack.c.bf16 %v810_v46, %v807_v53  ;;  %v779_v53 = vld [vmem:[#allocation2 + $0xf2] sm:$0xff] }
 0x126   :  { %1053 = vmatmul.bf16.gmra.mxu0 %v851_v52  ;;  %339 = vst.msk [vmem:[#allocation3 + $0x78] sm:$0xff] %vm333_vm4, %v296_v38  ;;  %2665 = vmatmul.msk.bf16.gmra.mxu2 %vm39_vm0, %v862_v21  ;;  %v778_v52 = vld [vmem:[#allocation2 + $0xe2] sm:$0xff]  ;;  %v461_v28 = vld [vmem:[#allocation2 + $0x111] sm:$0xff] }
 0x127   :  { %1102 = vmatmul.bf16.gmra.mxu1 %v852_v43  ;;  %474 = vst.msk [vmem:[#allocation3 + $0x110] sm:$0xff] %vm39_vm0, %v458_v26 }
 0x128   :  { %794 = vst.msk [vmem:[#allocation3 + $0x100] sm:$0xff] %vm39_vm0, %v778_v52 }
 0x129   :  { %638 = vrot.lane.b32.xlu0 %v591_v37, %s2823_s18  ;;  %795 = vst.msk [vmem:[#allocation3 + $0x118] sm:$0xff] %vm39_vm0, %v779_v53 }
 0x12a   :  { %732 = vrot.lane.b32.xlu1 %v686_v17, %s2824_s29  ;;  %477 = vst.msk [vmem:[#allocation3 + $0x158] sm:$0xff] %vm39_vm0, %v461_v28 }
 0x12b   :  { %636 = vrot.lane.b32.xlu2 %v3117_v41, %s2823_s18  ;;  %v522_v35 = vpop.permute.xlu0 %521 }
 0x12c   :  { %v294_v31 = vpop.permute.xlu1 %293  ;;  %564 = vst.msk [vmem:[#allocation3 + $0x80] sm:$0xff] %vm236_vm3, %v522_v35 }
 0x12d   :  { %v715_v58 = vpop.permute.xlu2 %714  ;;  %338 = vst.msk [vmem:[#allocation3 + $0x60] sm:$0xff] %vm333_vm4, %v294_v31  ;;  %v1387_v31 = vld [vmem:[#allocation2 + $0x2] sm:$0xff] }
 0x12e   :  { %435 = vst.msk [vmem:[#allocation3 + $0x60] sm:$0xff] %vm430_vm5, %v391_v54 }
 0x132   :  { %1419 = vrot.lane.b32.xlu1 %v1387_v31, %s2823_s18 }
 0x133   :  { %734 = vrot.lane.b32.xlu2 %v687_v30, %s2824_s29  ;;  %v617_v56 = vpop.permute.xlu0 %616  ;;  %v832_v30 = vld [vmem:[#allocation3 + $0x100] sm:$0xff] }
 0x134   :  { %v619_v9 = vpop.permute.xlu1 %618  ;;  %660 = vst.msk [vmem:[#allocation3 + $0x68] sm:$0xff] %vm333_vm4, %v617_v56  ;;  %v835_v56 = vld [vmem:[#allocation3 + $0x118] sm:$0xff] }
 0x135   :  { %v524_v41 = vpop.permute.xlu2 %523  ;;  %661 = vst.msk [vmem:[#allocation3 + $0x80] sm:$0xff] %vm333_vm4, %v619_v9  ;;  %v3441_v20 = vpop.f32.mrf.mxu1  ;;  %v812_v1 = vld [vmem:[#allocation3 + $0x60] sm:$0xff]  ;;  %v865_v61 = vpack.c.bf16 %v835_v56, %v832_v30 }
 0x136   :  { %757 = vst.msk [vmem:[#allocation3 + $0x80] sm:$0xff] %vm430_vm5, %v715_v58  ;;  %v459_v58 = vld [vmem:[#allocation2 + $0xf1] sm:$0xff] }
 0x137   :  { %565 = vst.msk [vmem:[#allocation3 + $0x98] sm:$0xff] %vm236_vm3, %v524_v41  ;;  %2666 = vmatmul.msk.bf16.vlgmr.msra.gmra.mxu3 %vm39_vm0, %v865_v61 }
 0x138   :  { %475 = vst.msk [vmem:[#allocation3 + $0x128] sm:$0xff] %vm39_vm0, %v459_v58 }
 0x13a   :  { %1753 = vrot.lane.b32.xlu1 %v3345_v40, %s2823_s18  ;;  %v1395_v40 = vld [vmem:[#allocation2 + $0xa2] sm:$0xff] }
 0x13b   :  { %1849 = vrot.lane.b32.xlu2 %v3362_v55, %s2824_s29  ;;  %v393_v44 = vpop.permute.xlu0 %392 }
 0x13c   :  { %v713_v12 = vpop.permute.xlu1 %712  ;;  %436 = vst.msk [vmem:[#allocation3 + $0x78] sm:$0xff] %vm430_vm5, %v393_v44 }
 0x13d   :  { %v300_v16 = vpop.permute.xlu2 %299  ;;  %756 = vst.msk [vmem:[#allocation3 + $0x68] sm:$0xff] %vm430_vm5, %v713_v12  ;;  %v3452_v51 = vpop.f32.mrf.mxu1  ;;  %v816_v62 = vld [vmem:[#allocation3 + $0x80] sm:$0xff] }
 0x142   :  { %1435 = vrot.lane.b32.xlu1 %v1395_v40, %s2823_s18 }
 0x143   :  { %v201_v0 = vpop.permute.xlu0 %200  ;;  %v815_v2 = vld [vmem:[#allocation3 + $0x78] sm:$0xff] }
 0x144   :  { %v203_v47 = vpop.permute.xlu1 %202  ;;  %243 = vst.msk [vmem:[#allocation3 + $0x90] sm:$0xff] %vm236_vm3, %v201_v0  ;;  %v854_v55 = vpack.c.bf16 %v815_v2, %v812_v1  ;;  %v813_v19 = vld [vmem:[#allocation3 + $0x68] sm:$0xff] }
 0x145   :  { %v395_v17 = vpop.permute.xlu2 %394  ;;  %244 = vst.msk [vmem:[#allocation3 + $0xa8] sm:$0xff] %vm236_vm3, %v203_v47  ;;  %v855_v29 = vpack.c.bf16 %v816_v62, %v813_v19  ;;  %v3458_v18 = vpop.f32.mrf.mxu1  ;;  %v780_v0 = vld [vmem:[#allocation2 + $0x102] sm:$0xff] }
 0x146   :  { %1058 = vmatmul.bf16.gmra.mxu0 %v854_v55  ;;  %341 = vst.msk [vmem:[#allocation3 + $0xa8] sm:$0xff] %vm333_vm4, %v300_v16  ;;  %v460_v47 = vld [vmem:[#allocation2 + $0x101] sm:$0xff]  ;;  %v781_v55 = vld [vmem:[#allocation2 + $0x112] sm:$0xff] }
 0x147   :  { %1107 = vmatmul.bf16.gmra.mxu1 %v855_v29  ;;  %796 = vst.msk [vmem:[#allocation3 + $0x130] sm:$0xff] %vm39_vm0, %v780_v0  ;;  %v1291_v19 = vld [vmem:[#allocation2 + $0x1] sm:$0xff] }
 0x148   :  { %476 = vst.msk [vmem:[#allocation3 + $0x140] sm:$0xff] %vm39_vm0, %v460_v47  ;;  %1323 = vrot.lane.b32.xlu0 %v1291_v19, %s2822_s17 }
 0x149   :  { %797 = vst.msk [vmem:[#allocation3 + $0x148] sm:$0xff] %vm39_vm0, %v781_v55 }
 0x14b   :  { %v526_v23 = vpop.permute.xlu0 %525 }
 0x14c   :  { %v298_v8 = vpop.permute.xlu1 %297  ;;  %566 = vst.msk [vmem:[#allocation3 + $0xb0] sm:$0xff] %vm236_vm3, %v526_v23 }
 0x14d   :  { %v719_v60 = vpop.permute.xlu2 %718  ;;  %340 = vst.msk [vmem:[#allocation3 + $0x90] sm:$0xff] %vm333_vm4, %v298_v8  ;;  %v3466_v34 = vpop.f32.mrf.mxu1 }
 0x14e   :  { %437 = vst.msk [vmem:[#allocation3 + $0x90] sm:$0xff] %vm430_vm5, %v395_v17  ;;  %v838_v23 = vld [vmem:[#allocation3 + $0x130] sm:$0xff] }
 0x150   :  { %v841_v45 = vld [vmem:[#allocation3 + $0x148] sm:$0xff] }
 0x151   :  { %v868_v24 = vpack.c.bf16 %v841_v45, %v838_v23 }
 0x153   :  { %v621_v38 = vpop.permute.xlu0 %620  ;;  %2667 = vmatmul.msk.bf16.gmra.mxu3 %vm39_vm0, %v868_v24 }
 0x154   :  { %v623_v46 = vpop.permute.xlu1 %622  ;;  %662 = vst.msk [vmem:[#allocation3 + $0x98] sm:$0xff] %vm333_vm4, %v621_v38  ;;  %v1299_v38 = vld [vmem:[#allocation2 + $0xa1] sm:$0xff] }
 0x155   :  { %v625_v48 = vpop.permute.xlu2 %624  ;;  %663 = vst.msk [vmem:[#allocation3 + $0xb0] sm:$0xff] %vm333_vm4, %v623_v46  ;;  %v3477_v37 = vpop.f32.mrf.mxu1  ;;  %v818_v57 = vld [vmem:[#allocation3 + $0x90] sm:$0xff]  ;;  %1339 = vrot.lane.b32.xlu0 %v1299_v38, %s2822_s17 }
 0x156   :  { %759 = vst.msk [vmem:[#allocation3 + $0xb0] sm:$0xff] %vm430_vm5, %v719_v60  ;;  %v783_v46 = vld [vmem:[#allocation2 + $0x132] sm:$0xff] }
 0x157   :  { %799 = vst.msk [vmem:[#allocation3 + $0x178] sm:$0xff] %vm39_vm0, %v783_v46 }
 0x15b   :  { %v397_v54 = vpop.permute.xlu0 %396 }
 0x15c   :  { %v717_v43 = vpop.permute.xlu1 %716  ;;  %438 = vst.msk [vmem:[#allocation3 + $0xa8] sm:$0xff] %vm430_vm5, %v397_v54  ;;  %v1147_v54 = vpop.f32.mrf.mxu2 }
 0x15d   :  { %758 = vst.msk [vmem:[#allocation3 + $0x98] sm:$0xff] %vm430_vm5, %v717_v43  ;;  %v723_v35 = vpop.permute.xlu2 %722  ;;  %v822_v36 = vld [vmem:[#allocation3 + $0xb0] sm:$0xff]  ;;  %v3487_v11 = vpop.f32.mrf.mxu1  ;;  %v844_v43 = vld [vmem:[#allocation3 + $0x160] sm:$0xff] }
 0x15e   :  { %v847_v53 = vld [vmem:[#allocation3 + $0x178] sm:$0xff] }
 0x15f   :  { %1930 = vst.msk [vmem:[#allocation3 + $0x178] sm:$0xff] %vm39_vm0, %v783_v46 }
 0x163   :  { %v528_v9 = vpop.permute.xlu0 %527  ;;  %v821_v59 = vld [vmem:[#allocation3 + $0xa8] sm:$0xff] }
 0x164   :  { %v530_v41 = vpop.permute.xlu1 %529  ;;  %567 = vst.msk [vmem:[#allocation3 + $0xc8] sm:$0xff] %vm236_vm3, %v528_v9  ;;  %v857_v44 = vpack.c.bf16 %v821_v59, %v818_v57  ;;  %v819_v12 = vld [vmem:[#allocation3 + $0x98] sm:$0xff]  ;;  %v3517_v9 = vld [vmem:[%s4286_s2] ss:$0 sm:$0xff]  ;;  %v871_v57 = vpack.c.bf16 %v847_v53, %v844_v43  ;;  %v1149_v40 = vpop.f32.mrf.mxu2 }
 0x165   :  { %664 = vst.msk [vmem:[#allocation3 + $0xc8] sm:$0xff] %vm333_vm4, %v625_v48  ;;  %v858_v16 = vpack.c.bf16 %v822_v36, %v819_v12  ;;  %v629_v62 = vpop.permute.xlu2 %628  ;;  %v3497_v17 = vpop.f32.mrf.mxu1  ;;  %v3523_v12 = vld [vmem:[%s4287_s3] ss:$0 sm:$0xff] }
 0x166   :  { %568 = vst.msk [vmem:[#allocation3 + $0xe0] sm:$0xff] %vm236_vm3, %v530_v41  ;;  %1063 = vmatmul.bf16.gmra.mxu0 %v857_v44  ;;  %2668 = vmatmul.msk.bf16.gmra.mxu3 %vm39_vm0, %v871_v57  ;;  %v2788_v53 = vld [vmem:[%s4288_s4 + $0x80] sm:$0xff] }
 0x167   :  { %1112 = vmatmul.bf16.gmra.mxu1 %v858_v16 }
 0x16b   :  { %v627_v1 = vpop.permute.xlu0 %626 }
 0x16c   :  { %v721_v2 = vpop.permute.xlu1 %720  ;;  %665 = vst.msk [vmem:[#allocation3 + $0xe0] sm:$0xff] %vm333_vm4, %v627_v1 }
 0x16d   :  { %761 = vst.msk [vmem:[#allocation3 + $0xe0] sm:$0xff] %vm430_vm5, %v723_v35  ;;  %v727_v29 = vpop.permute.xlu2 %726  ;;  %v3506_v26 = vpop.f32.mrf.mxu1 }
 0x16e   :  { %760 = vst.msk [vmem:[#allocation3 + $0xc8] sm:$0xff] %vm430_vm5, %v721_v2 }
 0x173   :  { %v532_v27 = vpop.permute.xlu0 %531 }
 0x174   :  { %v534_v39 = vpop.permute.xlu1 %533  ;;  %569 = vst.msk [vmem:[#allocation3 + $0xf8] sm:$0xff] %vm236_vm3, %v532_v27  ;;  %v828_v15 = vld [vmem:[#allocation3 + $0xe0] sm:$0xff] }
 0x175   :  { %666 = vst.msk [vmem:[#allocation3 + $0xf8] sm:$0xff] %vm333_vm4, %v629_v62  ;;  %v825_v8 = vld [vmem:[#allocation3 + $0xc8] sm:$0xff]  ;;  %v633_v52 = vpop.permute.xlu2 %632 }
 0x176   :  { %570 = vst.msk [vmem:[#allocation3 + $0x110] sm:$0xff] %vm236_vm3, %v534_v39  ;;  %v861_v60 = vpack.c.bf16 %v828_v15, %v825_v8 }
 0x178   :  { %1117 = vmatmul.bf16.gmra.mxu1 %v861_v60 }
 0x17b   :  { %v631_v21 = vpop.permute.xlu0 %630 }
 0x17c   :  { %v725_v48 = vpop.permute.xlu1 %724  ;;  %667 = vst.msk [vmem:[#allocation3 + $0x110] sm:$0xff] %vm333_vm4, %v631_v21 }
 0x17d   :  { %763 = vst.msk [vmem:[#allocation3 + $0x110] sm:$0xff] %vm430_vm5, %v727_v29  ;;  %v731_v61 = vpop.permute.xlu2 %730 }
 0x17e   :  { %762 = vst.msk [vmem:[#allocation3 + $0xf8] sm:$0xff] %vm430_vm5, %v725_v48  ;;  %v2789_v48 = vld [vmem:[%s4288_s4 + $0x88] sm:$0xff] }
 0x17f   :  { %2275 = vmatpush.bf16.msrb.mxu0 %v2789_v48 }
 0x183   :  { %v536_v35 = vpop.permute.xlu0 %535  ;;  %v1049_v31 = vpop.f32.mrf.mxu0  ;;  %2276 = vmatpush.bf16.msrb.mxu0 %v2788_v53 }
 0x184   :  { %571 = vst.msk [vmem:[#allocation3 + $0x128] sm:$0xff] %vm236_vm3, %v536_v35  ;;  %v1098_v58 = vpop.f32.mrf.mxu1  ;;  %v538_v30 = vpop.permute.xlu1 %537  ;;  %v834_v36 = vld [vmem:[#allocation3 + $0x110] sm:$0xff] }
 0x185   :  { %668 = vst.msk [vmem:[#allocation3 + $0x128] sm:$0xff] %vm333_vm4, %v633_v52  ;;  %v1099_v56 = vadd.f32 %v1098_v58, %v1049_v31  ;;  %v831_v41 = vld [vmem:[#allocation3 + $0xf8] sm:$0xff]  ;;  %v637_v27 = vpop.permute.xlu2 %636 }
 0x186   :  { %572 = vst.msk [vmem:[#allocation3 + $0x140] sm:$0xff] %vm236_vm3, %v538_v30  ;;  %v864_v59 = vpack.c.bf16 %v834_v36, %v831_v41  ;;  %v1152_v36 = vpop.f32.mrf.mxu2 }
 0x187   :  { %v1148_v44 = vadd.f32 %v1147_v54, %v1099_v56 }
 0x188   :  { %1122 = vmatmul.bf16.gmra.mxu1 %v864_v59 }
 0x189   :  { %v1191_v16 = vmul.f32 %v3517_v9, %v1148_v44 }
 0x18b   :  { %v1211_v62 = vadd.f32 %v3523_v12, %v1191_v16  ;;  %v635_v0 = vpop.permute.xlu0 %634  ;;  %v1051_v47 = vpop.f32.mrf.mxu0 }
 0x18c   :  { %669 = vst.msk [vmem:[#allocation3 + $0x140] sm:$0xff] %vm333_vm4, %v635_v0  ;;  %v1100_v1 = vpop.f32.mrf.mxu1  ;;  %v729_v2 = vpop.permute.xlu1 %728 }
 0x18d   :  { %v1227_v55 = vmax.f32 %v1211_v62, 0.0  ;;  %765 = vst.msk [vmem:[#allocation3 + $0x140] sm:$0xff] %vm430_vm5, %v731_v61  ;;  %v1101_v19 = vadd.f32 %v1100_v1, %v1051_v47  ;;  %v735_v52 = vpop.permute.xlu2 %734 }
 0x18e   :  { %764 = vst.msk [vmem:[#allocation3 + $0x128] sm:$0xff] %vm430_vm5, %v729_v2 }
 0x18f   :  { %1243 = vst.msk [vmem:[#allocation2 + $0x11] sm:$0xff] %vm39_vm0, %v1227_v55  ;;  %v1150_v29 = vadd.f32 %v1149_v40, %v1101_v19  ;;  %v1154_v55 = vpop.f32.mrf.mxu2 }
 0x191   :  { %v1192_v39 = vmul.f32 %v3517_v9, %v1150_v29 }
 0x193   :  { %v1212_v15 = vadd.f32 %v3523_v12, %v1192_v39  ;;  %v540_v23 = vpop.permute.xlu0 %539 }
 0x194   :  { %573 = vst.msk [vmem:[#allocation3 + $0x158] sm:$0xff] %vm236_vm3, %v540_v23  ;;  %v542_v8 = vpop.permute.xlu1 %541  ;;  %v840_v60 = vld [vmem:[#allocation3 + $0x140] sm:$0xff] }
 0x195   :  { %v1228_v45 = vmax.f32 %v1212_v15, 0.0  ;;  %670 = vst.msk [vmem:[#allocation3 + $0x158] sm:$0xff] %vm333_vm4, %v637_v27  ;;  %v837_v24 = vld [vmem:[#allocation3 + $0x128] sm:$0xff] }
 0x196   :  { %574 = vst.msk [vmem:[#allocation3 + $0x170] sm:$0xff] %vm236_vm3, %v542_v8  ;;  %v867_v28 = vpack.c.bf16 %v840_v60, %v837_v24  ;;  %v1611_v38 = vld [vmem:[#allocation2 + $0x12] sm:$0xff] }
 0x197   :  { %v1292_v46 = vld [vmem:[#allocation2 + $0x11] sm:$0xff]  ;;  %1244 = vst.msk [vmem:[#allocation2 + $0x21] sm:$0xff] %vm39_vm0, %v1228_v45  ;;  %1643 = vrot.lane.b32.xlu2 %v1611_v38, %s2822_s17 }
 0x198   :  { %v1483_v21 = vld [vmem:[#allocation2 + $0x10] sm:$0xff]  ;;  %1325 = vrot.lane.b32.xlu1 %v1292_v46, %s2822_s17  ;;  %1127 = vmatmul.bf16.gmra.mxu1 %v867_v28  ;;  %1595 = vst.msk [vmem:[#allocation3 + $0x8] sm:$0xff] %vm39_vm0, %v1292_v46 }
 0x199   :  { %1276 = vst.msk [vmem:[#allocation3 + $0x18] sm:$0xff] %vm39_vm0, %v1483_v21 }
 0x19b   :  { %v639_v54 = vpop.permute.xlu0 %638 }
 0x19c   :  { %671 = vst.msk [vmem:[#allocation3 + $0x170] sm:$0xff] %vm333_vm4, %v639_v54  ;;  %v733_v43 = vpop.permute.xlu1 %732 }
 0x19d   :  { %767 = vst.msk [vmem:[#allocation3 + $0x170] sm:$0xff] %vm430_vm5, %v735_v52 }
 0x19e   :  { %766 = vst.msk [vmem:[#allocation3 + $0x158] sm:$0xff] %vm430_vm5, %v733_v43  ;;  %v1803_v35 = vld [vmem:[#allocation2 + $0x21] sm:$0xff] }
 0x19f   :  { %v1612_v31 = vld [vmem:[#allocation2 + $0x22] sm:$0xff]  ;;  %1421 = vrot.lane.b32.xlu2 %v1611_v38, %s2823_s18  ;;  %1596 = vst.msk [vmem:[#allocation3 + $0x20] sm:$0xff] %vm39_vm0, %v1803_v35 }
 0x1a0   :  { %v1707_v58 = vld [vmem:[#allocation2 + $0x20] sm:$0xff]  ;;  %1835 = vrot.lane.b32.xlu1 %v1803_v35, %s2824_s29  ;;  %1915 = vst.msk [vmem:[#allocation3 + $0x10] sm:$0xff] %vm39_vm0, %v1612_v31  ;;  %1645 = vrot.lane.b32.xlu0 %v1612_v31, %s2822_s17 }
 0x1a1   :  { %1277 = vst.msk [vmem:[#allocation3 + $0x30] sm:$0xff] %vm39_vm0, %v1707_v58 }
 0x1a3   :  { %v1054_v30 = vpop.f32.mrf.mxu0 }
 0x1a4   :  { %v1103_v56 = vpop.f32.mrf.mxu1  ;;  %v846_v41 = vld [vmem:[#allocation3 + $0x170] sm:$0xff] }
 0x1a5   :  { %v1104_v57 = vadd.f32 %v1103_v56, %v1054_v30  ;;  %v843_v59 = vld [vmem:[#allocation3 + $0x158] sm:$0xff] }
 0x1a6   :  { %v870_v61 = vpack.c.bf16 %v846_v41, %v843_v59 }
 0x1a7   :  { %v1153_v44 = vadd.f32 %v1152_v36, %v1104_v57  ;;  %1515 = vrot.lane.b32.xlu2 %v1483_v21, %s2824_s29  ;;  %v1933_v24 = vld [vmem:[#allocation3 + $0x10] sm:$0xff]  ;;  %v1157_v21 = vpop.f32.mrf.mxu2 }
 0x1a8   :  { %1423 = vrot.lane.b32.xlu1 %v1612_v31, %s2823_s18  ;;  %1132 = vmatmul.bf16.gmra.mxu1 %v870_v61 }
 0x1a9   :  { %1739 = vrot.lane.b32.xlu0 %v1707_v58, %s2823_s18  ;;  %v1193_v16 = vmul.f32 %v3517_v9, %v1153_v44 }
 0x1ab   :  { %v1213_v62 = vadd.f32 %v3523_v12, %v1193_v16  ;;  %v1056_v0 = vpop.f32.mrf.mxu0 }
 0x1ac   :  { %v1105_v47 = vpop.f32.mrf.mxu1 }
 0x1ad   :  { %v1229_v1 = vmax.f32 %v1213_v62, 0.0  ;;  %v1106_v2 = vadd.f32 %v1105_v47, %v1056_v0  ;;  %v1420_v62 = vpop.permute.xlu1 %1419 }
 0x1af   :  { %1245 = vst.msk [vmem:[#allocation2 + $0x31] sm:$0xff] %vm39_vm0, %v1229_v1  ;;  %v1155_v19 = vadd.f32 %v1154_v55, %v1106_v2  ;;  %v1159_v36 = vpop.f32.mrf.mxu2  ;;  %v1259_v2 = vld [vmem:[#allocation2] sm:$0xff] }
 0x1b0   :  { %1275 = vst.msk [vmem:[#allocation3] sm:$0xff] %vm39_vm0, %v1259_v2  ;;  %v2776_v2 = vld [vmem:[%s4288_s4 + $0x20] sm:$0xff] }
 0x1b1   :  { %1517 = vrot.lane.b32.xlu0 %v1707_v58, %s2824_s29  ;;  %v1194_v40 = vmul.f32 %v3517_v9, %v1155_v19 }
 0x1b3   :  { %v1214_v29 = vadd.f32 %v3523_v12, %v1194_v40 }
 0x1b5   :  { %v1230_v27 = vmax.f32 %v1214_v29, 0.0 }
 0x1b6   :  { %v1804_v39 = vld [vmem:[#allocation2 + $0x31] sm:$0xff] }
 0x1b7   :  { %v1708_v15 = vld [vmem:[#allocation2 + $0x30] sm:$0xff]  ;;  %1246 = vst.msk [vmem:[#allocation2 + $0x41] sm:$0xff] %vm39_vm0, %v1230_v27  ;;  %1837 = vrot.lane.b32.xlu2 %v1804_v39, %s2824_s29  ;;  %v1162_v55 = vpop.f32.mrf.mxu2 }
 0x1b8   :  { %v1613_v23 = vld [vmem:[#allocation2 + $0x32] sm:$0xff]  ;;  %1741 = vrot.lane.b32.xlu1 %v1708_v15, %s2823_s18  ;;  %1597 = vst.msk [vmem:[#allocation3 + $0x38] sm:$0xff] %vm39_vm0, %v1804_v39 }
 0x1b9   :  { %1327 = vrot.lane.b32.xlu0 %v1803_v35, %s2822_s17  ;;  %1916 = vst.msk [vmem:[#allocation3 + $0x28] sm:$0xff] %vm39_vm0, %v1613_v23 }
 0x1ba   :  { %1278 = vst.msk [vmem:[#allocation3 + $0x48] sm:$0xff] %vm39_vm0, %v1708_v15  ;;  %v1324_v29 = vpop.permute.xlu0 %1323 }
 0x1bb   :  { %1371 = vst.msk [vmem:[#allocation3] sm:$0xff] %vm236_vm3, %v1324_v29 }
 0x1bc   :  { %1467 = vst.msk [vmem:[#allocation3] sm:$0xff] %vm333_vm4, %v1420_v62 }
 0x1be   :  { %v1614_v8 = vld [vmem:[#allocation2 + $0x42] sm:$0xff] }
 0x1bf   :  { %v1805_v60 = vld [vmem:[#allocation2 + $0x41] sm:$0xff]  ;;  %1647 = vrot.lane.b32.xlu2 %v1613_v23, %s2822_s17  ;;  %1917 = vst.msk [vmem:[#allocation3 + $0x40] sm:$0xff] %vm39_vm0, %v1614_v8 }
 0x1c0   :  { %v1709_v45 = vld [vmem:[#allocation2 + $0x40] sm:$0xff]  ;;  %1329 = vrot.lane.b32.xlu1 %v1804_v39, %s2822_s17  ;;  %v1936_v28 = vld [vmem:[#allocation3 + $0x28] sm:$0xff]  ;;  %1598 = vst.msk [vmem:[#allocation3 + $0x50] sm:$0xff] %vm39_vm0, %v1805_v60  ;;  %v3603_v39 = vpop.permute.xlu1 %1753 }
 0x1c1   :  { %1649 = vrot.lane.b32.xlu0 %v1614_v8, %s2822_s17  ;;  %v1981_v38 = vpack.c.bf16 %v1936_v28, %v1933_v24  ;;  %1279 = vst.msk [vmem:[#allocation3 + $0x60] sm:$0xff] %vm39_vm0, %v1709_v45  ;;  %v1267_v28 = vld [vmem:[#allocation2 + $0xa0] sm:$0xff] }
 0x1c2   :  { %1283 = vst.msk [vmem:[#allocation3 + $0xc0] sm:$0xff] %vm39_vm0, %v1267_v28 }
 0x1c3   :  { %2741 = vmatmul.msk.bf16.vlgmr.msrb.gmra.mxu0 %vm39_vm0, %v1981_v38  ;;  %v1059_v46 = vpop.f32.mrf.mxu0  ;;  %v1164_v38 = vpop.f32.mrf.mxu2 }
 0x1c4   :  { %v1108_v48 = vpop.f32.mrf.mxu1 }
 0x1c5   :  { %v1109_v52 = vadd.f32 %v1108_v48, %v1059_v46 }
 0x1c6   :  { %v1939_v47 = vld [vmem:[#allocation3 + $0x40] sm:$0xff] }
 0x1c7   :  { %v1158_v53 = vadd.f32 %v1157_v21, %v1109_v52  ;;  %1425 = vrot.lane.b32.xlu2 %v1613_v23, %s2823_s18  ;;  %v1340_v46 = vpop.permute.xlu0 %1339 }
 0x1c8   :  { %1839 = vrot.lane.b32.xlu1 %v1805_v60, %s2824_s29  ;;  %v1436_v52 = vpop.permute.xlu1 %1435  ;;  %1379 = vst.msk [vmem:[#allocation3 + $0xc0] sm:$0xff] %vm236_vm3, %v1340_v46 }
 0x1c9   :  { %1743 = vrot.lane.b32.xlu0 %v1709_v45, %s2823_s18  ;;  %v1195_v54 = vmul.f32 %v3517_v9, %v1158_v53  ;;  %1475 = vst.msk [vmem:[#allocation3 + $0xc0] sm:$0xff] %vm333_vm4, %v1436_v52 }
 0x1cb   :  { %v1215_v43 = vadd.f32 %v3523_v12, %v1195_v54  ;;  %v1061_v35 = vpop.f32.mrf.mxu0 }
 0x1cc   :  { %v1110_v31 = vpop.f32.mrf.mxu1 }
 0x1cd   :  { %v1231_v58 = vmax.f32 %v1215_v43, 0.0  ;;  %v1111_v30 = vadd.f32 %v1110_v31, %v1061_v35  ;;  %v2779_v35 = vld [vmem:[%s4288_s4 + $0x38] sm:$0xff] }
 0x1ce   :  { %2171 = vmatpush.bf16.msrb.mxu3 %v2779_v35 }
 0x1cf   :  { %1247 = vst.msk [vmem:[#allocation2 + $0x51] sm:$0xff] %vm39_vm0, %v1231_v58  ;;  %v1160_v56 = vadd.f32 %v1159_v36, %v1111_v30  ;;  %1519 = vrot.lane.b32.xlu2 %v1708_v15, %s2824_s29  ;;  %v2778_v36 = vld [vmem:[%s4288_s4 + $0x30] sm:$0xff] }
 0x1d0   :  { %1427 = vrot.lane.b32.xlu1 %v1614_v8, %s2823_s18 }
 0x1d1   :  { %1521 = vrot.lane.b32.xlu0 %v1709_v45, %s2824_s29  ;;  %v1196_v41 = vmul.f32 %v3517_v9, %v1160_v56  ;;  %v3612_v45 = vpop.permute.xlu2 %1849 }
 0x1d2   :  { %2172 = vmatpush.bf16.msrb.mxu3 %v2778_v36 }
 0x1d3   :  { %v1216_v57 = vadd.f32 %v3523_v12, %v1196_v41  ;;  %v1167_v41 = vpop.f32.mrf.mxu2 }
 0x1d5   :  { %v1232_v59 = vmax.f32 %v1216_v57, 0.0 }
 0x1d6   :  { %v1806_v61 = vld [vmem:[#allocation2 + $0x51] sm:$0xff] }
 0x1d7   :  { %v1710_v44 = vld [vmem:[#allocation2 + $0x50] sm:$0xff]  ;;  %1248 = vst.msk [vmem:[#allocation2 + $0x61] sm:$0xff] %vm39_vm0, %v1232_v59  ;;  %1841 = vrot.lane.b32.xlu2 %v1806_v61, %s2824_s29 }
 0x1d8   :  { %v1615_v16 = vld [vmem:[#allocation2 + $0x52] sm:$0xff]  ;;  %1745 = vrot.lane.b32.xlu1 %v1710_v44, %s2823_s18  ;;  %1599 = vst.msk [vmem:[#allocation3 + $0x68] sm:$0xff] %vm39_vm0, %v1806_v61 }
 0x1d9   :  { %1331 = vrot.lane.b32.xlu0 %v1805_v60, %s2822_s17  ;;  %1918 = vst.msk [vmem:[#allocation3 + $0x58] sm:$0xff] %vm39_vm0, %v1615_v16 }
 0x1da   :  { %1280 = vst.msk [vmem:[#allocation3 + $0x78] sm:$0xff] %vm39_vm0, %v1710_v44 }
 0x1de   :  { %v1616_v0 = vld [vmem:[#allocation2 + $0x62] sm:$0xff] }
 0x1df   :  { %1651 = vrot.lane.b32.xlu2 %v1615_v16, %s2822_s17  ;;  %1919 = vst.msk [vmem:[#allocation3 + $0x70] sm:$0xff] %vm39_vm0, %v1616_v0  ;;  %v1807_v40 = vld [vmem:[#allocation2 + $0x61] sm:$0xff] }
 0x1e0   :  { %1333 = vrot.lane.b32.xlu1 %v1806_v61, %s2822_s17  ;;  %v1942_v1 = vld [vmem:[#allocation3 + $0x58] sm:$0xff]  ;;  %v1711_v27 = vld [vmem:[#allocation2 + $0x60] sm:$0xff]  ;;  %1600 = vst.msk [vmem:[#allocation3 + $0x80] sm:$0xff] %vm39_vm0, %v1807_v40  ;;  %v2777_v61 = vld [vmem:[%s4288_s4 + $0x28] sm:$0xff] }
 0x1e1   :  { %1653 = vrot.lane.b32.xlu0 %v1616_v0, %s2822_s17  ;;  %v1984_v19 = vpack.c.bf16 %v1942_v1, %v1939_v47  ;;  %1281 = vst.msk [vmem:[#allocation3 + $0x90] sm:$0xff] %vm39_vm0, %v1711_v27  ;;  %v2787_v47 = vld [vmem:[%s4288_s4 + $0x78] sm:$0xff]  ;;  %2173 = vmatpush.bf16.msrb.mxu3 %v2777_v61 }
 0x1e2   :  { %2220 = vmatpush.bf16.msrb.mxu2 %v2787_v47  ;;  %v2782_v47 = vld [vmem:[%s4288_s4 + $0x50] sm:$0xff] }
 0x1e3   :  { %2742 = vmatmul.msk.bf16.gmra.mxu0 %vm39_vm0, %v1984_v19  ;;  %v1064_v15 = vpop.f32.mrf.mxu0  ;;  %v2786_v19 = vld [vmem:[%s4288_s4 + $0x70] sm:$0xff] }
 0x1e4   :  { %v1113_v23 = vpop.f32.mrf.mxu1 }
 0x1e5   :  { %v1114_v8 = vadd.f32 %v1113_v23, %v1064_v15  ;;  %2174 = vmatpush.bf16.msrb.mxu3 %v2776_v2  ;;  %v1169_v15 = vpop.f32.mrf.mxu2  ;;  %v2775_v23 = vld [vmem:[%s4288_s4 + $0x18] sm:$0xff] }
 0x1e6   :  { %2221 = vmatpush.bf16.msrb.mxu2 %v2786_v19  ;;  %v1954_v19 = vld [vmem:[#allocation3 + $0xb8] sm:$0xff] }
 0x1e7   :  { %v1163_v60 = vadd.f32 %v1162_v55, %v1114_v8  ;;  %1429 = vrot.lane.b32.xlu2 %v1615_v16, %s2823_s18 }
 0x1e8   :  { %1843 = vrot.lane.b32.xlu1 %v1807_v40, %s2824_s29 }
 0x1e9   :  { %1747 = vrot.lane.b32.xlu0 %v1711_v27, %s2823_s18  ;;  %v1197_v24 = vmul.f32 %v3517_v9, %v1163_v60  ;;  %2175 = vmatpush.bf16.msrb.mxu3 %v2775_v23 }
 0x1eb   :  { %v1217_v21 = vadd.f32 %v3523_v12, %v1197_v24  ;;  %v1066_v48 = vpop.f32.mrf.mxu0 }
 0x1ec   :  { %v1115_v53 = vpop.f32.mrf.mxu1 }
 0x1ed   :  { %v1233_v54 = vmax.f32 %v1217_v21, 0.0  ;;  %v1116_v43 = vadd.f32 %v1115_v53, %v1066_v48  ;;  %v2785_v21 = vld [vmem:[%s4288_s4 + $0x68] sm:$0xff]  ;;  %v2774_v53 = vld [vmem:[%s4288_s4 + $0x10] sm:$0xff] }
 0x1ee   :  { %2222 = vmatpush.bf16.msrb.mxu2 %v2785_v21  ;;  %2176 = vmatpush.bf16.msrb.mxu3 %v2774_v53 }
 0x1ef   :  { %1249 = vst.msk [vmem:[#allocation2 + $0x71] sm:$0xff] %vm39_vm0, %v1233_v54  ;;  %v1165_v31 = vadd.f32 %v1164_v38, %v1116_v43  ;;  %1523 = vrot.lane.b32.xlu2 %v1710_v44, %s2824_s29  ;;  %v1945_v38 = vld [vmem:[#allocation3 + $0x70] sm:$0xff]  ;;  %v2784_v43 = vld [vmem:[%s4288_s4 + $0x60] sm:$0xff] }
 0x1f0   :  { %1431 = vrot.lane.b32.xlu1 %v1616_v0, %s2823_s18 }
 0x1f1   :  { %1525 = vrot.lane.b32.xlu0 %v1711_v27, %s2824_s29  ;;  %v1198_v58 = vmul.f32 %v3517_v9, %v1165_v31  ;;  %v1644_v30 = vpop.permute.xlu2 %1643 }
 0x1f2   :  { %1691 = vst.msk [vmem:[#allocation3 + $0x8] sm:$0xff] %vm236_vm3, %v1644_v30  ;;  %2223 = vmatpush.bf16.msrb.mxu2 %v2784_v43  ;;  %v2773_v30 = vld [vmem:[%s4288_s4 + $0x8] sm:$0xff] }
 0x1f3   :  { %v1218_v56 = vadd.f32 %v3523_v12, %v1198_v58  ;;  %2177 = vmatpush.bf16.msrb.mxu3 %v2773_v30 }
 0x1f5   :  { %v1234_v57 = vmax.f32 %v1218_v56, 0.0  ;;  %v1118_v59 = vpop.f32.mrf.mxu1 }
 0x1f6   :  { %v1119_v44 = vadd.f32 %v1118_v59, %v3441_v20  ;;  %v1808_v16 = vld [vmem:[#allocation2 + $0x71] sm:$0xff] }
 0x1f7   :  { %v3637_v62 = vld [vmem:[#allocation2 + $0x70] sm:$0xff]  ;;  %1250 = vst.msk [vmem:[#allocation2 + $0x81] sm:$0xff] %vm39_vm0, %v1234_v57  ;;  %1845 = vrot.lane.b32.xlu2 %v1808_v16, %s2824_s29 }
 0x1f8   :  { %v1617_v0 = vld [vmem:[#allocation2 + $0x72] sm:$0xff]  ;;  %1749 = vrot.lane.b32.xlu1 %v3637_v62, %s2823_s18  ;;  %v1168_v1 = vadd.f32 %v1167_v41, %v1119_v44  ;;  %1601 = vst.msk [vmem:[#allocation3 + $0x98] sm:$0xff] %vm39_vm0, %v1808_v16 }
 0x1f9   :  { %1335 = vrot.lane.b32.xlu0 %v1807_v40, %s2822_s17  ;;  %1920 = vst.msk [vmem:[#allocation3 + $0x88] sm:$0xff] %vm39_vm0, %v1617_v0  ;;  %v1422_v20 = vpop.permute.xlu2 %1421  ;;  %v1172_v40 = vpop.f32.mrf.mxu3  ;;  %v2783_v41 = vld [vmem:[%s4288_s4 + $0x58] sm:$0xff] }
 0x1fa   :  { %v1199_v55 = vmul.f32 %v3517_v9, %v1168_v1  ;;  %1282 = vst.msk [vmem:[#allocation3 + $0xa8] sm:$0xff] %vm39_vm0, %v3637_v62  ;;  %2224 = vmatpush.bf16.msrb.mxu2 %v2783_v41 }
 0x1fc   :  { %v1219_v29 = vadd.f32 %v3523_v12, %v1199_v55 }
 0x1fd   :  { %v1120_v27 = vpop.f32.mrf.mxu1 }
 0x1fe   :  { %v1235_v8 = vmax.f32 %v1219_v29, 0.0  ;;  %v1121_v60 = vadd.f32 %v1120_v27, %v3452_v51  ;;  %v1618_v24 = vld [vmem:[#allocation2 + $0x82] sm:$0xff]  ;;  %2225 = vmatpush.bf16.msrb.mxu2 %v2782_v47 }
 0x1ff   :  { %v1809_v28 = vld [vmem:[#allocation2 + $0x81] sm:$0xff]  ;;  %1655 = vrot.lane.b32.xlu2 %v1617_v0, %s2822_s17  ;;  %1921 = vst.msk [vmem:[#allocation3 + $0xa0] sm:$0xff] %vm39_vm0, %v1618_v24 }
 0x200   :  { %1337 = vrot.lane.b32.xlu1 %v1808_v16, %s2822_s17  ;;  %v1948_v46 = vld [vmem:[#allocation3 + $0x88] sm:$0xff]  ;;  %1251 = vst.msk [vmem:[#allocation2 + $0xb1] sm:$0xff] %vm39_vm0, %v1235_v8  ;;  %v1170_v48 = vadd.f32 %v1169_v15, %v1121_v60  ;;  %v1713_v57 = vld [vmem:[#allocation2 + $0x80] sm:$0xff] }
 0x201   :  { %1657 = vrot.lane.b32.xlu0 %v1618_v24, %s2822_s17  ;;  %v1987_v51 = vpack.c.bf16 %v1948_v46, %v1945_v38  ;;  %v1516_v52 = vpop.permute.xlu2 %1515  ;;  %1602 = vst.msk [vmem:[#allocation3 + $0xb0] sm:$0xff] %vm39_vm0, %v1809_v28  ;;  %v1174_v58 = vpop.f32.mrf.mxu3  ;;  %v2781_v27 = vld [vmem:[%s4288_s4 + $0x48] sm:$0xff]  ;;  %v2780_v38 = vld [vmem:[%s4288_s4 + $0x40] sm:$0xff] }
 0x202   :  { %v1200_v54 = vmul.f32 %v3517_v9, %v1170_v48  ;;  %1563 = vst.msk [vmem:[#allocation3] sm:$0xff] %vm430_vm5, %v1516_v52  ;;  %2226 = vmatpush.bf16.msrb.mxu2 %v2781_v27 }
 0x203   :  { %2743 = vmatmul.msk.bf16.gmra.mxu0 %vm39_vm0, %v1987_v51 }
 0x204   :  { %v1220_v35 = vadd.f32 %v3523_v12, %v1200_v54 }
 0x205   :  { %v1123_v31 = vpop.f32.mrf.mxu1 }
 0x206   :  { %v1236_v36 = vmax.f32 %v1220_v35, 0.0  ;;  %v1124_v56 = vadd.f32 %v1123_v31, %v3458_v18  ;;  %v2772_v18 = vld [vmem:[%s4288_s4] sm:$0xff]  ;;  %2227 = vmatpush.bf16.msrb.mxu2 %v2780_v38 }
 0x207   :  { %1433 = vrot.lane.b32.xlu2 %v1617_v0, %s2823_s18  ;;  %v1300_v59 = vld [vmem:[#allocation2 + $0xb1] sm:$0xff]  ;;  %2178 = vmatpush.bf16.msrb.mxu3 %v2772_v18  ;;  %v1951_v55 = vld [vmem:[#allocation3 + $0xa0] sm:$0xff] }
 0x208   :  { %1847 = vrot.lane.b32.xlu1 %v1809_v28, %s2824_s29  ;;  %1252 = vst.msk [vmem:[#allocation2 + $0xc1] sm:$0xff] %vm39_vm0, %v1236_v36  ;;  %v1173_v61 = vadd.f32 %v1172_v40, %v1124_v56  ;;  %v3693_v16 = vld [vmem:[#allocation2 + $0xb0] sm:$0xff]  ;;  %v1990_v60 = vpack.c.bf16 %v1954_v19, %v1951_v55 }
 0x209   :  { %1751 = vrot.lane.b32.xlu0 %v1713_v57, %s2823_s18  ;;  %1603 = vst.msk [vmem:[#allocation3 + $0xc8] sm:$0xff] %vm39_vm0, %v1300_v59  ;;  %v1619_v52 = vld [vmem:[#allocation2 + $0xb2] sm:$0xff] }
 0x20a   :  { %v1326_v44 = vpop.permute.xlu1 %1325  ;;  %v1201_v0 = vmul.f32 %v3517_v9, %v1173_v61  ;;  %1284 = vst.msk [vmem:[#allocation3 + $0xd8] sm:$0xff] %vm39_vm0, %v3693_v16 }
 0x20b   :  { %1372 = vst.msk [vmem:[#allocation3 + $0x18] sm:$0xff] %vm236_vm3, %v1326_v44 }
 0x20c   :  { %1468 = vst.msk [vmem:[#allocation3 + $0x18] sm:$0xff] %vm333_vm4, %v1422_v20  ;;  %v1221_v1 = vadd.f32 %v3523_v12, %v1201_v0  ;;  %v1177_v20 = vpop.f32.mrf.mxu3 }
 0x20d   :  { %v1125_v2 = vpop.f32.mrf.mxu1 }
 0x20e   :  { %v1237_v40 = vmax.f32 %v1221_v1, 0.0  ;;  %v1126_v29 = vadd.f32 %v1125_v2, %v3466_v34 }
 0x20f   :  { %1527 = vrot.lane.b32.xlu2 %v3637_v62, %s2824_s29  ;;  %v3715_v15 = vld [vmem:[#allocation2 + $0xc1] sm:$0xff] }
 0x210   :  { %1341 = vrot.lane.b32.xlu1 %v1300_v59, %s2822_s17  ;;  %v1620_v23 = vld [vmem:[#allocation2 + $0xc2] sm:$0xff]  ;;  %1253 = vst.msk [vmem:[#allocation2 + $0xd1] sm:$0xff] %vm39_vm0, %v1237_v40  ;;  %v1175_v8 = vadd.f32 %v1174_v58, %v1126_v29 }
 0x211   :  { %1529 = vrot.lane.b32.xlu0 %v1713_v57, %s2824_s29  ;;  %v3719_v34 = vpop.permute.xlu2 %1837  ;;  %v3721_v24 = vld [vmem:[#allocation2 + $0xc0] sm:$0xff]  ;;  %1923 = vst.msk [vmem:[#allocation3 + $0xd0] sm:$0xff] %vm39_vm0, %v1620_v23 }
 0x212   :  { %v1202_v62 = vmul.f32 %v3517_v9, %v1175_v8  ;;  %v1646_v28 = vpop.permute.xlu0 %1645  ;;  %1604 = vst.msk [vmem:[#allocation3 + $0xe0] sm:$0xff] %vm39_vm0, %v3715_v15  ;;  %v1836_v53 = vpop.permute.xlu1 %1835 }
 0x213   :  { %2744 = vmatmul.msk.bf16.gmra.mxu0 %vm39_vm0, %v1990_v60  ;;  %1692 = vst.msk [vmem:[#allocation3 + $0x20] sm:$0xff] %vm236_vm3, %v1646_v28 }
 0x214   :  { %v1222_v46 = vadd.f32 %v3523_v12, %v1202_v62  ;;  %1285 = vst.msk [vmem:[#allocation3 + $0xf0] sm:$0xff] %vm39_vm0, %v3721_v24  ;;  %v1179_v31 = vpop.f32.mrf.mxu3 }
 0x215   :  { %v1128_v21 = vpop.f32.mrf.mxu1 }
 0x216   :  { %v1238_v48 = vmax.f32 %v1222_v46, 0.0  ;;  %v1129_v51 = vadd.f32 %v1128_v21, %v3477_v37 }
 0x217   :  { %1659 = vrot.lane.b32.xlu2 %v1619_v52, %s2822_s17  ;;  %v3739_v54 = vld [vmem:[#allocation2 + $0xd2] sm:$0xff] }
 0x218   :  { %1851 = vrot.lane.b32.xlu1 %v3715_v15, %s2824_s29  ;;  %1254 = vst.msk [vmem:[#allocation2 + $0xe1] sm:$0xff] %vm39_vm0, %v1238_v48  ;;  %v1178_v43 = vadd.f32 %v1177_v20, %v1129_v51  ;;  %v1812_v30 = vld [vmem:[#allocation2 + $0xd1] sm:$0xff] }
 0x219   :  { %1661 = vrot.lane.b32.xlu0 %v1620_v23, %s2822_s17  ;;  %v1648_v35 = vpop.permute.xlu2 %1647  ;;  %1924 = vst.msk [vmem:[#allocation3 + $0xe8] sm:$0xff] %vm39_vm0, %v3739_v54  ;;  %v3748_v36 = vld [vmem:[#allocation2 + $0xd0] sm:$0xff] }
 0x21a   :  { %v1203_v37 = vmul.f32 %v3517_v9, %v1178_v43  ;;  %1693 = vst.msk [vmem:[#allocation3 + $0x38] sm:$0xff] %vm236_vm3, %v1648_v35  ;;  %v1957_v0 = vld [vmem:[#allocation3 + $0xd0] sm:$0xff] }
 0x21b   :  { %v1740_v58 = vpop.permute.xlu0 %1739  ;;  %1605 = vst.msk [vmem:[#allocation3 + $0xf8] sm:$0xff] %vm39_vm0, %v1812_v30 }
 0x21c   :  { %1787 = vst.msk [vmem:[#allocation3 + $0x8] sm:$0xff] %vm333_vm4, %v1740_v58  ;;  %v1223_v56 = vadd.f32 %v3523_v12, %v1203_v37  ;;  %v1182_v29 = vpop.f32.mrf.mxu3 }
 0x21d   :  { %1883 = vst.msk [vmem:[#allocation3 + $0x8] sm:$0xff] %vm430_vm5, %v1836_v53  ;;  %v1130_v41 = vpop.f32.mrf.mxu1 }
 0x21e   :  { %v1239_v57 = vmax.f32 %v1223_v56, 0.0  ;;  %v1131_v59 = vadd.f32 %v1130_v41, %v3487_v11  ;;  %1286 = vst.msk [vmem:[#allocation3 + $0x108] sm:$0xff] %vm39_vm0, %v3748_v36  ;;  %v1424_v11 = vpop.permute.xlu1 %1423 }
 0x21f   :  { %1437 = vrot.lane.b32.xlu2 %v1619_v52, %s2823_s18  ;;  %v3758_v61 = vld [vmem:[#allocation2 + $0xe2] sm:$0xff] }
 0x220   :  { %1439 = vrot.lane.b32.xlu1 %v1620_v23, %s2823_s18  ;;  %v3760_v44 = vld [vmem:[#allocation2 + $0xe1] sm:$0xff]  ;;  %1255 = vst.msk [vmem:[#allocation2 + $0xf1] sm:$0xff] %vm39_vm0, %v1239_v57  ;;  %v1180_v18 = vadd.f32 %v1179_v31, %v1131_v59 }
 0x221   :  { %1755 = vrot.lane.b32.xlu0 %v3721_v24, %s2823_s18  ;;  %v1960_v47 = vld [vmem:[#allocation3 + $0xe8] sm:$0xff]  ;;  %v1426_v1 = vpop.permute.xlu2 %1425  ;;  %1925 = vst.msk [vmem:[#allocation3 + $0x100] sm:$0xff] %vm39_vm0, %v3758_v61  ;;  %v3767_v55 = vld [vmem:[#allocation2 + $0xe0] sm:$0xff] }
 0x222   :  { %v1993_v2 = vpack.c.bf16 %v1960_v47, %v1957_v0  ;;  %v1204_v19 = vmul.f32 %v3517_v9, %v1180_v18  ;;  %1606 = vst.msk [vmem:[#allocation3 + $0x110] sm:$0xff] %vm39_vm0, %v3760_v44 }
 0x223   :  { %v1518_v40 = vpop.permute.xlu0 %1517  ;;  %1287 = vst.msk [vmem:[#allocation3 + $0x120] sm:$0xff] %vm39_vm0, %v3767_v55 }
 0x224   :  { %1564 = vst.msk [vmem:[#allocation3 + $0x18] sm:$0xff] %vm430_vm5, %v1518_v40  ;;  %2745 = vmatmul.msk.bf16.gmra.mxu0 %vm39_vm0, %v1993_v2  ;;  %v1224_v27 = vadd.f32 %v3523_v12, %v1204_v19  ;;  %v1184_v53 = vpop.f32.mrf.mxu3  ;;  %v1932_v0 = vld [vmem:[#allocation3 + $0x8] sm:$0xff] }
 0x225   :  { %v1133_v20 = vpop.f32.mrf.mxu1 }
 0x226   :  { %v1240_v23 = vmax.f32 %v1224_v27, 0.0  ;;  %v1134_v8 = vadd.f32 %v1133_v20, %v3497_v17 }
 0x227   :  { %1531 = vrot.lane.b32.xlu2 %v3693_v16, %s2824_s29  ;;  %v3782_v60 = vld [vmem:[#allocation2 + $0xf2] sm:$0xff]  ;;  %v1931_v16 = vld [vmem:[#allocation3] sm:$0xff] }
 0x228   :  { %1757 = vrot.lane.b32.xlu1 %v3748_v36, %s2823_s18  ;;  %1256 = vst.msk [vmem:[#allocation2 + $0x101] sm:$0xff] %vm39_vm0, %v1240_v23  ;;  %v1183_v62 = vadd.f32 %v1182_v29, %v1134_v8  ;;  %v1963_v37 = vld [vmem:[#allocation3 + $0x100] sm:$0xff]  ;;  %v3815_v59 = vld [vmem:[#allocation2 + $0xf0] sm:$0xff] }
 0x229   :  { %1533 = vrot.lane.b32.xlu0 %v3721_v24, %s2824_s29  ;;  %v1520_v38 = vpop.permute.xlu2 %1519  ;;  %1926 = vst.msk [vmem:[#allocation3 + $0x118] sm:$0xff] %vm39_vm0, %v3782_v60  ;;  %v3794_v24 = vld [vmem:[#allocation2 + $0xf1] sm:$0xff] }
 0x22a   :  { %v1742_v28 = vpop.permute.xlu1 %1741  ;;  %v1205_v17 = vmul.f32 %v3517_v9, %v1183_v62  ;;  %1607 = vst.msk [vmem:[#allocation3 + $0x128] sm:$0xff] %vm39_vm0, %v3794_v24 }
 0x22b   :  { %v1328_v46 = vpop.permute.xlu0 %1327  ;;  %1788 = vst.msk [vmem:[#allocation3 + $0x20] sm:$0xff] %vm333_vm4, %v1742_v28  ;;  %v1934_v21 = vld [vmem:[#allocation3 + $0x18] sm:$0xff] }
 0x22c   :  { %1373 = vst.msk [vmem:[#allocation3 + $0x30] sm:$0xff] %vm236_vm3, %v1328_v46  ;;  %v1979_v48 = vpack.c.bf16 %v1934_v21, %v1931_v16  ;;  %v1225_v51 = vadd.f32 %v3523_v12, %v1205_v17 }
 0x22d   :  { %1469 = vst.msk [vmem:[#allocation3 + $0x30] sm:$0xff] %vm333_vm4, %v1424_v11  ;;  %v1135_v52 = vpop.f32.mrf.mxu1 }
 0x22e   :  { %1884 = vst.msk [vmem:[#allocation3 + $0x20] sm:$0xff] %vm430_vm5, %v3719_v34  ;;  %2179 = vmatmul.bf16.vlgmr.msrb.gmra.mxu3 %v1979_v48  ;;  %v1241_v43 = vmax.f32 %v1225_v51, 0.0  ;;  %v1136_v35 = vadd.f32 %v1135_v52, %v3506_v26 }
 0x22f   :  { %1565 = vst.msk [vmem:[#allocation3 + $0x30] sm:$0xff] %vm430_vm5, %v1520_v38  ;;  %1853 = vrot.lane.b32.xlu2 %v1812_v30, %s2824_s29  ;;  %v3802_v31 = vld [vmem:[#allocation2 + $0x102] sm:$0xff] }
 0x230   :  { %1345 = vrot.lane.b32.xlu1 %v1812_v30, %s2822_s17  ;;  %1257 = vst.msk [vmem:[#allocation2 + $0x111] sm:$0xff] %vm39_vm0, %v1241_v43  ;;  %v1185_v34 = vadd.f32 %v1184_v53, %v1136_v35  ;;  %v1966_v58 = vld [vmem:[#allocation3 + $0x118] sm:$0xff]  ;;  %v3823_v11 = vld [vmem:[#allocation2 + $0x100] sm:$0xff] }
 0x231   :  { %1343 = vrot.lane.b32.xlu0 %v3715_v15, %s2822_s17  ;;  %v3809_v41 = vpop.permute.xlu2 %1841  ;;  %v1996_v26 = vpack.c.bf16 %v1966_v58, %v1963_v37  ;;  %1927 = vst.msk [vmem:[#allocation3 + $0x130] sm:$0xff] %vm39_vm0, %v3802_v31  ;;  %v3819_v15 = vld [vmem:[#allocation2 + $0x101] sm:$0xff] }
 0x232   :  { %v1330_v56 = vpop.permute.xlu1 %1329  ;;  %v1206_v30 = vmul.f32 %v3517_v9, %v1185_v34  ;;  %1288 = vst.msk [vmem:[#allocation3 + $0x138] sm:$0xff] %vm39_vm0, %v3815_v59 }
 0x233   :  { %1374 = vst.msk [vmem:[#allocation3 + $0x48] sm:$0xff] %vm236_vm3, %v1330_v56  ;;  %v1650_v57 = vpop.permute.xlu0 %1649 }
 0x234   :  { %1470 = vst.msk [vmem:[#allocation3 + $0x48] sm:$0xff] %vm333_vm4, %v1426_v1  ;;  %2746 = vmatmul.msk.bf16.gmra.mxu0 %vm39_vm0, %v1996_v26  ;;  %v1226_v18 = vadd.f32 %v3523_v12, %v1206_v30 }
 0x235   :  { %1694 = vst.msk [vmem:[#allocation3 + $0x50] sm:$0xff] %vm236_vm3, %v1650_v57  ;;  %v1935_v47 = vld [vmem:[#allocation3 + $0x20] sm:$0xff] }
 0x236   :  { %v1980_v9 = vpack.c.bf16 %v1935_v47, %v1932_v0  ;;  %v1242_v2 = vmax.f32 %v1226_v18, 0.0  ;;  %1608 = vst.msk [vmem:[#allocation3 + $0x140] sm:$0xff] %vm39_vm0, %v3819_v15  ;;  %v1937_v48 = vld [vmem:[#allocation3 + $0x30] sm:$0xff] }
 0x237   :  { %1663 = vrot.lane.b32.xlu2 %v3739_v54, %s2822_s17  ;;  %v3831_v1 = vld [vmem:[#allocation2 + $0x112] sm:$0xff]  ;;  %1289 = vst.msk [vmem:[#allocation3 + $0x150] sm:$0xff] %vm39_vm0, %v3823_v11 }
 0x238   :  { %2228 = vmatmul.bf16.vlgmr.msrb.gmra.mxu2 %v1980_v9  ;;  %1258 = vst.msk [vmem:[#allocation2 + $0x121] sm:$0xff] %vm39_vm0, %v1242_v2  ;;  %1855 = vrot.lane.b32.xlu1 %v3760_v44, %s2824_s29  ;;  %v3843_v29 = vld [vmem:[#allocation2 + $0x111] sm:$0xff] }
 0x239   :  { %1665 = vrot.lane.b32.xlu0 %v3758_v61, %s2822_s17  ;;  %v1652_v19 = vpop.permute.xlu2 %1651  ;;  %1928 = vst.msk [vmem:[#allocation3 + $0x148] sm:$0xff] %vm39_vm0, %v3831_v1  ;;  %v3846_v27 = vld [vmem:[#allocation2 + $0x110] sm:$0xff] }
 0x23a   :  { %v1840_v12 = vpop.permute.xlu1 %1839  ;;  %1695 = vst.msk [vmem:[#allocation3 + $0x68] sm:$0xff] %vm236_vm3, %v1652_v19  ;;  %v1969_v8 = vld [vmem:[#allocation3 + $0x130] sm:$0xff] }
 0x23b   :  { %v1744_v40 = vpop.permute.xlu0 %1743  ;;  %1609 = vst.msk [vmem:[#allocation3 + $0x158] sm:$0xff] %vm39_vm0, %v3843_v29 }
 0x23c   :  { %1789 = vst.msk [vmem:[#allocation3 + $0x38] sm:$0xff] %vm333_vm4, %v1744_v40 }
 0x23d   :  { %1885 = vst.msk [vmem:[#allocation3 + $0x38] sm:$0xff] %vm430_vm5, %v1840_v12 }
 0x23e   :  { %1290 = vst.msk [vmem:[#allocation3 + $0x168] sm:$0xff] %vm39_vm0, %v3846_v27 }
 0x23f   :  { %1441 = vrot.lane.b32.xlu2 %v3739_v54, %s2823_s18  ;;  %v3855_v20 = vld [vmem:[#allocation2 + $0x122] sm:$0xff] }
 0x240   :  { %v3857_v23 = vld [vmem:[#allocation2 + $0x121] sm:$0xff]  ;;  %1761 = vrot.lane.b32.xlu1 %v3815_v59, %s2823_s18  ;;  %1929 = vst.msk [vmem:[#allocation3 + $0x160] sm:$0xff] %vm39_vm0, %v3855_v20 }
 0x241   :  { %1759 = vrot.lane.b32.xlu0 %v3767_v55, %s2823_s18  ;;  %v1972_v62 = vld [vmem:[#allocation3 + $0x148] sm:$0xff]  ;;  %v1430_v38 = vpop.permute.xlu2 %1429  ;;  %1610 = vst.msk [vmem:[#allocation3 + $0x170] sm:$0xff] %vm39_vm0, %v3857_v23 }
 0x242   :  { %v1428_v28 = vpop.permute.xlu1 %1427  ;;  %v1999_v17 = vpack.c.bf16 %v1972_v62, %v1969_v8 }
 0x243   :  { %v1522_v54 = vpop.permute.xlu0 %1521 }
 0x244   :  { %1566 = vst.msk [vmem:[#allocation3 + $0x48] sm:$0xff] %vm430_vm5, %v1522_v54  ;;  %2747 = vmatmul.msk.bf16.gmra.mxu0 %vm39_vm0, %v1999_v17  ;;  %v1938_v37 = vld [vmem:[#allocation3 + $0x38] sm:$0xff] }
 0x247   :  { %1535 = vrot.lane.b32.xlu2 %v3748_v36, %s2824_s29  ;;  %v1975_v36 = vld [vmem:[#allocation3 + $0x160] sm:$0xff] }
 0x248   :  { %1349 = vrot.lane.b32.xlu1 %v3794_v24, %s2822_s17 }
 0x249   :  { %1537 = vrot.lane.b32.xlu0 %v3767_v55, %s2824_s29  ;;  %v1524_v16 = vpop.permute.xlu2 %1523  ;;  %v1978_v55 = vld [vmem:[#allocation3 + $0x178] sm:$0xff] }
 0x24a   :  { %v1746_v46 = vpop.permute.xlu1 %1745  ;;  %v2002_v35 = vpack.c.bf16 %v1978_v55, %v1975_v36 }
 0x24b   :  { %v1332_v21 = vpop.permute.xlu0 %1331  ;;  %1790 = vst.msk [vmem:[#allocation3 + $0x50] sm:$0xff] %vm333_vm4, %v1746_v46  ;;  %v1940_v51 = vld [vmem:[#allocation3 + $0x48] sm:$0xff] }
 0x24c   :  { %1375 = vst.msk [vmem:[#allocation3 + $0x60] sm:$0xff] %vm236_vm3, %v1332_v21  ;;  %v1982_v52 = vpack.c.bf16 %v1940_v51, %v1937_v48  ;;  %v1818_v21 = vld [vmem:[#allocation2 + $0x131] sm:$0xff] }
 0x24d   :  { %1471 = vst.msk [vmem:[#allocation3 + $0x60] sm:$0xff] %vm333_vm4, %v1428_v28 }
 0x24e   :  { %1886 = vst.msk [vmem:[#allocation3 + $0x50] sm:$0xff] %vm430_vm5, %v3809_v41  ;;  %2184 = vmatmul.bf16.gmra.mxu3 %v1982_v52 }
 0x24f   :  { %1567 = vst.msk [vmem:[#allocation3 + $0x60] sm:$0xff] %vm430_vm5, %v1524_v16  ;;  %1857 = vrot.lane.b32.xlu2 %v3794_v24, %s2824_s29 }
 0x250   :  { %1443 = vrot.lane.b32.xlu1 %v3758_v61, %s2823_s18 }
 0x251   :  { %1347 = vrot.lane.b32.xlu0 %v3760_v44, %s2822_s17  ;;  %v1846_v43 = vpop.permute.xlu2 %1845 }
 0x252   :  { %v1334_v53 = vpop.permute.xlu1 %1333 }
 0x253   :  { %1376 = vst.msk [vmem:[#allocation3 + $0x78] sm:$0xff] %vm236_vm3, %v1334_v53  ;;  %v1654_v34 = vpop.permute.xlu0 %1653 }
 0x254   :  { %1472 = vst.msk [vmem:[#allocation3 + $0x78] sm:$0xff] %vm333_vm4, %v1430_v38  ;;  %2748 = vmatmul.msk.bf16.gmra.mxu0 %vm39_vm0, %v2002_v35 }
 0x255   :  { %1696 = vst.msk [vmem:[#allocation3 + $0x80] sm:$0xff] %vm236_vm3, %v1654_v34  ;;  %v1941_v24 = vld [vmem:[#allocation3 + $0x50] sm:$0xff] }
 0x256   :  { %v1983_v58 = vpack.c.bf16 %v1941_v24, %v1938_v37  ;;  %v1943_v0 = vld [vmem:[#allocation3 + $0x60] sm:$0xff] }
 0x257   :  { %1667 = vrot.lane.b32.xlu2 %v3782_v60, %s2822_s17 }
 0x258   :  { %2233 = vmatmul.bf16.gmra.mxu2 %v1983_v58  ;;  %1765 = vrot.lane.b32.xlu1 %v3846_v27, %s2823_s18 }
 0x259   :  { %1669 = vrot.lane.b32.xlu0 %v3802_v31, %s2822_s17  ;;  %v1656_v44 = vpop.permute.xlu2 %1655 }
 0x25a   :  { %v1844_v61 = vpop.permute.xlu1 %1843  ;;  %1697 = vst.msk [vmem:[#allocation3 + $0x98] sm:$0xff] %vm236_vm3, %v1656_v44 }
 0x25b   :  { %v1748_v56 = vpop.permute.xlu0 %1747 }
 0x25c   :  { %1791 = vst.msk [vmem:[#allocation3 + $0x68] sm:$0xff] %vm333_vm4, %v1748_v56 }
 0x25d   :  { %1887 = vst.msk [vmem:[#allocation3 + $0x68] sm:$0xff] %vm430_vm5, %v1844_v61 }
 0x25f   :  { %1445 = vrot.lane.b32.xlu2 %v3782_v60, %s2823_s18 }
 0x260   :  { %1859 = vrot.lane.b32.xlu1 %v3819_v15, %s2824_s29 }
 0x261   :  { %1763 = vrot.lane.b32.xlu0 %v3823_v11, %s2823_s18  ;;  %v1434_v26 = vpop.permute.xlu2 %1433 }
 0x262   :  { %v1432_v41 = vpop.permute.xlu1 %1431 }
 0x263   :  { %v1526_v30 = vpop.permute.xlu0 %1525 }
 0x264   :  { %1568 = vst.msk [vmem:[#allocation3 + $0x78] sm:$0xff] %vm430_vm5, %v1526_v30  ;;  %v1944_v12 = vld [vmem:[#allocation3 + $0x68] sm:$0xff] }
 0x267   :  { %1539 = vrot.lane.b32.xlu2 %v3815_v59, %s2824_s29 }
 0x268   :  { %1353 = vrot.lane.b32.xlu1 %v3843_v29, %s2822_s17 }
 0x269   :  { %1541 = vrot.lane.b32.xlu0 %v3823_v11, %s2824_s29  ;;  %v1528_v57 = vpop.permute.xlu2 %1527 }
 0x26a   :  { %v1750_v60 = vpop.permute.xlu1 %1749 }
 0x26b   :  { %v1336_v18 = vpop.permute.xlu0 %1335  ;;  %1792 = vst.msk [vmem:[#allocation3 + $0x80] sm:$0xff] %vm333_vm4, %v1750_v60  ;;  %v1946_v47 = vld [vmem:[#allocation3 + $0x78] sm:$0xff] }
 0x26c   :  { %1377 = vst.msk [vmem:[#allocation3 + $0x90] sm:$0xff] %vm236_vm3, %v1336_v18  ;;  %v1985_v9 = vpack.c.bf16 %v1946_v47, %v1943_v0 }
 0x26d   :  { %1473 = vst.msk [vmem:[#allocation3 + $0x90] sm:$0xff] %vm333_vm4, %v1432_v41 }
 0x26e   :  { %1888 = vst.msk [vmem:[#allocation3 + $0x80] sm:$0xff] %vm430_vm5, %v1846_v43  ;;  %2189 = vmatmul.bf16.gmra.mxu3 %v1985_v9 }
 0x26f   :  { %1569 = vst.msk [vmem:[#allocation3 + $0x90] sm:$0xff] %vm430_vm5, %v1528_v57  ;;  %1861 = vrot.lane.b32.xlu2 %v3843_v29, %s2824_s29  ;;  %v1722_v29 = vld [vmem:[#allocation2 + $0x130] sm:$0xff] }
 0x270   :  { %1447 = vrot.lane.b32.xlu1 %v3802_v31, %s2823_s18 }
 0x271   :  { %1351 = vrot.lane.b32.xlu0 %v3819_v15, %s2822_s17  ;;  %v1660_v59 = vpop.permute.xlu2 %1659 }
 0x272   :  { %v1338_v11 = vpop.permute.xlu1 %1337  ;;  %1699 = vst.msk [vmem:[#allocation3 + $0xc8] sm:$0xff] %vm236_vm3, %v1660_v59 }
 0x273   :  { %v1658_v2 = vpop.permute.xlu0 %1657  ;;  %1378 = vst.msk [vmem:[#allocation3 + $0xa8] sm:$0xff] %vm236_vm3, %v1338_v11 }
 0x274   :  { %1474 = vst.msk [vmem:[#allocation3 + $0xa8] sm:$0xff] %vm333_vm4, %v1434_v26 }
 0x275   :  { %v1947_v19 = vld [vmem:[#allocation3 + $0x80] sm:$0xff]  ;;  %1698 = vst.msk [vmem:[#allocation3 + $0xb0] sm:$0xff] %vm236_vm3, %v1658_v2 }
 0x276   :  { %v1986_v40 = vpack.c.bf16 %v1947_v19, %v1944_v12  ;;  %1794 = vst.msk [vmem:[#allocation3 + $0xb0] sm:$0xff] %vm333_vm4, %v3603_v39  ;;  %v1721_v39 = vld [vmem:[#allocation2 + $0x120] sm:$0xff]  ;;  %v1949_v46 = vld [vmem:[#allocation3 + $0x90] sm:$0xff] }
 0x277   :  { %1890 = vst.msk [vmem:[#allocation3 + $0xb0] sm:$0xff] %vm430_vm5, %v3612_v45  ;;  %1671 = vrot.lane.b32.xlu2 %v3831_v1, %s2822_s17 }
 0x278   :  { %2238 = vmatmul.bf16.gmra.mxu2 %v1986_v40  ;;  %1769 = vrot.lane.b32.xlu1 %v1722_v29, %s2823_s18 }
 0x279   :  { %1673 = vrot.lane.b32.xlu0 %v3855_v20, %s2822_s17  ;;  %v1438_v31 = vpop.permute.xlu2 %1437 }
 0x27a   :  { %v1848_v15 = vpop.permute.xlu1 %1847 }
 0x27b   :  { %v1752_v8 = vpop.permute.xlu0 %1751 }
 0x27c   :  { %1793 = vst.msk [vmem:[#allocation3 + $0x98] sm:$0xff] %vm333_vm4, %v1752_v8 }
 0x27d   :  { %1889 = vst.msk [vmem:[#allocation3 + $0x98] sm:$0xff] %vm430_vm5, %v1848_v15 }
 0x27e   :  { %v1953_v38 = vld [vmem:[#allocation3 + $0xb0] sm:$0xff] }
 0x27f   :  { %1449 = vrot.lane.b32.xlu2 %v3831_v1, %s2823_s18 }
 0x280   :  { %1863 = vrot.lane.b32.xlu1 %v3857_v23, %s2824_s29 }
 0x281   :  { %1767 = vrot.lane.b32.xlu0 %v1721_v39, %s2823_s18  ;;  %v1532_v45 = vpop.permute.xlu2 %1531 }
 0x282   :  { %v1342_v62 = vpop.permute.xlu1 %1341  ;;  %1571 = vst.msk [vmem:[#allocation3 + $0xc0] sm:$0xff] %vm430_vm5, %v1532_v45 }
 0x283   :  { %v1530_v20 = vpop.permute.xlu0 %1529  ;;  %1380 = vst.msk [vmem:[#allocation3 + $0xd8] sm:$0xff] %vm236_vm3, %v1342_v62 }
 0x284   :  { %v1950_v28 = vld [vmem:[#allocation3 + $0x98] sm:$0xff]  ;;  %1476 = vst.msk [vmem:[#allocation3 + $0xd8] sm:$0xff] %vm333_vm4, %v1438_v31 }
 0x285   :  { %v1989_v17 = vpack.c.bf16 %v1953_v38, %v1950_v28  ;;  %1570 = vst.msk [vmem:[#allocation3 + $0xa8] sm:$0xff] %vm430_vm5, %v1530_v20 }
 0x287   :  { %1543 = vrot.lane.b32.xlu2 %v3846_v27, %s2824_s29 }
 0x288   :  { %2243 = vmatmul.bf16.gmra.mxu2 %v1989_v17 }
 0x289   :  { %1545 = vrot.lane.b32.xlu0 %v1721_v39, %s2824_s29  ;;  %v1854_v1 = vpop.permute.xlu2 %1853  ;;  %v1955_v58 = vld [vmem:[#allocation3 + $0xc0] sm:$0xff] }
 0x28a   :  { %v1852_v23 = vpop.permute.xlu1 %1851 }
 0x28b   :  { %v1662_v54 = vpop.permute.xlu0 %1661 }
 0x28c   :  { %1700 = vst.msk [vmem:[#allocation3 + $0xe0] sm:$0xff] %vm236_vm3, %v1662_v54  ;;  %v1952_v16 = vld [vmem:[#allocation3 + $0xa8] sm:$0xff] }
 0x28d   :  { %v1988_v48 = vpack.c.bf16 %v1952_v16, %v1949_v46 }
 0x28f   :  { %2194 = vmatmul.bf16.gmra.mxu3 %v1988_v48  ;;  %1865 = vrot.lane.b32.xlu2 %v1818_v21, %s2824_s29  ;;  %v3986_v21 = vpop.f32.mrf.mxu0 }
 0x291   :  { %v1664_v51 = vpop.permute.xlu2 %1663 }
 0x292   :  { %v1440_v52 = vpop.permute.xlu1 %1439  ;;  %1701 = vst.msk [vmem:[#allocation3 + $0xf8] sm:$0xff] %vm236_vm3, %v1664_v51 }
 0x293   :  { %v1756_v36 = vpop.permute.xlu0 %1755 }
 0x294   :  { %1795 = vst.msk [vmem:[#allocation3 + $0xc8] sm:$0xff] %vm333_vm4, %v1756_v36 }
 0x295   :  { %1891 = vst.msk [vmem:[#allocation3 + $0xc8] sm:$0xff] %vm430_vm5, %v1852_v23 }
 0x299   :  { %v1442_v27 = vpop.permute.xlu2 %1441 }
 0x29a   :  { %v1758_v55 = vpop.permute.xlu1 %1757 }
 0x29b   :  { %1796 = vst.msk [vmem:[#allocation3 + $0xe0] sm:$0xff] %vm333_vm4, %v1758_v55  ;;  %v1534_v53 = vpop.permute.xlu0 %1533 }
 0x29c   :  { %1892 = vst.msk [vmem:[#allocation3 + $0xe0] sm:$0xff] %vm430_vm5, %v1854_v1  ;;  %v1956_v37 = vld [vmem:[#allocation3 + $0xc8] sm:$0xff] }
 0x29d   :  { %1572 = vst.msk [vmem:[#allocation3 + $0xd8] sm:$0xff] %vm430_vm5, %v1534_v53 }
 0x2a1   :  { %v1536_v43 = vpop.permute.xlu2 %1535 }
 0x2a2   :  { %v1346_v35 = vpop.permute.xlu1 %1345 }
 0x2a3   :  { %1382 = vst.msk [vmem:[#allocation3 + $0x108] sm:$0xff] %vm236_vm3, %v1346_v35  ;;  %v1344_v34 = vpop.permute.xlu0 %1343  ;;  %v1959_v24 = vld [vmem:[#allocation3 + $0xe0] sm:$0xff] }
 0x2a4   :  { %1478 = vst.msk [vmem:[#allocation3 + $0x108] sm:$0xff] %vm333_vm4, %v1442_v27  ;;  %v1958_v61 = vld [vmem:[#allocation3 + $0xd8] sm:$0xff]  ;;  %v1992_v44 = vpack.c.bf16 %v1959_v24, %v1956_v37 }
 0x2a5   :  { %1381 = vst.msk [vmem:[#allocation3 + $0xf0] sm:$0xff] %vm236_vm3, %v1344_v34  ;;  %v1991_v56 = vpack.c.bf16 %v1958_v61, %v1955_v58 }
 0x2a6   :  { %1477 = vst.msk [vmem:[#allocation3 + $0xf0] sm:$0xff] %vm333_vm4, %v1440_v52  ;;  %2248 = vmatmul.bf16.gmra.mxu2 %v1992_v44  ;;  %v3995_v44 = vpop.f32.mrf.mxu0 }
 0x2a7   :  { %1573 = vst.msk [vmem:[#allocation3 + $0xf0] sm:$0xff] %vm430_vm5, %v1536_v43  ;;  %2199 = vmatmul.bf16.gmra.mxu3 %v1991_v56 }
 0x2a9   :  { %v1858_v41 = vpop.permute.xlu2 %1857 }
 0x2aa   :  { %v1856_v26 = vpop.permute.xlu1 %1855 }
 0x2ab   :  { %v1666_v30 = vpop.permute.xlu0 %1665 }
 0x2ac   :  { %1702 = vst.msk [vmem:[#allocation3 + $0x110] sm:$0xff] %vm236_vm3, %v1666_v30 }
 0x2ae   :  { %v1961_v62 = vld [vmem:[#allocation3 + $0xf0] sm:$0xff] }
 0x2b1   :  { %v1668_v60 = vpop.permute.xlu2 %1667  ;;  %v2180_v0 = vpop.f32.mrf.mxu3 }
 0x2b2   :  { %1703 = vst.msk [vmem:[#allocation3 + $0x128] sm:$0xff] %vm236_vm3, %v1668_v60  ;;  %v1762_v57 = vpop.permute.xlu1 %1761 }
 0x2b3   :  { %v1760_v18 = vpop.permute.xlu0 %1759  ;;  %1798 = vst.msk [vmem:[#allocation3 + $0x110] sm:$0xff] %vm333_vm4, %v1762_v57 }
 0x2b4   :  { %1894 = vst.msk [vmem:[#allocation3 + $0x110] sm:$0xff] %vm430_vm5, %v1858_v41 }
 0x2b5   :  { %1797 = vst.msk [vmem:[#allocation3 + $0xf8] sm:$0xff] %vm333_vm4, %v1760_v18  ;;  %v2283_v18 = vpop.f32.mrf.mxu0 }
 0x2b6   :  { %1893 = vst.msk [vmem:[#allocation3 + $0xf8] sm:$0xff] %vm430_vm5, %v1856_v26 }
 0x2b9   :  { %v1446_v47 = vpop.permute.xlu2 %1445  ;;  %v2182_v29 = vpop.f32.mrf.mxu3 }
 0x2ba   :  { %v1350_v59 = vpop.permute.xlu1 %1349 }
 0x2bb   :  { %v2229_v9 = vpop.f32.mrf.mxu2  ;;  %1384 = vst.msk [vmem:[#allocation3 + $0x138] sm:$0xff] %vm236_vm3, %v1350_v59  ;;  %v1538_v2 = vpop.permute.xlu0 %1537  ;;  %v1965_v12 = vld [vmem:[#allocation3 + $0x110] sm:$0xff] }
 0x2bc   :  { %v3970_v11 = vadd.f32 %v2229_v9, %v2180_v0  ;;  %1480 = vst.msk [vmem:[#allocation3 + $0x138] sm:$0xff] %vm333_vm4, %v1446_v47 }
 0x2bd   :  { %1574 = vst.msk [vmem:[#allocation3 + $0x108] sm:$0xff] %vm430_vm5, %v1538_v2  ;;  %v1962_v19 = vld [vmem:[#allocation3 + $0xf8] sm:$0xff]  ;;  %v2285_v9 = vpop.f32.mrf.mxu0 }
 0x2be   :  { %v1995_v40 = vpack.c.bf16 %v1965_v12, %v1962_v19 }
 0x2c0   :  { %2253 = vmatmul.bf16.gmra.mxu2 %v1995_v40 }
 0x2c1   :  { %v1540_v31 = vpop.permute.xlu2 %1539 }
 0x2c2   :  { %v1444_v8 = vpop.permute.xlu1 %1443 }
 0x2c3   :  { %v2231_v15 = vpop.f32.mrf.mxu2  ;;  %v1348_v45 = vpop.permute.xlu0 %1347 }
 0x2c4   :  { %v3975_v39 = vadd.f32 %v2231_v15, %v2182_v29  ;;  %1383 = vst.msk [vmem:[#allocation3 + $0x120] sm:$0xff] %vm236_vm3, %v1348_v45  ;;  %v1964_v20 = vld [vmem:[#allocation3 + $0x108] sm:$0xff] }
 0x2c5   :  { %1479 = vst.msk [vmem:[#allocation3 + $0x120] sm:$0xff] %vm333_vm4, %v1444_v8  ;;  %v1994_v28 = vpack.c.bf16 %v1964_v20, %v1961_v62  ;;  %v2288_v15 = vpop.f32.mrf.mxu0 }
 0x2c6   :  { %1575 = vst.msk [vmem:[#allocation3 + $0x120] sm:$0xff] %vm430_vm5, %v1540_v31 }
 0x2c7   :  { %2204 = vmatmul.bf16.gmra.mxu3 %v1994_v28 }
 0x2c9   :  { %v1862_v38 = vpop.permute.xlu2 %1861 }
 0x2ca   :  { %v1766_v17 = vpop.permute.xlu1 %1765 }
 0x2cb   :  { %v1670_v1 = vpop.permute.xlu0 %1669 }
 0x2cc   :  { %1704 = vst.msk [vmem:[#allocation3 + $0x140] sm:$0xff] %vm236_vm3, %v1670_v1 }
 0x2cd   :  { %1800 = vst.msk [vmem:[#allocation3 + $0x140] sm:$0xff] %vm333_vm4, %v1766_v17  ;;  %v1967_v56 = vld [vmem:[#allocation3 + $0x120] sm:$0xff]  ;;  %v2290_v17 = vpop.f32.mrf.mxu0 }
 0x2ce   :  { %1896 = vst.msk [vmem:[#allocation3 + $0x140] sm:$0xff] %vm430_vm5, %v1862_v38 }
 0x2d1   :  { %v1672_v23 = vpop.permute.xlu2 %1671  ;;  %v2185_v16 = vpop.f32.mrf.mxu3 }
 0x2d2   :  { %1705 = vst.msk [vmem:[#allocation3 + $0x158] sm:$0xff] %vm236_vm3, %v1672_v23  ;;  %v1860_v54 = vpop.permute.xlu1 %1859 }
 0x2d3   :  { %v1764_v46 = vpop.permute.xlu0 %1763 }
 0x2d4   :  { %1799 = vst.msk [vmem:[#allocation3 + $0x128] sm:$0xff] %vm333_vm4, %v1764_v46 }
 0x2d5   :  { %1895 = vst.msk [vmem:[#allocation3 + $0x128] sm:$0xff] %vm430_vm5, %v1860_v54  ;;  %v1971_v53 = vld [vmem:[#allocation3 + $0x140] sm:$0xff]  ;;  %v2293_v23 = vpop.f32.mrf.mxu0 }
 0x2d9   :  { %v1450_v48 = vpop.permute.xlu2 %1449  ;;  %v2187_v35 = vpop.f32.mrf.mxu3 }
 0x2da   :  { %v1354_v52 = vpop.permute.xlu1 %1353 }
 0x2db   :  { %v2234_v51 = vpop.f32.mrf.mxu2  ;;  %1386 = vst.msk [vmem:[#allocation3 + $0x168] sm:$0xff] %vm236_vm3, %v1354_v52  ;;  %v1542_v27 = vpop.permute.xlu0 %1541 }
 0x2dc   :  { %v3988_v36 = vadd.f32 %v2234_v51, %v2185_v16  ;;  %1482 = vst.msk [vmem:[#allocation3 + $0x168] sm:$0xff] %vm333_vm4, %v1450_v48  ;;  %v1968_v55 = vld [vmem:[#allocation3 + $0x128] sm:$0xff]  ;;  %v2428_v16 = vld [vmem:[%s4291_s7 + $0x18] sm:$0xff] }
 0x2dd   :  { %1576 = vst.msk [vmem:[#allocation3 + $0x138] sm:$0xff] %vm430_vm5, %v1542_v27  ;;  %v1998_v43 = vpack.c.bf16 %v1971_v53, %v1968_v55  ;;  %2451 = vmatpush.msra.mxu3 %v2428_v16  ;;  %v2295_v55 = vpop.f32.mrf.mxu0 }
 0x2df   :  { %2258 = vmatmul.bf16.gmra.mxu2 %v1998_v43  ;;  %v2427_v43 = vld [vmem:[%s4291_s7 + $0x10] sm:$0xff] }
 0x2e0   :  { %2452 = vmatpush.msra.mxu3 %v2427_v43 }
 0x2e1   :  { %v1544_v58 = vpop.permute.xlu2 %1543 }
 0x2e2   :  { %v1448_v37 = vpop.permute.xlu1 %1447 }
 0x2e3   :  { %v2236_v34 = vpop.f32.mrf.mxu2  ;;  %v1352_v61 = vpop.permute.xlu0 %1351 }
 0x2e4   :  { %v3993_v24 = vadd.f32 %v2236_v34, %v2187_v35  ;;  %1385 = vst.msk [vmem:[#allocation3 + $0x150] sm:$0xff] %vm236_vm3, %v1352_v61  ;;  %v1970_v41 = vld [vmem:[#allocation3 + $0x138] sm:$0xff]  ;;  %v2426_v61 = vld [vmem:[%s4291_s7 + $0x8] sm:$0xff] }
 0x2e5   :  { %1481 = vst.msk [vmem:[#allocation3 + $0x150] sm:$0xff] %vm333_vm4, %v1448_v37  ;;  %v1997_v26 = vpack.c.bf16 %v1970_v41, %v1967_v56  ;;  %v2298_v35 = vpop.f32.mrf.mxu0  ;;  %2453 = vmatpush.msra.mxu3 %v2426_v61 }
 0x2e6   :  { %1577 = vst.msk [vmem:[#allocation3 + $0x150] sm:$0xff] %vm430_vm5, %v1544_v58 }
 0x2e7   :  { %2209 = vmatmul.bf16.gmra.mxu3 %v1997_v26 }
 0x2e9   :  { %v1866_v57 = vpop.permute.xlu2 %1865 }
 0x2ea   :  { %v1770_v30 = vpop.permute.xlu1 %1769 }
 0x2eb   :  { %v1674_v60 = vpop.permute.xlu0 %1673 }
 0x2ec   :  { %1706 = vst.msk [vmem:[#allocation3 + $0x170] sm:$0xff] %vm236_vm3, %v1674_v60 }
 0x2ed   :  { %1802 = vst.msk [vmem:[#allocation3 + $0x170] sm:$0xff] %vm333_vm4, %v1770_v30  ;;  %v1973_v20 = vld [vmem:[#allocation3 + $0x150] sm:$0xff]  ;;  %v2300_v58 = vpop.f32.mrf.mxu0 }
 0x2ee   :  { %1898 = vst.msk [vmem:[#allocation3 + $0x170] sm:$0xff] %vm430_vm5, %v1866_v57 }
 0x2f1   :  { %v2190_v59 = vpop.f32.mrf.mxu3 }
 0x2f2   :  { %v1864_v0 = vpop.permute.xlu1 %1863 }
 0x2f3   :  { %v1768_v47 = vpop.permute.xlu0 %1767 }
 0x2f4   :  { %1801 = vst.msk [vmem:[#allocation3 + $0x158] sm:$0xff] %vm333_vm4, %v1768_v47 }
 0x2f5   :  { %1897 = vst.msk [vmem:[#allocation3 + $0x158] sm:$0xff] %vm430_vm5, %v1864_v0  ;;  %v1977_v12 = vld [vmem:[#allocation3 + $0x170] sm:$0xff]  ;;  %v2303_v26 = vpop.f32.mrf.mxu0 }
 0x2f9   :  { %v2192_v8 = vpop.f32.mrf.mxu3 }
 0x2fb   :  { %v2239_v2 = vpop.f32.mrf.mxu2  ;;  %v1546_v40 = vpop.permute.xlu0 %1545 }
 0x2fc   :  { %v2240_v19 = vadd.f32 %v2239_v2, %v2190_v59  ;;  %1578 = vst.msk [vmem:[#allocation3 + $0x168] sm:$0xff] %vm430_vm5, %v1546_v40  ;;  %v1974_v29 = vld [vmem:[#allocation3 + $0x158] sm:$0xff]  ;;  %v2281_v59 = vadd.f32 %v3995_v44, %v3975_v39  ;;  %v2279_v2 = vadd.f32 %v3986_v21, %v3970_v11  ;;  %v2284_v40 = vadd.f32 %v2283_v18, %v3988_v36  ;;  %v4031_v39 = vld [vmem:[%s4290_s6] ss:$0 sm:$0xff] }
 0x2fd   :  { %v2001_v31 = vpack.c.bf16 %v1977_v12, %v1974_v29  ;;  %v2305_v57 = vpop.f32.mrf.mxu0  ;;  %v4022_v12 = vld [vmem:[%s4289_s5] ss:$0 sm:$0xff] }
 0x2fe   :  { %v2323_v29 = vmul.f32 %v4022_v12, %v2281_v59  ;;  %v2324_v11 = vmul.f32 %v4022_v12, %v2284_v40  ;;  %v2425_v36 = vld [vmem:[%s4291_s7] sm:$0xff]  ;;  %v2289_v18 = vadd.f32 %v2288_v15, %v2240_v19 }
 0x2ff   :  { %2263 = vmatmul.bf16.gmra.mxu2 %v2001_v31  ;;  %v2286_v31 = vadd.f32 %v2285_v9, %v3993_v24  ;;  %2454 = vmatpush.msra.mxu3 %v2425_v36 }
 0x300   :  { %v4038_v24 = vadd.f32 %v4031_v39, %v2323_v29 }
 0x301   :  { %v2325_v9 = vmul.f32 %v4022_v12, %v2286_v31 }
 0x303   :  { %v2241_v45 = vpop.f32.mrf.mxu2  ;;  %v1976_v28 = vld [vmem:[#allocation3 + $0x168] sm:$0xff]  ;;  %v4050_v19 = vadd.f32 %v4031_v39, %v2325_v9 }
 0x304   :  { %v2242_v62 = vadd.f32 %v2241_v45, %v2192_v8  ;;  %v2000_v38 = vpack.c.bf16 %v1976_v28, %v1973_v20  ;;  %v2322_v45 = vmul.f32 %v4022_v12, %v2279_v2 }
 0x305   :  { %v2308_v8 = vpop.f32.mrf.mxu0 }
 0x306   :  { %2214 = vmatmul.bf16.gmra.mxu3 %v2000_v38  ;;  %v2291_v20 = vadd.f32 %v2290_v17, %v2242_v62  ;;  %v4042_v28 = vadd.f32 %v4031_v39, %v2322_v45  ;;  %v4045_v38 = vadd.f32 %v4031_v39, %v2324_v11 }
 0x308   :  { %v2327_v15 = vmul.f32 %v4022_v12, %v2291_v20  ;;  %v2358_v62 = vmax.f32 %v4042_v28, 0.0  ;;  %v2360_v17 = vmax.f32 %v4045_v38, 0.0 }
 0x30b   :  { %v2244_v1 = vpop.f32.mrf.mxu2 }
 0x312   :  { %v2195_v54 = vpop.f32.mrf.mxu3 }
 0x313   :  { %v2245_v46 = vadd.f32 %v2244_v1, %v2195_v54  ;;  %v2246_v51 = vpop.f32.mrf.mxu2  ;;  %v2326_v1 = vmul.f32 %v4022_v12, %v2289_v18  ;;  %v2359_v54 = vmax.f32 %v4038_v24, 0.0 }
 0x315   :  { %v2294_v48 = vadd.f32 %v2293_v23, %v2245_v46  ;;  %v2375_v61 = vsel %vm39_vm0, %v2359_v54, 0.0 }
 0x31a   :  { %v2197_v52 = vpop.f32.mrf.mxu3 }
 0x31b   :  { %v2247_v27 = vadd.f32 %v2246_v51, %v2197_v52  ;;  %v2328_v51 = vmul.f32 %v4022_v12, %v2294_v48  ;;  %v2310_v52 = vpop.f32.mrf.mxu0 }
 0x31d   :  { %v2296_v53 = vadd.f32 %v2295_v55, %v2247_v27  ;;  %v4057_v27 = vadd.f32 %v4031_v39, %v2326_v1 }
 0x329   :  { %v2249_v37 = vpop.f32.mrf.mxu2 }
 0x32a   :  { %v2200_v34 = vpop.f32.mrf.mxu3 }
 0x32b   :  { %v2250_v46 = vadd.f32 %v2249_v37, %v2200_v34  ;;  %v2329_v34 = vmul.f32 %v4022_v12, %v2296_v53  ;;  %v2362_v53 = vmax.f32 %v4057_v27, 0.0 }
 0x32d   :  { %v2299_v48 = vadd.f32 %v2298_v35, %v2250_v46  ;;  %v4082_v31 = vadd.f32 %v4031_v39, %v2329_v34 }
 0x32f   :  { %v2330_v11 = vmul.f32 %v4022_v12, %v2299_v48 }
 0x331   :  { %v2251_v41 = vpop.f32.mrf.mxu2 }
 0x332   :  { %v2202_v56 = vpop.f32.mrf.mxu3 }
 0x333   :  { %v2252_v23 = vadd.f32 %v2251_v41, %v2202_v56  ;;  %v2361_v56 = vmax.f32 %v4050_v19, 0.0 }
 0x335   :  { %v2301_v55 = vadd.f32 %v2300_v58, %v2252_v23  ;;  %v2374_v58 = vsel %vm39_vm0, %v2358_v62, 0.0 }
 0x336   :  { %v2376_v35 = vadd.f32 %v2375_v61, %v2374_v58 }
 0x337   :  { %v2331_v2 = vmul.f32 %v4022_v12, %v2301_v55 }
 0x339   :  { %v4092_v9 = vadd.f32 %v4031_v39, %v2331_v2 }
 0x343   :  { %v2254_v30 = vpop.f32.mrf.mxu2 }
 0x34a   :  { %v2205_v60 = vpop.f32.mrf.mxu3 }
 0x34b   :  { %v2256_v0 = vpop.f32.mrf.mxu2  ;;  %v2255_v16 = vadd.f32 %v2254_v30, %v2205_v60  ;;  %v4065_v30 = vadd.f32 %v4031_v39, %v2327_v15  ;;  %v2365_v15 = vmax.f32 %v4082_v31, 0.0 }
 0x34d   :  { %v2304_v60 = vadd.f32 %v2303_v26, %v2255_v16  ;;  %v2379_v26 = vsel %vm39_vm0, %v2361_v56, 0.0  ;;  %v2363_v45 = vmax.f32 %v4065_v30, 0.0  ;;  %v4100_v16 = vadd.f32 %v4031_v39, %v2330_v11 }
 0x34e   :  { %v2387_v58 = vsel %vm39_vm0, %v2365_v15, 0.0 }
 0x352   :  { %v2207_v47 = vpop.f32.mrf.mxu3 }
 0x353   :  { %v2257_v43 = vadd.f32 %v2256_v0, %v2207_v47  ;;  %v2377_v0 = vsel %vm39_vm0, %v2360_v17, 0.0  ;;  %v4074_v47 = vadd.f32 %v4031_v39, %v2328_v51 }
 0x354   :  { %v2378_v36 = vadd.f32 %v2377_v0, %v2376_v35  ;;  %v4302_v0 = vmax.f32 %v4100_v16, 0.0 }
 0x355   :  { %v2306_v40 = vadd.f32 %v2305_v57, %v2257_v43  ;;  %v2364_v18 = vmax.f32 %v4074_v47, 0.0  ;;  %v2381_v57 = vsel %vm39_vm0, %v2362_v53, 0.0  ;;  %v2313_v43 = vpop.f32.mrf.mxu0 }
 0x356   :  { %v2380_v23 = vadd.f32 %v2379_v26, %v2378_v36 }
 0x357   :  { %v2333_v20 = vmul.f32 %v4022_v12, %v2306_v40 }
 0x358   :  { %v2382_v61 = vadd.f32 %v2381_v57, %v2380_v23  ;;  %v2825_v57 = vmov 64.0  }
 0x359   :  { %2811 = vrcp.f32 %v2825_v57 }
 0x362   :  { %v2259_v21 = vpop.f32.mrf.mxu2 }
 0x36a   :  { %v2210_v44 = vpop.f32.mrf.mxu3  ;;  %v2261_v37 = vpop.f32.mrf.mxu2 }
 0x36b   :  { %v2260_v59 = vadd.f32 %v2259_v21, %v2210_v44  ;;  %v2332_v21 = vmul.f32 %v4022_v12, %v2304_v60 }
 0x36d   :  { %v2309_v44 = vadd.f32 %v2308_v8, %v2260_v59  ;;  %v2383_v8 = vsel %vm39_vm0, %v2363_v45, 0.0  ;;  %v4103_v51 = vadd.f32 %v4031_v39, %v2332_v21 }
 0x36e   :  { %v2384_v59 = vadd.f32 %v2383_v8, %v2382_v61 }
 0x36f   :  { %v2334_v55 = vmul.f32 %v4022_v12, %v2309_v44  ;;  %v4300_v2 = vmax.f32 %v4103_v51, 0.0 }
 0x371   :  { %v4120_v40 = vadd.f32 %v4031_v39, %v2334_v55 }
 0x372   :  { %v2212_v41 = vpop.f32.mrf.mxu3 }
 0x373   :  { %v2262_v29 = vadd.f32 %v2261_v37, %v2212_v41  ;;  %v4301_v37 = vmax.f32 %v4092_v9, 0.0  ;;  %v4111_v41 = vadd.f32 %v4031_v39, %v2333_v20  ;;  %v2395_v20 = vsel %vm39_vm0, %v4302_v0, 0.0 }
 0x374   :  { %v4297_v23 = vmax.f32 %v4120_v40, 0.0  ;;  %v4307_v31 = vmax.f32 %v4120_v40, 0.0 }
 0x375   :  { %v2311_v1 = vadd.f32 %v2310_v52, %v2262_v29  ;;  %v2385_v52 = vsel %vm39_vm0, %v2364_v18, 0.0  ;;  %v2396_v26 = vsel %vm39_vm0, %v4301_v37, 0.0  ;;  %v4296_v11 = vmax.f32 %v4111_v41, 0.0 }
 0x376   :  { %v2386_v35 = vadd.f32 %v2385_v52, %v2384_v59  ;;  %v2397_v8 = vadd.f32 %v2396_v26, %v2395_v20  ;;  %v2812_v26 = vpop.eup %2811  ;;  %v4306_v47 = vmax.f32 %v4111_v41, 0.0 }
 0x377   :  { %v2335_v48 = vmul.f32 %v4022_v12, %v2311_v1  ;;  %v2398_v1 = vsel %vm39_vm0, %v4300_v2, 0.0  ;;  %v2400_v61 = vsel %vm39_vm0, %v4296_v11, 0.0  ;;  %vm2421_vm6 = vweird.f32 %v2812_v26 }
 0x378   :  { %v2388_v36 = vadd.f32 %v2387_v58, %v2386_v35  ;;  %v2399_v59 = vadd.f32 %v2398_v1, %v2397_v8  ;;  %v2402_v58 = vsel %vm39_vm0, %v4297_v23, 0.0 }
 0x379   :  { %v4127_v21 = vadd.f32 %v4031_v39, %v2335_v48  ;;  %v2315_v48 = vpop.f32.mrf.mxu0 }
 0x37b   :  { %v4299_v52 = vmax.f32 %v4127_v21, 0.0 }
 0x37d   :  { %v2404_v57 = vsel %vm39_vm0, %v4299_v52, 0.0 }
 0x382   :  { %v2264_v46 = vpop.f32.mrf.mxu2 }
 0x389   :  { %v2215_v34 = vpop.f32.mrf.mxu3 }
 0x38a   :  { %v2265_v60 = vadd.f32 %v2264_v46, %v2215_v34  ;;  %v2266_v55 = vpop.f32.mrf.mxu2 }
 0x38c   :  { %v2314_v29 = vadd.f32 %v2313_v43, %v2265_v60  ;;  %v2389_v60 = vrot.slane %v2388_v36, 4 }
 0x38e   :  { %v2336_v44 = vmul.f32 %v4022_v12, %v2314_v29  ;;  %v2390_v11 = vadd.f32 %v2389_v60, %v2388_v36 }
 0x390   :  { %v4138_v46 = vadd.f32 %v4031_v39, %v2336_v44  ;;  %v2401_v44 = vadd.f32 %v2400_v61, %v2399_v59  ;;  %v2391_v61 = vrot.slane %v2390_v11, 2 }
 0x391   :  { %v2217_v43 = vpop.f32.mrf.mxu3 }
 0x392   :  { %v2267_v34 = vadd.f32 %v2266_v55, %v2217_v43  ;;  %v4298_v29 = vmax.f32 %v4138_v46, 0.0  ;;  %v2403_v55 = vadd.f32 %v2402_v58, %v2401_v44  ;;  %v2417_v43 = vmul.f32 64.0, %v2812_v26 }
 0x393   :  { %v2392_v60 = vadd.f32 %v2391_v61, %v2390_v11  ;;  %v2809_v11 = vld [vmem:[%s4292_s8] ss:$0 sm:$0xff] }
 0x394   :  { %v2316_v35 = vadd.f32 %v2315_v48, %v2267_v34  ;;  %v2406_v1 = vsel %vm39_vm0, %v4298_v29, 0.0  ;;  %v2405_v23 = vadd.f32 %v2404_v57, %v2403_v55 }
 0x395   :  { %v2393_v52 = vrot.slane %v2392_v60, 1 }
 0x396   :  { %v2337_v20 = vmul.f32 %v4022_v12, %v2316_v35  ;;  %v2407_v48 = vadd.f32 %v2406_v1, %v2405_v23  ;;  %v2418_v12 = vsub.f32 1.0, %v2417_v43  ;;  %v2479_v43 = vld [vmem:[%s4294_s9] sm:$0xf] }
 0x397   :  { %v2394_v57 = vadd.f32 %v2393_v52, %v2392_v60  ;;  %2751 = vmatpush.msk.msrb.mxu3 %vm2488_vm8, %v2479_v43 }
 0x398   :  { %v4156_v8 = vadd.f32 %v4031_v39, %v2337_v20  ;;  %v2419_v35 = vmul.f32 %v2812_v26, %v2418_v12 }
 0x39a   :  { %v2373_v34 = vmax.f32 %v4156_v8, 0.0  ;;  %v2420_v39 = vadd.f32 %v2812_v26, %v2419_v35 }
 0x39c   :  { %v2408_v59 = vsel %vm39_vm0, %v2373_v34, 0.0  ;;  %v2422_v2 = vsel %vm2421_vm6, %v2812_v26, %v2420_v39 }
 0x39d   :  { %v2409_v36 = vadd.f32 %v2408_v59, %v2407_v48  ;;  %v2423_v23 = vmul.f32 %v2422_v2, %v2394_v57 }
 0x39f   :  { %v2410_v58 = vrot.slane %v2409_v36, 4 }
 0x3a1   :  { %v2411_v44 = vadd.f32 %v2410_v58, %v2409_v36 }
 0x3a3   :  { %v2412_v29 = vrot.slane %v2411_v44, 2 }
 0x3a5   :  { %v2413_v20 = vadd.f32 %v2412_v29, %v2411_v44 }
 0x3a7   :  { %v2414_v55 = vrot.slane %v2413_v20, 1 }
 0x3a9   :  { %v2415_v37 = vadd.f32 %v2414_v55, %v2413_v20  ;;  %v2810_v20 = vld [vmem:[%s4293_s10] ss:$0 sm:$0xff] }
 0x3ab   :  { %v2424_v1 = vmul.f32 %v2422_v2, %v2415_v37 }
 0x3ad   :  { %v2436_v0 = vsel %vm2435_vm7, %v2424_v1, %v2423_v23 }
 0x3ae   :  { %2749 = vmatmul.msk.f32.vlgmr.msra.gmra.mxu3 %vm39_vm0, %v2436_v0 }
 0x431   :  { %v2456_v29 = vpop.f32.mrf.mxu3 }
 0x432   :  { %v2457_v52 = vadd.f32 %v2809_v11, %v2456_v29 }
 0x434   :  { %v2750_v26 = vmul.f32 -1.442695, %v2457_v52 }
 0x436   :  { %2813 = vpow2.f32 %v2750_v26 }
 0x43c   :  { %v2814_v61 = vpop.eup %2813 }
 0x43d   :  { %v2462_v48 = vadd.f32 1.0, %v2814_v61 }
 0x43f   :  { %2815 = vrcp.f32 %v2462_v48  ;;  %v2474_v59 = vand.u32 2147483648, %v2462_v48  ;;  %v2472_v36 = vand.u32 2147483647, %v2462_v48  ;;  %vm2468_vm10 = vweird.f32 %v2462_v48 }
 0x441   :  { %v2475_v58 = vor.u32 1.1754944e-38, %v2474_v59  ;;  %vm2473_vm12 = vcmp.eq.f32.partialorder %v2472_v36, 8.507059e+37 }
 0x445   :  { %v2816_v37 = vpop.eup %2815 }
 0x446   :  { %v2464_v2 = vmul.f32 %v2816_v37, %v2462_v48  ;;  %vm2469_vm9 = vweird.f32 %v2816_v37 }
 0x447   :  { %vm2470_vm11 = vmor %vm2468_vm10, %vm2469_vm9 }
 0x448   :  { %v2465_v0 = vsub.f32 1.0, %v2464_v2 }
 0x44a   :  { %v2466_v12 = vmul.f32 %v2816_v37, %v2465_v0 }
 0x44c   :  { %v2467_v60 = vadd.f32 %v2816_v37, %v2466_v12 }
 0x44e   :  { %v2471_v35 = vsel %vm2470_vm11, %v2816_v37, %v2467_v60 }
 0x44f   :  { %v2476_v44 = vsel %vm2473_vm12, %v2475_v58, %v2471_v35 }
 0x450   :  { %v2478_v39 = vmul.f32 %v2476_v44, %v2457_v52 }
 0x452   :  { %2752 = vmatmul.msk.f32.vlgmr.msrb.gmra.mxu3 %vm2484_vm13, %v2478_v39 }
 0x4d5   :  { %v2509_v57 = vpop.f32.mrf.mxu3 }
 0x4d6   :  { %v2510_v55 = vadd.f32 %v2810_v20, %v2509_v57 }
 0x4d8   :  { %v2753_v23 = vmul.f32 -1.442695, %v2510_v55 }
 0x4da   :  { %2817 = vpow2.f32 %v2753_v23 }
 0x4e0   :  { %v2818_v1 = vpop.eup %2817 }
 0x4e1   :  { %v2515_v11 = vadd.f32 1.0, %v2818_v1 }
 0x4e3   :  { %2819 = vrcp.f32 %v2515_v11  ;;  %v2527_v61 = vand.u32 2147483648, %v2515_v11  ;;  %v2525_v37 = vand.u32 2147483647, %v2515_v11  ;;  %vm2521_vm15 = vweird.f32 %v2515_v11 }
 0x4e5   :  { %v2528_v2 = vor.u32 1.1754944e-38, %v2527_v61  ;;  %vm2526_vm2 = vcmp.eq.f32.partialorder %v2525_v37, 8.507059e+37 }
 0x4e9   :  { %v2820_v43 = vpop.eup %2819 }
 0x4ea   :  { %v2517_v29 = vmul.f32 %v2820_v43, %v2515_v11  ;;  %vm2522_vm14 = vweird.f32 %v2820_v43 }
 0x4eb   :  { %vm2523_vm1 = vmor %vm2521_vm15, %vm2522_vm14 }
 0x4ec   :  { %v2518_v26 = vsub.f32 1.0, %v2517_v29 }
 0x4ee   :  { %v2519_v48 = vmul.f32 %v2820_v43, %v2518_v26 }
 0x4f0   :  { %v2520_v52 = vadd.f32 %v2820_v43, %v2519_v48 }
 0x4f2   :  { %v2524_v0 = vsel %vm2523_vm1, %v2820_v43, %v2520_v52 }
 0x4f3   :  { %v2529_v59 = vsel %vm2526_vm2, %v2528_v2, %v2524_v0 }
 0x4f4   :  { %v2532_v12 = vrot.slane %v2529_v59, 1  ;;  %v2533_v36 = vperm.slane %v2529_v59, 0 }
 0x4f6   :  { %v2537_v60 = vmul.f32 %v2533_v36, %v2358_v62  ;;  %v2538_v58 = vmul.f32 %v2533_v36, %v2359_v54  ;;  %v2539_v35 = vmul.f32 %v2533_v36, %v2360_v17  ;;  %v2540_v44 = vmul.f32 %v2533_v36, %v2361_v56 }
 0x4f7   :  { %v2534_v39 = vperm.slane %v2532_v12, 0  ;;  %v2541_v20 = vmul.f32 %v2533_v36, %v2362_v53  ;;  %v2542_v57 = vmul.f32 %v2533_v36, %v2363_v45  ;;  %v2543_v28 = vmul.f32 %v2533_v36, %v2364_v18 }
 0x4f8   :  { %v2553_v62 = vadd.f32 %v2537_v60, %v3029_v22  ;;  %v2554_v24 = vadd.f32 %v2538_v58, %v3042_v25  ;;  %v2555_v38 = vadd.f32 %v2539_v35, %v3081_v33  ;;  %v2544_v54 = vmul.f32 %v2533_v36, %v2365_v15 }
 0x4f9   :  { %v2556_v19 = vadd.f32 %v2540_v44, %v3122_v42  ;;  %v4303_v17 = vmax.f32 %v4100_v16, 0.0  ;;  %v2557_v56 = vadd.f32 %v2541_v20, %v3148_v50  ;;  %v4304_v22 = vmax.f32 %v4092_v9, 0.0 }
 0x4fa   :  { %2569 = vst.msk [vmem:[%s4295_s11] sm:$0xff] %vm39_vm0, %v2553_v62  ;;  %v2558_v33 = vadd.f32 %v2542_v57, %v3197_v63  ;;  %v4305_v42 = vmax.f32 %v4103_v51, 0.0  ;;  %v2559_v50 = vadd.f32 %v2543_v28, %v3217_v10  ;;  %v2548_v53 = vmul.f32 %v2534_v39, %v4306_v47 }
 0x4fb   :  { %v2545_v27 = vmul.f32 %v2534_v39, %v4303_v17  ;;  %v2546_v25 = vmul.f32 %v2534_v39, %v4304_v22  ;;  %2570 = vst.msk [vmem:[%s4295_s11 + $0x8] sm:$0xff] %vm39_vm0, %v2554_v24  ;;  %v2560_v63 = vadd.f32 %v2544_v54, %v3260_v49  ;;  %v2549_v45 = vmul.f32 %v2534_v39, %v4307_v31 }
 0x4fc   :  { %v2547_v30 = vmul.f32 %v2534_v39, %v4305_v42  ;;  %2571 = vst.msk [vmem:[%s4295_s11 + $0x10] sm:$0xff] %vm39_vm0, %v2555_v38  ;;  %v4308_v18 = vmax.f32 %v4127_v21, 0.0  ;;  %v4309_v15 = vmax.f32 %v4138_v46, 0.0  ;;  %v2552_v51 = vmul.f32 %v2534_v39, %v2373_v34 }
 0x4fd   :  { %2572 = vst.msk [vmem:[%s4295_s11 + $0x18] sm:$0xff] %vm39_vm0, %v2556_v19  ;;  %v2561_v10 = vadd.f32 %v2545_v27, %v2933_v3  ;;  %v2562_v49 = vadd.f32 %v2546_v25, %v2939_v4  ;;  %v2564_v4 = vadd.f32 %v2548_v53, %v2952_v6  ;;  %v2565_v41 = vadd.f32 %v2549_v45, %v2959_v7 }
 0x4fe   :  { %2573 = vst.msk [vmem:[%s4295_s11 + $0x20] sm:$0xff] %vm39_vm0, %v2557_v56  ;;  %v2550_v9 = vmul.f32 %v2534_v39, %v4308_v18  ;;  %v2551_v16 = vmul.f32 %v2534_v39, %v4309_v15  ;;  %v2563_v3 = vadd.f32 %v2547_v30, %v2945_v5  ;;  %v2568_v7 = vadd.f32 %v2552_v51, %v3076_v32 }
 0x4ff   :  { %2574 = vst.msk [vmem:[%s4295_s11 + $0x28] sm:$0xff] %vm39_vm0, %v2558_v33 }
 0x500   :  { %2575 = vst.msk [vmem:[%s4295_s11 + $0x30] sm:$0xff] %vm39_vm0, %v2559_v50  ;;  %v2566_v5 = vadd.f32 %v2550_v9, %v2983_v13  ;;  %v2567_v6 = vadd.f32 %v2551_v16, %v2988_v14 }
 0x501   :  { %2576 = vst.msk [vmem:[%s4295_s11 + $0x38] sm:$0xff] %vm39_vm0, %v2560_v63 }
 0x502   :  { %2577 = vst.msk [vmem:[%s4295_s11 + $0x40] sm:$0xff] %vm39_vm0, %v2561_v10 }
 0x503   :  { %2578 = vst.msk [vmem:[%s4295_s11 + $0x48] sm:$0xff] %vm39_vm0, %v2562_v49 }
 0x504   :  { %2579 = vst.msk [vmem:[%s4295_s11 + $0x50] sm:$0xff] %vm39_vm0, %v2563_v3 }
 0x505   :  { %2580 = vst.msk [vmem:[%s4295_s11 + $0x58] sm:$0xff] %vm39_vm0, %v2564_v4 }
 0x506   :  { %2581 = vst.msk [vmem:[%s4295_s11 + $0x60] sm:$0xff] %vm39_vm0, %v2565_v41 }
 0x507   :  { %2582 = vst.msk [vmem:[%s4295_s11 + $0x68] sm:$0xff] %vm39_vm0, %v2566_v5 }
 0x508   :  { %2583 = vst.msk [vmem:[%s4295_s11 + $0x70] sm:$0xff] %vm39_vm0, %v2567_v6 }
 0x509   :  { %2584 = vst.msk [vmem:[%s4295_s11 + $0x78] sm:$0xff] %vm39_vm0, %v2568_v7 }

</bundles_post_ra>
